<compile_context>
chip_gen: v7x
topology: tpu7x:2x2x1
jax: 0.10.0
libtpu: 0.0.40
codegen_flags: <defaults>
</compile_context>

<pallas_src>
import jax
import jax.numpy as jnp
from jax.experimental import pallas as pl
from jax.experimental.pallas import tpu as pltpu


def _round_up(x, m):
    return (x + m - 1) // m * m


def _double_conv_kernel(xp_ref, w1_ref, b1_ref, w2_ref, b2_ref, out_ref):
    # xp_ref : (1, H+2, W+2, Cin_p)   bf16, reflect-padded NHWC input image
    # w1_ref : (9, Cin_p, Cout_p)     bf16, BN1-scale-folded conv1 weights
    # b1_ref : (1, Cout_p)            f32,  folded BN1 bias
    # w2_ref : (9, Cout_p, Cout_p)    bf16, BN2-scale-folded conv2 weights
    # b2_ref : (1, Cout_p)            f32,  folded BN2 bias
    # out_ref: (1, Cout, H*W)         f32,  transposed (lane-dense) output
    _, hp, wp, cin_p = xp_ref.shape
    h, w = hp - 2, wp - 2
    cout_p = w1_ref.shape[-1]
    cout = out_ref.shape[1]
    hw = h * w

    x = xp_ref[0]                                     # (H+2, W+2, Cin_p) bf16

    # ---- stage 1: conv1 (BN1 scale folded) + folded bias + LeakyReLU -------
    acc = jnp.broadcast_to(b1_ref[...], (hw, cout_p)).astype(jnp.float32)
    for dy in range(3):
        for dx in range(3):
            xs = x[dy:dy + h, dx:dx + w, :].reshape(hw, cin_p)
            acc = acc + jnp.dot(xs, w1_ref[dy * 3 + dx],
                                preferred_element_type=jnp.float32)
    # TODO(synk): Dropout2d(0.3) is stochastic channel masking in training;
    # here it is the eval-mode identity (deterministic forward).
    y = jnp.where(acc >= 0, acc, 0.01 * acc)          # LeakyReLU(0.01)
    y1 = y.reshape(h, w, cout_p).astype(jnp.bfloat16)

    # In-VMEM reflect pad of y1 by 1 (matches torch padding_mode='reflect').
    y1 = jnp.concatenate([y1[:, 1:2], y1, y1[:, w - 2:w - 1]], axis=1)
    y1 = jnp.concatenate([y1[1:2], y1, y1[h - 2:h - 1]], axis=0)  # (H+2, W+2, Cout_p)

    # ---- stage 2: conv2 (BN2 scale folded) + folded bias + LeakyReLU -------
    acc2 = jnp.broadcast_to(b2_ref[...], (hw, cout_p)).astype(jnp.float32)
    for dy in range(3):
        for dx in range(3):
            ys = y1[dy:dy + h, dx:dx + w, :].reshape(hw, cout_p)
            acc2 = acc2 + jnp.dot(ys, w2_ref[dy * 3 + dx],
                                  preferred_element_type=jnp.float32)
    z = jnp.where(acc2 >= 0, acc2, 0.01 * acc2)       # LeakyReLU(0.01)

    # Lane-dense, exact-size store: (Cout, H*W) with H*W on the lane axis.
    out_ref[0] = jnp.transpose(z)[:cout, :].astype(out_ref.dtype)


def _prep_weights(w, gamma, beta, mean, var, cin_pad, cout_pad, eps=1e-5):
    # w: torch layout (Cout, Cin, 3, 3).  Fold BN (eval) scale into the weights
    # and return (9, Cin_pad, Cout_pad) bf16 + (1, Cout_pad) f32 bias.
    cout, cin = w.shape[0], w.shape[1]
    scale = gamma / jnp.sqrt(var + eps)                       # (Cout,)
    bias = beta - mean * scale                                # (Cout,)
    w = w * scale[:, None, None, None]
    w = jnp.transpose(w, (2, 3, 1, 0)).reshape(9, cin, cout)  # k = ky*3 + kx
    w = jnp.pad(w, ((0, 0), (0, cin_pad - cin), (0, cout_pad - cout)))
    b = jnp.pad(bias, (0, cout_pad - cout)).reshape(1, cout_pad)
    return w.astype(jnp.bfloat16), b.astype(jnp.float32)


@jax.jit
def double_conv(x_nchw, params):
    n, cin, h, w = x_nchw.shape
    cout = params["w1"].shape[0]
    cin_p = _round_up(cin, 8)
    cout_p = _round_up(cout, 128)
    hp, wp, hw = h + 2, w + 2, h * w

    # NCHW -> NHWC, reflect pad, channel zero-pad, bf16 cast (one fused XLA
    # pass).  Interface kept NCHW to match the PyTorch module; callers that can
    # supply NHWC could skip this transpose.
    x = jnp.transpose(x_nchw, (0, 2, 3, 1))
    xp = jnp.pad(x, ((0, 0), (1, 1), (1, 1), (0, 0)), mode="reflect")
    xp = jnp.pad(xp, ((0, 0), (0, 0), (0, 0), (0, cin_p - cin)))
    xp = xp.astype(jnp.bfloat16)

    w1, b1 = _prep_weights(params["w1"], params["g1"], params["b1"],
                           params["m1"], params["v1"], cin_p, cout_p)
    w2, b2 = _prep_weights(params["w2"], params["g2"], params["b2"],
                           params["m2"], params["v2"], cout_p, cout_p)

    out = pl.pallas_call(
        _double_conv_kernel,
        out_shape=jax.ShapeDtypeStruct((n, cout, hw), jnp.float32),
        grid_spec=pltpu.PrefetchScalarGridSpec(
            num_scalar_prefetch=0,
            grid=(n,),
            in_specs=[
                pl.BlockSpec((1, hp, wp, cin_p), lambda i: (i, 0, 0, 0)),
                pl.BlockSpec((9, cin_p, cout_p), lambda i: (0, 0, 0)),
                pl.BlockSpec((1, cout_p), lambda i: (0, 0)),
                pl.BlockSpec((9, cout_p, cout_p), lambda i: (0, 0, 0)),
                pl.BlockSpec((1, cout_p), lambda i: (0, 0)),
            ],
            out_specs=pl.BlockSpec((1, cout, hw), lambda i: (i, 0, 0)),
        ),
        compiler_params=pltpu.CompilerParams(
            dimension_semantics=("parallel",),
            vmem_limit_bytes=32 * 1024 * 1024,
        ),
    )(xp, w1, b1, w2, b2)

    # (N, Cout, H*W) -> (N, Cout, H, W): free, contiguous reshape.
    return out.reshape(n, cout, h, w)


def _reference_double_conv(x, params, eps=1e-5):
    # Pure-JAX f32 reference (eval-mode forward of the PyTorch module).
    def stage(x, w, g, b, m, v):
        xp = jnp.pad(x, ((0, 0), (0, 0), (1, 1), (1, 1)), mode="reflect")
        y = jax.lax.conv_general_dilated(
            xp, w, window_strides=(1, 1), padding="VALID",
            dimension_numbers=("NCHW", "OIHW", "NCHW"),
            precision=jax.lax.Precision.HIGHEST)
        s = g / jnp.sqrt(v + eps)
        y = y * s[None, :, None, None] + (b - m * s)[None, :, None, None]
        return jnp.where(y >= 0, y, 0.01 * y)

    y = stage(x, params["w1"], params["g1"], params["b1"], params["m1"], params["v1"])
    return stage(y, params["w2"], params["g2"], params["b2"], params["m2"], params["v2"])


def init_params(key, in_channel, out_channel):
    ks = jax.random.split(key, 10)

    def conv_w(k, ci, co):
        fan_in = ci * 9
        bound = 1.0 / jnp.sqrt(fan_in)
        return jax.random.uniform(k, (co, ci, 3, 3), jnp.float32, -bound, bound)

    return {
        "w1": conv_w(ks[0], in_channel, out_channel),
        "g1": jax.random.uniform(ks[1], (out_channel,), jnp.float32, 0.5, 1.5),
        "b1": jax.random.normal(ks[2], (out_channel,), jnp.float32) * 0.1,
        "m1": jax.random.normal(ks[3], (out_channel,), jnp.float32) * 0.1,
        "v1": jax.random.uniform(ks[4], (out_channel,), jnp.float32, 0.5, 1.5),
        "w2": conv_w(ks[5], out_channel, out_channel),
        "g2": jax.random.uniform(ks[6], (out_channel,), jnp.float32, 0.5, 1.5),
        "b2": jax.random.normal(ks[7], (out_channel,), jnp.float32) * 0.1,
        "m2": jax.random.normal(ks[8], (out_channel,), jnp.float32) * 0.1,
        "v2": jax.random.uniform(ks[9], (out_channel,), jnp.float32, 0.5, 1.5),
    }


if __name__ == "__main__":
    key = jax.random.PRNGKey(0)
    k_x, k_p = jax.random.split(key)

    N, Cin, Cout, H, W = 2, 4, 8, 16, 16
    x = jax.random.normal(k_x, (N, Cin, H, W), jnp.float32)
    params = init_params(k_p, Cin, Cout)

    out = jax.block_until_ready(double_conv(x, params))
    assert out.shape == (N, Cout, H, W), out.shape
    assert bool(jnp.all(jnp.isfinite(out)))

    # Correctness vs. f32 reference (bf16 matmul tolerance).
    ref = jax.block_until_ready(_reference_double_conv(x, params))
    max_err = float(jnp.max(jnp.abs(out - ref)))
    assert max_err < 1e-1, f"max abs error vs reference: {max_err}"

    print("KERNEL_OK")
</pallas_src>

<mosaic_0001>
module attributes {stable_mosaic.version = 11 : i64} {
  func.func @_double_conv_kernel(%arg0: i32, %arg1: memref<1x18x18x8xbf16, #tpu.memory_space<vmem>>, %arg2: memref<9x8x128xbf16, #tpu.memory_space<vmem>>, %arg3: memref<1x128xf32, #tpu.memory_space<vmem>>, %arg4: memref<9x128x128xbf16, #tpu.memory_space<vmem>>, %arg5: memref<1x128xf32, #tpu.memory_space<vmem>>, %arg6: memref<1x8x256xf32, #tpu.memory_space<vmem>>) attributes {dimension_semantics = [#tpu.dimension_semantics<parallel>], iteration_bounds = array<i64: 2>, scalar_prefetch = 0 : i64, scratch_operands = 0 : i64, tpu.core_type = #tpu.core_type<tc>, window_params = [{transform_indices = @transform_0, window_bounds = array<i64: 1, 18, 18, 8>}, {pipeline_mode = #tpu.pipeline_mode<synchronous>, transform_indices = @transform_1, window_bounds = array<i64: 9, 8, 128>}, {pipeline_mode = #tpu.pipeline_mode<synchronous>, transform_indices = @transform_2, window_bounds = array<i64: 1, 128>}, {pipeline_mode = #tpu.pipeline_mode<synchronous>, transform_indices = @transform_3, window_bounds = array<i64: 9, 128, 128>}, {pipeline_mode = #tpu.pipeline_mode<synchronous>, transform_indices = @transform_4, window_bounds = array<i64: 1, 128>}, {transform_indices = @transform_5, window_bounds = array<i64: 1, 8, 256>}]} {
    %c0 = arith.constant 0 : index
    %c0_0 = arith.constant 0 : index
    %c0_1 = arith.constant 0 : index
    %c0_2 = arith.constant 0 : index
    %0 = vector.load %arg1[%c0, %c0_0, %c0_1, %c0_2] : memref<1x18x18x8xbf16, #tpu.memory_space<vmem>>, vector<1x18x18x8xbf16>
    %1 = vector.shape_cast %0 : vector<1x18x18x8xbf16> to vector<18x18x8xbf16>
    %c0_3 = arith.constant 0 : index
    %c0_4 = arith.constant 0 : index
    %2 = vector.load %arg3[%c0_3, %c0_4] : memref<1x128xf32, #tpu.memory_space<vmem>>, vector<1x128xf32>
    %3 = vector.shape_cast %2 : vector<1x128xf32> to vector<1x128xf32>
    %4 = vector.broadcast %3 : vector<1x128xf32> to vector<256x128xf32>
    %5 = vector.extract_strided_slice %1 {offsets = [0, 0, 0], sizes = [16, 16, 8], strides = [1, 1, 1]} : vector<18x18x8xbf16> to vector<16x16x8xbf16>
    %6 = vector.shape_cast %5 : vector<16x16x8xbf16> to vector<256x8xbf16>
    %c0_5 = arith.constant 0 : index
    %c0_6 = arith.constant 0 : index
    %c0_7 = arith.constant 0 : index
    %7 = vector.load %arg2[%c0_5, %c0_6, %c0_7] : memref<9x8x128xbf16, #tpu.memory_space<vmem>>, vector<1x8x128xbf16>
    %8 = vector.shape_cast %7 : vector<1x8x128xbf16> to vector<8x128xbf16>
    %cst = arith.constant dense<0.000000e+00> : vector<256x128xf32>
    %9 = tpu.matmul %6, %8, %cst {dimension_numbers = #tpu.dot_dimension_numbers<[1], [0], [0], [1], [0, 0, 1, 1], [], []>} : vector<256x8xbf16>, vector<8x128xbf16>, vector<256x128xf32> -> vector<256x128xf32>
    %10 = arith.addf %4, %9 : vector<256x128xf32>
    %11 = vector.extract_strided_slice %1 {offsets = [0, 1, 0], sizes = [16, 16, 8], strides = [1, 1, 1]} : vector<18x18x8xbf16> to vector<16x16x8xbf16>
    %12 = vector.shape_cast %11 : vector<16x16x8xbf16> to vector<256x8xbf16>
    %c1 = arith.constant 1 : index
    %c0_8 = arith.constant 0 : index
    %c0_9 = arith.constant 0 : index
    %13 = vector.load %arg2[%c1, %c0_8, %c0_9] : memref<9x8x128xbf16, #tpu.memory_space<vmem>>, vector<1x8x128xbf16>
    %14 = vector.shape_cast %13 : vector<1x8x128xbf16> to vector<8x128xbf16>
    %cst_10 = arith.constant dense<0.000000e+00> : vector<256x128xf32>
    %15 = tpu.matmul %12, %14, %cst_10 {dimension_numbers = #tpu.dot_dimension_numbers<[1], [0], [0], [1], [0, 0, 1, 1], [], []>} : vector<256x8xbf16>, vector<8x128xbf16>, vector<256x128xf32> -> vector<256x128xf32>
    %16 = arith.addf %10, %15 : vector<256x128xf32>
    %17 = vector.extract_strided_slice %1 {offsets = [0, 2, 0], sizes = [16, 16, 8], strides = [1, 1, 1]} : vector<18x18x8xbf16> to vector<16x16x8xbf16>
    %18 = vector.shape_cast %17 : vector<16x16x8xbf16> to vector<256x8xbf16>
    %c2 = arith.constant 2 : index
    %c0_11 = arith.constant 0 : index
    %c0_12 = arith.constant 0 : index
    %19 = vector.load %arg2[%c2, %c0_11, %c0_12] : memref<9x8x128xbf16, #tpu.memory_space<vmem>>, vector<1x8x128xbf16>
    %20 = vector.shape_cast %19 : vector<1x8x128xbf16> to vector<8x128xbf16>
    %cst_13 = arith.constant dense<0.000000e+00> : vector<256x128xf32>
    %21 = tpu.matmul %18, %20, %cst_13 {dimension_numbers = #tpu.dot_dimension_numbers<[1], [0], [0], [1], [0, 0, 1, 1], [], []>} : vector<256x8xbf16>, vector<8x128xbf16>, vector<256x128xf32> -> vector<256x128xf32>
    %22 = arith.addf %16, %21 : vector<256x128xf32>
    %23 = vector.extract_strided_slice %1 {offsets = [1, 0, 0], sizes = [16, 16, 8], strides = [1, 1, 1]} : vector<18x18x8xbf16> to vector<16x16x8xbf16>
    %24 = vector.shape_cast %23 : vector<16x16x8xbf16> to vector<256x8xbf16>
    %c3 = arith.constant 3 : index
    %c0_14 = arith.constant 0 : index
    %c0_15 = arith.constant 0 : index
    %25 = vector.load %arg2[%c3, %c0_14, %c0_15] : memref<9x8x128xbf16, #tpu.memory_space<vmem>>, vector<1x8x128xbf16>
    %26 = vector.shape_cast %25 : vector<1x8x128xbf16> to vector<8x128xbf16>
    %cst_16 = arith.constant dense<0.000000e+00> : vector<256x128xf32>
    %27 = tpu.matmul %24, %26, %cst_16 {dimension_numbers = #tpu.dot_dimension_numbers<[1], [0], [0], [1], [0, 0, 1, 1], [], []>} : vector<256x8xbf16>, vector<8x128xbf16>, vector<256x128xf32> -> vector<256x128xf32>
    %28 = arith.addf %22, %27 : vector<256x128xf32>
    %29 = vector.extract_strided_slice %1 {offsets = [1, 1, 0], sizes = [16, 16, 8], strides = [1, 1, 1]} : vector<18x18x8xbf16> to vector<16x16x8xbf16>
    %30 = vector.shape_cast %29 : vector<16x16x8xbf16> to vector<256x8xbf16>
    %c4 = arith.constant 4 : index
    %c0_17 = arith.constant 0 : index
    %c0_18 = arith.constant 0 : index
    %31 = vector.load %arg2[%c4, %c0_17, %c0_18] : memref<9x8x128xbf16, #tpu.memory_space<vmem>>, vector<1x8x128xbf16>
    %32 = vector.shape_cast %31 : vector<1x8x128xbf16> to vector<8x128xbf16>
    %cst_19 = arith.constant dense<0.000000e+00> : vector<256x128xf32>
    %33 = tpu.matmul %30, %32, %cst_19 {dimension_numbers = #tpu.dot_dimension_numbers<[1], [0], [0], [1], [0, 0, 1, 1], [], []>} : vector<256x8xbf16>, vector<8x128xbf16>, vector<256x128xf32> -> vector<256x128xf32>
    %34 = arith.addf %28, %33 : vector<256x128xf32>
    %35 = vector.extract_strided_slice %1 {offsets = [1, 2, 0], sizes = [16, 16, 8], strides = [1, 1, 1]} : vector<18x18x8xbf16> to vector<16x16x8xbf16>
    %36 = vector.shape_cast %35 : vector<16x16x8xbf16> to vector<256x8xbf16>
    %c5 = arith.constant 5 : index
    %c0_20 = arith.constant 0 : index
    %c0_21 = arith.constant 0 : index
    %37 = vector.load %arg2[%c5, %c0_20, %c0_21] : memref<9x8x128xbf16, #tpu.memory_space<vmem>>, vector<1x8x128xbf16>
    %38 = vector.shape_cast %37 : vector<1x8x128xbf16> to vector<8x128xbf16>
    %cst_22 = arith.constant dense<0.000000e+00> : vector<256x128xf32>
    %39 = tpu.matmul %36, %38, %cst_22 {dimension_numbers = #tpu.dot_dimension_numbers<[1], [0], [0], [1], [0, 0, 1, 1], [], []>} : vector<256x8xbf16>, vector<8x128xbf16>, vector<256x128xf32> -> vector<256x128xf32>
    %40 = arith.addf %34, %39 : vector<256x128xf32>
    %41 = vector.extract_strided_slice %1 {offsets = [2, 0, 0], sizes = [16, 16, 8], strides = [1, 1, 1]} : vector<18x18x8xbf16> to vector<16x16x8xbf16>
    %42 = vector.shape_cast %41 : vector<16x16x8xbf16> to vector<256x8xbf16>
    %c6 = arith.constant 6 : index
    %c0_23 = arith.constant 0 : index
    %c0_24 = arith.constant 0 : index
    %43 = vector.load %arg2[%c6, %c0_23, %c0_24] : memref<9x8x128xbf16, #tpu.memory_space<vmem>>, vector<1x8x128xbf16>
    %44 = vector.shape_cast %43 : vector<1x8x128xbf16> to vector<8x128xbf16>
    %cst_25 = arith.constant dense<0.000000e+00> : vector<256x128xf32>
    %45 = tpu.matmul %42, %44, %cst_25 {dimension_numbers = #tpu.dot_dimension_numbers<[1], [0], [0], [1], [0, 0, 1, 1], [], []>} : vector<256x8xbf16>, vector<8x128xbf16>, vector<256x128xf32> -> vector<256x128xf32>
    %46 = arith.addf %40, %45 : vector<256x128xf32>
    %47 = vector.extract_strided_slice %1 {offsets = [2, 1, 0], sizes = [16, 16, 8], strides = [1, 1, 1]} : vector<18x18x8xbf16> to vector<16x16x8xbf16>
    %48 = vector.shape_cast %47 : vector<16x16x8xbf16> to vector<256x8xbf16>
    %c7 = arith.constant 7 : index
    %c0_26 = arith.constant 0 : index
    %c0_27 = arith.constant 0 : index
    %49 = vector.load %arg2[%c7, %c0_26, %c0_27] : memref<9x8x128xbf16, #tpu.memory_space<vmem>>, vector<1x8x128xbf16>
    %50 = vector.shape_cast %49 : vector<1x8x128xbf16> to vector<8x128xbf16>
    %cst_28 = arith.constant dense<0.000000e+00> : vector<256x128xf32>
    %51 = tpu.matmul %48, %50, %cst_28 {dimension_numbers = #tpu.dot_dimension_numbers<[1], [0], [0], [1], [0, 0, 1, 1], [], []>} : vector<256x8xbf16>, vector<8x128xbf16>, vector<256x128xf32> -> vector<256x128xf32>
    %52 = arith.addf %46, %51 : vector<256x128xf32>
    %53 = vector.extract_strided_slice %1 {offsets = [2, 2, 0], sizes = [16, 16, 8], strides = [1, 1, 1]} : vector<18x18x8xbf16> to vector<16x16x8xbf16>
    %54 = vector.shape_cast %53 : vector<16x16x8xbf16> to vector<256x8xbf16>
    %c8 = arith.constant 8 : index
    %c0_29 = arith.constant 0 : index
    %c0_30 = arith.constant 0 : index
    %55 = vector.load %arg2[%c8, %c0_29, %c0_30] : memref<9x8x128xbf16, #tpu.memory_space<vmem>>, vector<1x8x128xbf16>
    %56 = vector.shape_cast %55 : vector<1x8x128xbf16> to vector<8x128xbf16>
    %cst_31 = arith.constant dense<0.000000e+00> : vector<256x128xf32>
    %57 = tpu.matmul %54, %56, %cst_31 {dimension_numbers = #tpu.dot_dimension_numbers<[1], [0], [0], [1], [0, 0, 1, 1], [], []>} : vector<256x8xbf16>, vector<8x128xbf16>, vector<256x128xf32> -> vector<256x128xf32>
    %58 = arith.addf %52, %57 : vector<256x128xf32>
    %cst_32 = arith.constant 0.000000e+00 : f32
    %59 = vector.broadcast %cst_32 : f32 to vector<256x128xf32>
    %60 = arith.cmpf oge, %58, %59 : vector<256x128xf32>
    %cst_33 = arith.constant 0.00999999977 : f32
    %61 = vector.broadcast %cst_33 : f32 to vector<256x128xf32>
    %62 = arith.mulf %61, %58 : vector<256x128xf32>
    %63 = arith.select %60, %58, %62 : vector<256x128xi1>, vector<256x128xf32>
    %64 = vector.shape_cast %63 : vector<256x128xf32> to vector<16x16x128xf32>
    %65 = arith.truncf %64 : vector<16x16x128xf32> to vector<16x16x128xbf16>
    %66 = vector.extract_strided_slice %65 {offsets = [0, 1, 0], sizes = [16, 1, 128], strides = [1, 1, 1]} : vector<16x16x128xbf16> to vector<16x1x128xbf16>
    %67 = vector.extract_strided_slice %65 {offsets = [0, 14, 0], sizes = [16, 1, 128], strides = [1, 1, 1]} : vector<16x16x128xbf16> to vector<16x1x128xbf16>
    %68 = tpu.concatenate %66, %65, %67 in 1 : vector<16x1x128xbf16>, vector<16x16x128xbf16>, vector<16x1x128xbf16> -> vector<16x18x128xbf16>
    %69 = vector.extract_strided_slice %68 {offsets = [1, 0, 0], sizes = [1, 18, 128], strides = [1, 1, 1]} : vector<16x18x128xbf16> to vector<1x18x128xbf16>
    %70 = vector.extract_strided_slice %68 {offsets = [14, 0, 0], sizes = [1, 18, 128], strides = [1, 1, 1]} : vector<16x18x128xbf16> to vector<1x18x128xbf16>
    %71 = tpu.concatenate %69, %68, %70 in 0 : vector<1x18x128xbf16>, vector<16x18x128xbf16>, vector<1x18x128xbf16> -> vector<18x18x128xbf16>
    %c0_34 = arith.constant 0 : index
    %c0_35 = arith.constant 0 : index
    %72 = vector.load %arg5[%c0_34, %c0_35] : memref<1x128xf32, #tpu.memory_space<vmem>>, vector<1x128xf32>
    %73 = vector.shape_cast %72 : vector<1x128xf32> to vector<1x128xf32>
    %74 = vector.broadcast %73 : vector<1x128xf32> to vector<256x128xf32>
    %75 = vector.extract_strided_slice %71 {offsets = [0, 0, 0], sizes = [16, 16, 128], strides = [1, 1, 1]} : vector<18x18x128xbf16> to vector<16x16x128xbf16>
    %76 = vector.shape_cast %75 : vector<16x16x128xbf16> to vector<256x128xbf16>
    %c0_36 = arith.constant 0 : index
    %c0_37 = arith.constant 0 : index
    %c0_38 = arith.constant 0 : index
    %77 = vector.load %arg4[%c0_36, %c0_37, %c0_38] : memref<9x128x128xbf16, #tpu.memory_space<vmem>>, vector<1x128x128xbf16>
    %78 = vector.shape_cast %77 : vector<1x128x128xbf16> to vector<128x128xbf16>
    %cst_39 = arith.constant dense<0.000000e+00> : vector<256x128xf32>
    %79 = tpu.matmul %76, %78, %cst_39 {dimension_numbers = #tpu.dot_dimension_numbers<[1], [0], [0], [1], [0, 0, 1, 1], [], []>} : vector<256x128xbf16>, vector<128x128xbf16>, vector<256x128xf32> -> vector<256x128xf32>
    %80 = arith.addf %74, %79 : vector<256x128xf32>
    %81 = vector.extract_strided_slice %71 {offsets = [0, 1, 0], sizes = [16, 16, 128], strides = [1, 1, 1]} : vector<18x18x128xbf16> to vector<16x16x128xbf16>
    %82 = vector.shape_cast %81 : vector<16x16x128xbf16> to vector<256x128xbf16>
    %c1_40 = arith.constant 1 : index
    %c0_41 = arith.constant 0 : index
    %c0_42 = arith.constant 0 : index
    %83 = vector.load %arg4[%c1_40, %c0_41, %c0_42] : memref<9x128x128xbf16, #tpu.memory_space<vmem>>, vector<1x128x128xbf16>
    %84 = vector.shape_cast %83 : vector<1x128x128xbf16> to vector<128x128xbf16>
    %cst_43 = arith.constant dense<0.000000e+00> : vector<256x128xf32>
    %85 = tpu.matmul %82, %84, %cst_43 {dimension_numbers = #tpu.dot_dimension_numbers<[1], [0], [0], [1], [0, 0, 1, 1], [], []>} : vector<256x128xbf16>, vector<128x128xbf16>, vector<256x128xf32> -> vector<256x128xf32>
    %86 = arith.addf %80, %85 : vector<256x128xf32>
    %87 = vector.extract_strided_slice %71 {offsets = [0, 2, 0], sizes = [16, 16, 128], strides = [1, 1, 1]} : vector<18x18x128xbf16> to vector<16x16x128xbf16>
    %88 = vector.shape_cast %87 : vector<16x16x128xbf16> to vector<256x128xbf16>
    %c2_44 = arith.constant 2 : index
    %c0_45 = arith.constant 0 : index
    %c0_46 = arith.constant 0 : index
    %89 = vector.load %arg4[%c2_44, %c0_45, %c0_46] : memref<9x128x128xbf16, #tpu.memory_space<vmem>>, vector<1x128x128xbf16>
    %90 = vector.shape_cast %89 : vector<1x128x128xbf16> to vector<128x128xbf16>
    %cst_47 = arith.constant dense<0.000000e+00> : vector<256x128xf32>
    %91 = tpu.matmul %88, %90, %cst_47 {dimension_numbers = #tpu.dot_dimension_numbers<[1], [0], [0], [1], [0, 0, 1, 1], [], []>} : vector<256x128xbf16>, vector<128x128xbf16>, vector<256x128xf32> -> vector<256x128xf32>
    %92 = arith.addf %86, %91 : vector<256x128xf32>
    %93 = vector.extract_strided_slice %71 {offsets = [1, 0, 0], sizes = [16, 16, 128], strides = [1, 1, 1]} : vector<18x18x128xbf16> to vector<16x16x128xbf16>
    %94 = vector.shape_cast %93 : vector<16x16x128xbf16> to vector<256x128xbf16>
    %c3_48 = arith.constant 3 : index
    %c0_49 = arith.constant 0 : index
    %c0_50 = arith.constant 0 : index
    %95 = vector.load %arg4[%c3_48, %c0_49, %c0_50] : memref<9x128x128xbf16, #tpu.memory_space<vmem>>, vector<1x128x128xbf16>
    %96 = vector.shape_cast %95 : vector<1x128x128xbf16> to vector<128x128xbf16>
    %cst_51 = arith.constant dense<0.000000e+00> : vector<256x128xf32>
    %97 = tpu.matmul %94, %96, %cst_51 {dimension_numbers = #tpu.dot_dimension_numbers<[1], [0], [0], [1], [0, 0, 1, 1], [], []>} : vector<256x128xbf16>, vector<128x128xbf16>, vector<256x128xf32> -> vector<256x128xf32>
    %98 = arith.addf %92, %97 : vector<256x128xf32>
    %99 = vector.extract_strided_slice %71 {offsets = [1, 1, 0], sizes = [16, 16, 128], strides = [1, 1, 1]} : vector<18x18x128xbf16> to vector<16x16x128xbf16>
    %100 = vector.shape_cast %99 : vector<16x16x128xbf16> to vector<256x128xbf16>
    %c4_52 = arith.constant 4 : index
    %c0_53 = arith.constant 0 : index
    %c0_54 = arith.constant 0 : index
    %101 = vector.load %arg4[%c4_52, %c0_53, %c0_54] : memref<9x128x128xbf16, #tpu.memory_space<vmem>>, vector<1x128x128xbf16>
    %102 = vector.shape_cast %101 : vector<1x128x128xbf16> to vector<128x128xbf16>
    %cst_55 = arith.constant dense<0.000000e+00> : vector<256x128xf32>
    %103 = tpu.matmul %100, %102, %cst_55 {dimension_numbers = #tpu.dot_dimension_numbers<[1], [0], [0], [1], [0, 0, 1, 1], [], []>} : vector<256x128xbf16>, vector<128x128xbf16>, vector<256x128xf32> -> vector<256x128xf32>
    %104 = arith.addf %98, %103 : vector<256x128xf32>
    %105 = vector.extract_strided_slice %71 {offsets = [1, 2, 0], sizes = [16, 16, 128], strides = [1, 1, 1]} : vector<18x18x128xbf16> to vector<16x16x128xbf16>
    %106 = vector.shape_cast %105 : vector<16x16x128xbf16> to vector<256x128xbf16>
    %c5_56 = arith.constant 5 : index
    %c0_57 = arith.constant 0 : index
    %c0_58 = arith.constant 0 : index
    %107 = vector.load %arg4[%c5_56, %c0_57, %c0_58] : memref<9x128x128xbf16, #tpu.memory_space<vmem>>, vector<1x128x128xbf16>
    %108 = vector.shape_cast %107 : vector<1x128x128xbf16> to vector<128x128xbf16>
    %cst_59 = arith.constant dense<0.000000e+00> : vector<256x128xf32>
    %109 = tpu.matmul %106, %108, %cst_59 {dimension_numbers = #tpu.dot_dimension_numbers<[1], [0], [0], [1], [0, 0, 1, 1], [], []>} : vector<256x128xbf16>, vector<128x128xbf16>, vector<256x128xf32> -> vector<256x128xf32>
    %110 = arith.addf %104, %109 : vector<256x128xf32>
    %111 = vector.extract_strided_slice %71 {offsets = [2, 0, 0], sizes = [16, 16, 128], strides = [1, 1, 1]} : vector<18x18x128xbf16> to vector<16x16x128xbf16>
    %112 = vector.shape_cast %111 : vector<16x16x128xbf16> to vector<256x128xbf16>
    %c6_60 = arith.constant 6 : index
    %c0_61 = arith.constant 0 : index
    %c0_62 = arith.constant 0 : index
    %113 = vector.load %arg4[%c6_60, %c0_61, %c0_62] : memref<9x128x128xbf16, #tpu.memory_space<vmem>>, vector<1x128x128xbf16>
    %114 = vector.shape_cast %113 : vector<1x128x128xbf16> to vector<128x128xbf16>
    %cst_63 = arith.constant dense<0.000000e+00> : vector<256x128xf32>
    %115 = tpu.matmul %112, %114, %cst_63 {dimension_numbers = #tpu.dot_dimension_numbers<[1], [0], [0], [1], [0, 0, 1, 1], [], []>} : vector<256x128xbf16>, vector<128x128xbf16>, vector<256x128xf32> -> vector<256x128xf32>
    %116 = arith.addf %110, %115 : vector<256x128xf32>
    %117 = vector.extract_strided_slice %71 {offsets = [2, 1, 0], sizes = [16, 16, 128], strides = [1, 1, 1]} : vector<18x18x128xbf16> to vector<16x16x128xbf16>
    %118 = vector.shape_cast %117 : vector<16x16x128xbf16> to vector<256x128xbf16>
    %c7_64 = arith.constant 7 : index
    %c0_65 = arith.constant 0 : index
    %c0_66 = arith.constant 0 : index
    %119 = vector.load %arg4[%c7_64, %c0_65, %c0_66] : memref<9x128x128xbf16, #tpu.memory_space<vmem>>, vector<1x128x128xbf16>
    %120 = vector.shape_cast %119 : vector<1x128x128xbf16> to vector<128x128xbf16>
    %cst_67 = arith.constant dense<0.000000e+00> : vector<256x128xf32>
    %121 = tpu.matmul %118, %120, %cst_67 {dimension_numbers = #tpu.dot_dimension_numbers<[1], [0], [0], [1], [0, 0, 1, 1], [], []>} : vector<256x128xbf16>, vector<128x128xbf16>, vector<256x128xf32> -> vector<256x128xf32>
    %122 = arith.addf %116, %121 : vector<256x128xf32>
    %123 = vector.extract_strided_slice %71 {offsets = [2, 2, 0], sizes = [16, 16, 128], strides = [1, 1, 1]} : vector<18x18x128xbf16> to vector<16x16x128xbf16>
    %124 = vector.shape_cast %123 : vector<16x16x128xbf16> to vector<256x128xbf16>
    %c8_68 = arith.constant 8 : index
    %c0_69 = arith.constant 0 : index
    %c0_70 = arith.constant 0 : index
    %125 = vector.load %arg4[%c8_68, %c0_69, %c0_70] : memref<9x128x128xbf16, #tpu.memory_space<vmem>>, vector<1x128x128xbf16>
    %126 = vector.shape_cast %125 : vector<1x128x128xbf16> to vector<128x128xbf16>
    %cst_71 = arith.constant dense<0.000000e+00> : vector<256x128xf32>
    %127 = tpu.matmul %124, %126, %cst_71 {dimension_numbers = #tpu.dot_dimension_numbers<[1], [0], [0], [1], [0, 0, 1, 1], [], []>} : vector<256x128xbf16>, vector<128x128xbf16>, vector<256x128xf32> -> vector<256x128xf32>
    %128 = arith.addf %122, %127 : vector<256x128xf32>
    %cst_72 = arith.constant 0.000000e+00 : f32
    %129 = vector.broadcast %cst_72 : f32 to vector<256x128xf32>
    %130 = arith.cmpf oge, %128, %129 : vector<256x128xf32>
    %cst_73 = arith.constant 0.00999999977 : f32
    %131 = vector.broadcast %cst_73 : f32 to vector<256x128xf32>
    %132 = arith.mulf %131, %128 : vector<256x128xf32>
    %133 = arith.select %130, %128, %132 : vector<256x128xi1>, vector<256x128xf32>
    %134 = tpu.transpose %133, [1, 0] : vector<256x128xf32> -> vector<128x256xf32>
    %135 = vector.extract_strided_slice %134 {offsets = [0, 0], sizes = [8, 256], strides = [1, 1]} : vector<128x256xf32> to vector<8x256xf32>
    %c0_74 = arith.constant 0 : index
    %c0_75 = arith.constant 0 : index
    %c0_76 = arith.constant 0 : index
    %136 = vector.load %arg6[%c0_74, %c0_75, %c0_76] : memref<1x8x256xf32, #tpu.memory_space<vmem>>, vector<1x8x256xf32>
    %137 = vector.shape_cast %136 : vector<1x8x256xf32> to vector<8x256xf32>
    %138 = vector.shape_cast %135 : vector<8x256xf32> to vector<1x8x256xf32>
    tpu.vector_store %arg6[%c0_74, %c0_75, %c0_76], %138 {strides = array<i32>} : memref<1x8x256xf32, #tpu.memory_space<vmem>>, vector<1x8x256xf32>,
    return
  }
  func.func @transform_0(%arg0: i32) -> (i32, i32, i32, i32) {
    %c0_i32 = arith.constant 0 : i32
    %c0_i32_0 = arith.constant 0 : i32
    %c0_i32_1 = arith.constant 0 : i32
    %c0_i32_2 = arith.constant 0 : i32
    return %arg0, %c0_i32, %c0_i32_0, %c0_i32_1 : i32, i32, i32, i32
  }
  func.func @transform_1(%arg0: i32) -> (i32, i32, i32) {
    %c0_i32 = arith.constant 0 : i32
    %c0_i32_0 = arith.constant 0 : i32
    %c0_i32_1 = arith.constant 0 : i32
    %c0_i32_2 = arith.constant 0 : i32
    return %c0_i32, %c0_i32_0, %c0_i32_1 : i32, i32, i32
  }
  func.func @transform_2(%arg0: i32) -> (i32, i32) {
    %c0_i32 = arith.constant 0 : i32
    %c0_i32_0 = arith.constant 0 : i32
    %c0_i32_1 = arith.constant 0 : i32
    return %c0_i32, %c0_i32_0 : i32, i32
  }
  func.func @transform_3(%arg0: i32) -> (i32, i32, i32) {
    %c0_i32 = arith.constant 0 : i32
    %c0_i32_0 = arith.constant 0 : i32
    %c0_i32_1 = arith.constant 0 : i32
    %c0_i32_2 = arith.constant 0 : i32
    return %c0_i32, %c0_i32_0, %c0_i32_1 : i32, i32, i32
  }
  func.func @transform_4(%arg0: i32) -> (i32, i32) {
    %c0_i32 = arith.constant 0 : i32
    %c0_i32_0 = arith.constant 0 : i32
    %c0_i32_1 = arith.constant 0 : i32
    return %c0_i32, %c0_i32_0 : i32, i32
  }
  func.func @transform_5(%arg0: i32) -> (i32, i32, i32) {
    %c0_i32 = arith.constant 0 : i32
    %c0_i32_0 = arith.constant 0 : i32
    %c0_i32_1 = arith.constant 0 : i32
    return %arg0, %c0_i32, %c0_i32_0 : i32, i32, i32
  }
}

</mosaic_0001>

<bundles_post_ra>
// kernel: double_conv.1
= control target key start
LH: loop header
LB: loop body
LE: loop exit
PB: predicated region body
PF: predicated region fallthrough
CT: control target
= control target key end

     0   :  { %s8498_s18 = smov 0   ;;  %s10539_s0 = inlined_call_operand.vmem [shape: bf16[2,18,18,8], index: 0, kind: input, shape index: {}]   ;;  %s10540_s1 = inlined_call_operand.vmem [shape: bf16[9,8,128], index: 1, kind: input, shape index: {}]   ;;  %s10541_s2 = inlined_call_operand.vmem [shape: f32[1,128], index: 2, kind: input, shape index: {}]   ;;  %s10542_s3 = inlined_call_operand.vmem [shape: bf16[9,128,128], index: 3, kind: input, shape index: {}]   ;;  %s10543_s4 = inlined_call_operand.vmem [shape: f32[1,128], index: 4, kind: input, shape index: {}]   ;;  %s10544_s5 = inlined_call_operand.vmem [shape: f32[2,8,256], index: 5, kind: output, shape index: {}]  }
   0x1 LB: > { %s6202_s19 = sadd.s32 4294967295, %s8466_s18   ;;  %p6206_p0 = scmp.ge.s32.totalorder %s8466_s18, 1  ;;  %s8466_s18 = sphi %s8498_s18, %s15_s18  }
   0x2   : > { %p187_p1 = scmp.lt.s32.totalorder %s8466_s18, 3 }
   0x4   : > { %p188_p2 = pnand %p6206_p0, %p187_p1 }
   0x6   : > { %191 = sbr.rel (%p188_p2) target bundleno = 1659 (0x67b), region = 40 }
   0xd   : > { %v287_v0 = vld [vmem:[%s10540_s1] sm:$0xf]  ;;  %vm417_vm0 = vcmask 1043456   ;;  %p215_p3 = scmp.lt.s32.totalorder %s6202_s19, 1  ;;  %v6243_v2 = vld [vmem:[%s10540_s1 + $0x4] sm:$0xf] }
   0xe   : > { %8338 = vmatprep.subr.msk.bf16.mxu0 %vm417_vm0, %v287_v0  ;;  %v419_v1 = vsel %vm417_vm0, %v287_v0, 0  ;;  %vm368_vm1 = vcmask 64512   ;;  %v1100_v9 = vsel %vm417_vm0, %v6243_v2, 0  ;;  %v6292_v10 = vld [vmem:[%s10540_s1 + $0x8] sm:$0xf]  ;;  %vm1311_vm2 = vcmask 1042432  }
   0xf   : > { %7009 = vmatpush3.bf16.msra.mxu0 %v419_v1  ;;  %s10737_s19 = smov (!%p215_p3, %s6202_s19), 1  ;;  %vm1312_vm3 = vcmask 1046532   ;;  %v8649_v60 = vsel %vm417_vm0, %v6292_v10, 0  ;;  %vm614_vm5 = vsmask.f32 3328  ;;  %v8380_v34 = vld [vmem:[%s10542_s3 + $0x30] sm:$0xff]  }
  0x10   : > { %8339 = vmatprep.subr.msk.bf16.mxu0 %vm417_vm0, %v6243_v2  ;;  %s8347_s24 = smul.u32 216, %s10737_s19  ;;  %vm8597_vm4 = vmor %vm1311_vm2, %vm1312_vm3  ;;  %vm615_vm6 = vsmask.f32 7440  ;;  %vm3316_vm12 = vcmask 1040384   ;;  %vm3317_vm13 = vsmask.f32 256 }
  0x11   : > { %vm8793_vm7 = vmor %vm614_vm5, %vm615_vm6  ;;  %s6638_s29 = sshll.u32 %s10737_s19, 4 }
  0x12   : > { %s8521_s27 = scalar_lea.vmem %s10539_s0, %s8347_s24  ;;  %vm9630_vm15 = vmand %vm3316_vm12, %vm3317_vm13  ;;  %s224_s7 = scalar_lea.vmem %s10544_s5, %s6638_s29 }
  0x13   : > { %v226_v3 = vld [vmem:[%s8521_s27] sm:$0xf]  ;;  %v8525_v4 = vld [vmem:[%s8521_s27 + $0x4] sm:$0xf]  ;;  %v229_v5 = vld [vmem:[%s8521_s27 + $0xc] sm:$0xf] }
  0x14   : > { %v6211_v6 = vcombine.low %v226_v3, %v8525_v4  ;;  %v8530_v7 = vld [vmem:[%s8521_s27 + $0x10] sm:$0xf]  ;;  %v8543_v11 = vld [vmem:[%s8521_s27 + $0x18] sm:$0xf]  ;;  %v8546_v12 = vld [vmem:[%s8521_s27 + $0x1c] sm:$0xf] }
  0x15   : > { %v8533_v8 = vcombine.low %v229_v5, %v8530_v7  ;;  %v8549_v13 = vld [vmem:[%s8521_s27 + $0x24] sm:$0xf]  ;;  %v8552_v14 = vld [vmem:[%s8521_s27 + $0x28] sm:$0xf]  ;;  %v8557_v15 = vcombine.low %v8543_v11, %v8546_v12  ;;  %v8560_v16 = vld [vmem:[%s8521_s27 + $0x30] sm:$0xf] }
  0x16   : > { %7010 = vmatprep.mubr.msk.bf16.mxu0 %vm368_vm1, %v6211_v6  ;;  %v8563_v17 = vld [vmem:[%s8521_s27 + $0x34] sm:$0xf]  ;;  %v8569_v18 = vcombine.low %v8549_v13, %v8552_v14  ;;  %v618_v20 = vshrl.u32 %v226_v3, 16  ;;  %v621_v21 = vshll.u32 %v226_v3, 16  ;;  %v627_v22 = vshll.u32 %v8525_v4, 16 }
  0x17   : > { %10614 = vst [vmem:[#allocation2_spill] sm:$0xff] %v8533_v8  ;;  %7011 = vmatmul.mubr.msk.bf16.vlgmr.msra.gmra.mrb[0].mxu0 %vm368_vm1, %v8533_v8  ;;  %10615 = vst [vmem:[#allocation3_spill] sm:$0xff] %v8557_v15  ;;  %v8573_v19 = vcombine.low %v8560_v16, %v8563_v17  ;;  %v631_v23 = vshrl.u32 %v8525_v4, 16  ;;  %v6276_v24 = vrot.slane %v226_v3, 9  ;;  %v8582_v25 = vld [vmem:[%s8521_s27 + $0x3c] sm:$0xf] }
  0x18   : > { %7043 = vmatpush3.bf16.msra.mxu0 %v1100_v9  ;;  %7014 = vmatprep.mubr.msk.bf16.mxu0 %vm368_vm1, %v8557_v15  ;;  %10616 = vst [vmem:[#allocation4_spill] sm:$0xff] %v8569_v18  ;;  %v8585_v26 = vld [vmem:[%s8521_s27 + $0x40] sm:$0xf]  ;;  %v642_v27 = vshrl.u32 %v229_v5, 16  ;;  %v645_v28 = vshll.u32 %v229_v5, 16  ;;  %v1316_v31 = vrot.slane %v8525_v4, 5 }
  0x19   : > { %8340 = vmatprep.subr.msk.bf16.mxu0 %vm417_vm0, %v6292_v10  ;;  %10617 = vst [vmem:[#allocation5_spill] sm:$0xff] %v8573_v19  ;;  %v8588_v29 = vld [vmem:[%s8521_s27 + $0x48] sm:$0xf]  ;;  %v8591_v30 = vld [vmem:[%s8521_s27 + $0x4c] sm:$0xf]  ;;  %v651_v32 = vshll.u32 %v8530_v7, 16  ;;  %v8603_v38 = vcombine.low %v8582_v25, %v8585_v26 }
  0x1a   : > { %v655_v33 = vshrl.u32 %v8530_v7, 16  ;;  %v620_v35 = vrot.slane %v618_v20, 4  ;;  %v623_v36 = vrot.slane %v621_v21, 5  ;;  %v6277_v37 = vrot.slane %v229_v5, 9  ;;  %v8628_v51 = vld [vmem:[%s8521_s27 + $0x54] sm:$0xf] }
  0x1b   : > { %10620 = vst [vmem:[#allocation6_spill] sm:$0xff] %v8603_v38  ;;  %v8605_v39 = vrot.slane %v627_v22, 5  ;;  %v633_v40 = vrot.slane %v631_v23, 4  ;;  %v8609_v41 = vcombine.low %v8588_v29, %v8591_v30  ;;  %v644_v42 = vrot.slane %v642_v27, 4  ;;  %v8631_v52 = vld [vmem:[%s8521_s27 + $0x58] sm:$0xf] }
  0x1c   : > { %v647_v43 = vrot.slane %v645_v28, 5  ;;  %v1323_v44 = vrot.slane %v8530_v7, 5  ;;  %v8614_v45 = vsel %vm8597_vm4, %v6276_v24, %v1316_v31  ;;  %v8616_v46 = vrot.slane %v651_v32, 5  ;;  %v8634_v54 = vld [vmem:[%s8521_s27 + $0x60] sm:$0xf] }
  0x1d   : > { %10621 = vst [vmem:[#allocation7_spill] sm:$0xff] %v8609_v41  ;;  %v657_v47 = vrot.slane %v655_v33, 4  ;;  %v624_v48 = vor.u32 %v623_v36, %v620_v35  ;;  %v634_v50 = vor.u32 %v633_v40, %v8605_v39  ;;  %v8637_v55 = vld [vmem:[%s8521_s27 + $0x64] sm:$0xf]  ;;  %v8642_v58 = vrot.slane %v1316_v31, 4 }
  0x1e   : > { %v8622_v49 = vsel %vm8597_vm4, %v6277_v37, %v1323_v44  ;;  %v648_v53 = vor.u32 %v647_v43, %v644_v42  ;;  %v8646_v59 = vcombine.low %v8628_v51, %v8631_v52  ;;  %v8653_v62 = vrot.slane %v1323_v44, 4  ;;  %v8681_v24 = vld [vmem:[%s8521_s27 + $0x6c] sm:$0xf]  ;;  %v8684_v27 = vld [vmem:[%s8521_s27 + $0x70] sm:$0xf] }
  0x1f   : > { %7015 = vmatmul.mubr.msk.bf16.gmra.mrb[4].mxu0 %vm368_vm1, %v8569_v18  ;;  %v658_v56 = vor.u32 %v657_v47, %v8616_v46  ;;  %v8640_v57 = vrot.slane %v624_v48, 4  ;;  %v8651_v61 = vrot.slane %v634_v50, 4  ;;  %v666_v63 = vshrl.u32 %v8543_v11, 16  ;;  %v8689_v32 = vld [vmem:[%s8521_s27 + $0x78] sm:$0xf] }
  0x20   : > { %7018 = vmatprep.mubr.msk.bf16.mxu0 %vm368_vm1, %v8573_v19  ;;  %10622 = vst [vmem:[#allocation8_spill] sm:$0xff] %v8646_v59  ;;  %v8658_v0 = vcombine.low %v8634_v54, %v8637_v55  ;;  %v8660_v1 = vrot.slane %v648_v53, 4  ;;  %v669_v2 = vshll.u32 %v8543_v11, 16  ;;  %v8692_v33 = vld [vmem:[%s8521_s27 + $0x7c] sm:$0xf]  ;;  %v8702_v44 = vcombine.low %v8681_v24, %v8684_v27 }
  0x21   : > { %v8665_v5 = vrot.slane %v658_v56, 4  ;;  %v8709_v53 = vcombine.low %v8689_v32, %v8692_v33  ;;  %v8715_v40 = vld [vmem:[%s8521_s27 + $0x84] sm:$0xf]  ;;  %v8718_v47 = vld [vmem:[%s8521_s27 + $0x88] sm:$0xf]  ;;  %v668_v37 = vrot.slane %v666_v63, 4 }
  0x22   : > { %10623 = vst [vmem:[#allocation9_spill] sm:$0xff] %v8658_v0  ;;  %10624 = vst [vmem:[#allocation10_spill] sm:$0xff] %v8702_v44  ;;  %v8726_v43 = vld [vmem:[%s8521_s27 + $0x90] sm:$0xf]  ;;  %v8731_v42 = vld [vmem:[%s8521_s27 + $0x94] sm:$0xf]  ;;  %v8743_v56 = vcombine.low %v8715_v40, %v8718_v47 }
  0x23   : > { %10625 = vst [vmem:[#allocation11_spill] sm:$0xff] %v8709_v53  ;;  %v8736_v36 = vld [vmem:[%s8521_s27 + $0x9c] sm:$0xf]  ;;  %v8739_v50 = vld [vmem:[%s8521_s27 + $0xa0] sm:$0xf]  ;;  %v8749_v48 = vcombine.low %v8726_v43, %v8731_v42  ;;  %v671_v35 = vrot.slane %v669_v2, 5 }
  0x24   : > { %10626 = vst [vmem:[#allocation12_spill] sm:$0xff] %v8736_v36  ;;  %10627 = vst [vmem:[#allocation13_spill] sm:$0xff] %v8743_v56  ;;  %v8754_v23 = vld [vmem:[%s8521_s27 + $0xa8] sm:$0xf]  ;;  %v8757_v22 = vld [vmem:[%s8521_s27 + $0xac] sm:$0xf]  ;;  %v8782_v7 = vcombine.low %v8736_v36, %v8739_v50 }
  0x25   : > { %10628 = vst [vmem:[#allocation14_spill] sm:$0xff] %v8749_v48  ;;  %10629 = vst [vmem:[#allocation15_spill] sm:$0xff] %v8754_v23  ;;  %v8761_v11 = vld [vmem:[%s8521_s27 + $0x8] sm:$0x1]  ;;  %v8770_v28 = vld [vmem:[%s8521_s27 + $0xb4] sm:$0xf]  ;;  %v672_v9 = vor.u32 %v671_v35, %v668_v37  ;;  %v8788_v6 = vcombine.low %v8754_v23, %v8757_v22 }
  0x26   : > { %10630 = vst [vmem:[#allocation16_spill] sm:$0xff] %v8770_v28  ;;  %v8773_v63 = vld [vmem:[%s8521_s27 + $0xb8] sm:$0xf]  ;;  %v637_v21 = vshll.u32 %v8761_v11, 16  ;;  %v675_v10 = vshll.u32 %v8546_v12, 16  ;;  %10632 = vst [vmem:[#allocation18_spill] sm:$0xff] %v8782_v7 }
  0x27   : > { %7019 = vmatmul.mubr.msk.bf16.gmra.mrb[8].mxu0 %vm368_vm1, %v8603_v38  ;;  %10631 = vst [vmem:[#allocation17_spill] sm:$0xff] %v8773_v63  ;;  %v8778_v2 = vld [vmem:[%s8521_s27 + $0x14] sm:$0x1]  ;;  %10633 = vst [vmem:[#allocation19_spill] sm:$0xff] %v8788_v6  ;;  %v8798_v35 = vld [vmem:[%s8521_s27 + $0x20] sm:$0x1] }
  0x28   : > { %7022 = vmatprep.mubr.msk.bf16.mxu0 %vm368_vm1, %v8609_v41  ;;  %10636 = vst [vmem:[#allocation20_spill] sm:$0xff] %v8798_v35  ;;  %v699_v37 = vshll.u32 %v8552_v14, 16  ;;  %v639_v20 = vrot.slane %v637_v21, 5  ;;  %v661_v31 = vshll.u32 %v8778_v2, 16  ;;  %v723_v4 = vshll.u32 %v8563_v17, 16 }
  0x29   : > { %v8813_v21 = vld [vmem:[%s8521_s27 + $0x2c] sm:$0x1]  ;;  %v8826_v19 = vld [vmem:[%s8521_s27 + $0x38] sm:$0x1] }
  0x2a   : > { %v663_v15 = vrot.slane %v661_v31, 5  ;;  %v733_v23 = vshll.u32 %v8826_v19, 16 }
  0x2f   : > { %7023 = vmatmul.mubr.msk.bf16.gmra.mrb[12].mxu0 %vm368_vm1, %v8646_v59  ;;  %v685_v59 = vshll.u32 %v8798_v35, 16  ;;  %v10645_v35 = vshrl.u32 %v8582_v25, 16 }
  0x30   : > { %7026 = vmatprep.mubr.msk.bf16.mxu0 %vm368_vm1, %v8658_v0  ;;  %v630_v0 = vsel %vm8793_vm7, %v8640_v57, %v8605_v39  ;;  %v10641_v39 = vshrl.u32 %v8560_v16, 16 }
  0x31   : > { %v687_v8 = vrot.slane %v685_v59, 5  ;;  %v654_v59 = vsel %vm8793_vm7, %v8660_v1, %v8616_v46  ;;  %v10649_v46 = vshll.u32 %v8588_v29, 16 }
  0x32   : > { %v716_v57 = vrot.slane %v10641_v39, 4  ;;  %v747_v39 = vshll.u32 %v8585_v26, 16 }
  0x33   : > { %v767_v1 = vrot.slane %v10649_v46, 5 }
  0x34   : > { %v8859_v31 = vrot.slane %v747_v39, 5 }
  0x37   : > { %7027 = vmatmul.mubr.msk.bf16.gmra.mrb[16].mxu0 %vm368_vm1, %v8702_v44  ;;  %v673_v44 = vrot.slane %v672_v9, 4 }
  0x38   : > { %7030 = vmatprep.mubr.msk.bf16.mxu0 %vm368_vm1, %v8709_v53 }
  0x3f   : > { %7031 = vmatmul.mubr.msk.bf16.gmra.mrb[20].mxu0 %vm368_vm1, %v8743_v56  ;;  %v10637_v56 = vshrl.u32 %v8546_v12, 16  ;;  %v10639_v12 = vshll.u32 %v8549_v13, 16 }
  0x40   : > { %7034 = vmatprep.mubr.msk.bf16.mxu0 %vm368_vm1, %v8749_v48  ;;  %v677_v48 = vrot.slane %v675_v10, 5  ;;  %v10638_v10 = vshrl.u32 %v8549_v13, 16 }
  0x41   : > { %v681_v53 = vrot.slane %v10637_v56, 4  ;;  %v695_v9 = vrot.slane %v10639_v12, 5  ;;  %v8821_v56 = vrot.slane %v699_v37, 5  ;;  %v10643_v37 = vshrl.u32 %v8563_v17, 16 }
  0x42   : > { %v692_v41 = vrot.slane %v10638_v10, 4  ;;  %v640_v10 = vsel %vm8793_vm7, %v8651_v61, %v639_v20  ;;  %v740_v61 = vrot.slane %v10645_v35, 4  ;;  %v10646_v20 = vshll.u32 %v8582_v25, 16 }
  0x43   : > { %v682_v18 = vor.u32 %v681_v53, %v677_v48  ;;  %v729_v12 = vrot.slane %v10643_v37, 4  ;;  %v709_v37 = vshll.u32 %v8813_v21, 16  ;;  %v10648_v35 = vshrl.u32 %v8588_v29, 16 }
  0x44   : > { %v696_v53 = vor.u32 %v695_v9, %v692_v41  ;;  %v10647_v41 = vshrl.u32 %v8585_v26, 16  ;;  %v735_v29 = vrot.slane %v733_v23, 5  ;;  %v8897_v23 = vld [vmem:[%s8521_s27 + $0x5c] sm:$0x1] }
  0x45   : > { %v764_v9 = vrot.slane %v10648_v35, 4 }
  0x47   : > { %7035 = vmatmul.mubr.msk.bf16.gmra.mrb[24].mxu0 %vm368_vm1, %v8782_v7  ;;  %v10640_v7 = vshrl.u32 %v8552_v14, 16  ;;  %v8839_v14 = vcombine.low %v8770_v28, %v8773_v63  ;;  %v8851_v28 = vld [vmem:[%s8521_s27 + $0x44] sm:$0x1] }
  0x48   : > { %7038 = vmatprep.mubr.msk.bf16.mxu0 %vm368_vm1, %v8788_v6  ;;  %v10642_v6 = vshll.u32 %v8560_v16, 16  ;;  %v743_v16 = vrot.slane %v10646_v20, 5  ;;  %v757_v39 = vshll.u32 %v8851_v28, 16 }
  0x49   : > { %v705_v38 = vrot.slane %v10640_v7, 4  ;;  %10644 = vst [vmem:[#allocation21_spill] sm:$0xff] %v8839_v14  ;;  %v8841_v7 = vrot.slane %v723_v4, 5  ;;  %v683_v4 = vrot.slane %v682_v18, 4  ;;  %v664_v18 = vsel %vm8793_vm7, %v8665_v5, %v663_v15 }
  0x4a   : > { %v719_v13 = vrot.slane %v10642_v6, 5  ;;  %v6244_v6 = vcombine.low %v630_v0, %v640_v10  ;;  %v744_v0 = vor.u32 %v743_v16, %v740_v61  ;;  %v711_v10 = vrot.slane %v709_v37, 5  ;;  %v8881_v16 = vld [vmem:[%s8521_s27 + $0x50] sm:$0x1] }
  0x4b   : > { %v706_v17 = vor.u32 %v705_v38, %v8821_v56  ;;  %v730_v25 = vor.u32 %v729_v12, %v8841_v7  ;;  %v753_v38 = vrot.slane %v10647_v41, 4  ;;  %v678_v12 = vsel %vm8793_vm7, %v673_v44, %v677_v48 }
  0x4c   : > { %v720_v63 = vor.u32 %v719_v13, %v716_v57  ;;  %v697_v57 = vrot.slane %v696_v53, 4  ;;  %v771_v13 = vshll.u32 %v8591_v30, 16  ;;  %v688_v15 = vsel %vm8793_vm7, %v683_v4, %v687_v8 }
  0x4d   : > { %v707_v26 = vrot.slane %v706_v17, 4  ;;  %v731_v61 = vrot.slane %v730_v25, 4  ;;  %v754_v20 = vor.u32 %v753_v38, %v8859_v31  ;;  %v8885_v53 = vrot.slane %v744_v0, 4 }
  0x4e   : > { %v721_v5 = vrot.slane %v720_v63, 4  ;;  %v768_v17 = vor.u32 %v767_v1, %v764_v9  ;;  %v10651_v37 = vshrl.u32 %v8591_v30, 16  ;;  %v8889_v48 = vcombine.low %v678_v12, %v688_v15 }
  0x4f   : > { %7039 = vmatmul.mubr.msk.bf16.gmra.mrb[28].mxu0 %vm368_vm1, %v8839_v14  ;;  %v702_v8 = vsel %vm8793_vm7, %v697_v57, %v8821_v56  ;;  %v8894_v63 = vrot.slane %v771_v13, 5  ;;  %v795_v4 = vshll.u32 %v8631_v52, 16  ;;  %v712_v30 = vsel %vm8793_vm7, %v707_v26, %v711_v10 }
  0x50   : > { %7044 = vmatprep.mubr.msk.bf16.mxu0 %vm368_vm1, %v6244_v6  ;;  %v8883_v6 = vcombine.low %v654_v59, %v664_v18  ;;  %v777_v44 = vrot.slane %v10651_v37, 4  ;;  %10652 = vst [vmem:[#allocation23_spill] sm:$0xff] %v8889_v48  ;;  %v8903_v59 = vld [vmem:[%s10540_s1 + $0xc] sm:$0xf]  ;;  %v726_v25 = vsel %vm8793_vm7, %v721_v5, %v8841_v7  ;;  %v759_v41 = vrot.slane %v757_v39, 5 }
  0x51   : > { %v781_v56 = vshll.u32 %v8881_v16, 16  ;;  %v736_v38 = vsel %vm8793_vm7, %v731_v61, %v735_v29  ;;  %v755_v18 = vrot.slane %v754_v20, 4  ;;  %v10653_v0 = vshrl.u32 %v8628_v51, 16  ;;  %v8938_v39 = vld [vmem:[%s8521_s27 + $0x68] sm:$0x1] }
  0x52   : > { %10650 = vst [vmem:[#allocation22_spill] sm:$0xff] %v8883_v6  ;;  %v10654_v9 = vshll.u32 %v8628_v51, 16  ;;  %v769_v1 = vrot.slane %v768_v17, 4  ;;  %v819_v7 = vshll.u32 %v8637_v55, 16  ;;  %v8923_v57 = vcombine.low %v702_v8, %v712_v30 }
  0x53   : > { %v788_v35 = vrot.slane %v10653_v0, 4  ;;  %v778_v26 = vor.u32 %v777_v44, %v8894_v63  ;;  %v8926_v10 = vrot.slane %v795_v4, 5  ;;  %v10656_v51 = vshrl.u32 %v8631_v52, 16 }
  0x54   : > { %v791_v46 = vrot.slane %v10654_v9, 5  ;;  %10655 = vst [vmem:[#allocation24_spill] sm:$0xff] %v8923_v57  ;;  %v8930_v12 = vcombine.low %v726_v25, %v736_v38  ;;  %v750_v15 = vsel %vm8793_vm7, %v8885_v53, %v8859_v31  ;;  %v805_v5 = vshll.u32 %v8897_v23, 16 }
  0x55   : > { %v801_v13 = vrot.slane %v10656_v51, 4  ;;  %v10658_v61 = vshrl.u32 %v8634_v54, 16  ;;  %v10659_v29 = vshll.u32 %v8634_v54, 16  ;;  %v10660_v17 = vshrl.u32 %v8637_v55, 16 }
  0x56   : > { %10657 = vst [vmem:[#allocation25_spill] sm:$0xff] %v8930_v12  ;;  %v843_v31 = vshll.u32 %v8684_v27, 16  ;;  %v760_v53 = vsel %vm8793_vm7, %v755_v18, %v759_v41  ;;  %v792_v44 = vor.u32 %v791_v46, %v788_v35  ;;  %v8951_v8 = vrot.slane %v819_v7, 5  ;;  %v8977_v7 = vld [vmem:[%s8521_s27 + $0x80] sm:$0x1] }
  0x57   : > { %7045 = vmatmul.mubr.msk.bf16.vlgmr.msra.gmra.mrb[0].mxu0 %vm368_vm1, %v8883_v6  ;;  %v812_v52 = vrot.slane %v10658_v61, 4  ;;  %v815_v20 = vrot.slane %v10659_v29, 5  ;;  %v825_v37 = vrot.slane %v10660_v17, 4  ;;  %v1319_v4 = vrot.slane %v8761_v11, 5 }
  0x58   : > { %7077 = vmatpush3.bf16.msra.mxu0 %v8649_v60  ;;  %7048 = vmatprep.mubr.msk.bf16.mxu0 %vm368_vm1, %v8889_v48  ;;  %v783_v60 = vrot.slane %v781_v56, 5  ;;  %v774_v30 = vsel %vm8793_vm7, %v769_v1, %v8894_v63  ;;  %v779_v54 = vrot.slane %v778_v26, 4  ;;  %v802_v25 = vor.u32 %v801_v13, %v8926_v10  ;;  %v8960_v56 = vld [vmem:[%s8521_s27 + $0x74] sm:$0x1] }
  0x59   : > { %8341 = vmatprep.subr.msk.bf16.mxu0 %vm417_vm0, %v8903_v59  ;;  %v829_v55 = vshll.u32 %v8938_v39, 16  ;;  %v10661_v38 = vshrl.u32 %v8681_v24, 16  ;;  %v10662_v18 = vshll.u32 %v8681_v24, 16  ;;  %v8969_v11 = vsel %vm8597_vm4, %v8642_v58, %v1319_v4 }
  0x5a   : > { %v1326_v63 = vrot.slane %v8778_v2, 5  ;;  %v816_v35 = vor.u32 %v815_v20, %v812_v52  ;;  %v8972_v9 = vrot.slane %v843_v31, 5  ;;  %v10663_v46 = vshrl.u32 %v8684_v27, 16 }
  0x5b   : > { %v836_v41 = vrot.slane %v10661_v38, 4  ;;  %v839_v0 = vrot.slane %v10662_v18, 5  ;;  %v793_v51 = vrot.slane %v792_v44, 4  ;;  %v807_v13 = vrot.slane %v805_v5, 5 }
  0x5c   : > { %v849_v1 = vrot.slane %v10663_v46, 4  ;;  %v826_v58 = vor.u32 %v825_v37, %v8951_v8  ;;  %v1327_v2 = vsel %vm8597_vm4, %v8653_v62, %v1326_v63  ;;  %v10664_v61 = vshrl.u32 %v8689_v32, 16 }
  0x5d   : > { %v10665_v29 = vshll.u32 %v8689_v32, 16  ;;  %v867_v17 = vshll.u32 %v8692_v33, 16  ;;  %v8995_v5 = vcombine.low %v8622_v49, %v1327_v2  ;;  %v784_v37 = vsel %vm8793_vm7, %v779_v54, %v783_v60 }
  0x5e   : > { %v860_v52 = vrot.slane %v10664_v61, 4  ;;  %v803_v31 = vrot.slane %v802_v25, 4  ;;  %v840_v62 = vor.u32 %v839_v0, %v836_v41  ;;  %v853_v44 = vshll.u32 %v8960_v56, 16  ;;  %v9011_v25 = vld [vmem:[%s8521_s27 + $0x8c] sm:$0x1] }
  0x5f   : > { %7049 = vmatmul.mubr.msk.bf16.gmra.mrb[4].mxu0 %vm368_vm1, %v8923_v57  ;;  %v863_v20 = vrot.slane %v10665_v29, 5  ;;  %v817_v4 = vrot.slane %v816_v35, 4  ;;  %v831_v38 = vrot.slane %v829_v55, 5  ;;  %v850_v18 = vor.u32 %v849_v1, %v8972_v9 }
  0x60   : > { %7052 = vmatprep.mubr.msk.bf16.mxu0 %vm368_vm1, %v8930_v12  ;;  %v9001_v63 = vcombine.low %v750_v15, %v760_v53  ;;  %v827_v46 = vrot.slane %v826_v58, 4  ;;  %v877_v61 = vshll.u32 %v8977_v7, 16  ;;  %v9004_v29 = vcombine.low %v774_v30, %v784_v37 }
  0x61   : > { %v864_v49 = vor.u32 %v863_v20, %v860_v52  ;;  %v9006_v2 = vrot.slane %v867_v17, 5  ;;  %v10668_v60 = vshrl.u32 %v8692_v33, 16  ;;  %v841_v41 = vrot.slane %v840_v62, 4 }
  0x62   : > { %10666 = vst [vmem:[#allocation26_spill] sm:$0xff] %v9001_v63  ;;  %10667 = vst [vmem:[#allocation27_spill] sm:$0xff] %v9004_v29  ;;  %v855_v0 = vrot.slane %v853_v44, 5  ;;  %v798_v15 = vsel %vm8793_vm7, %v793_v51, %v8926_v10  ;;  %v808_v53 = vsel %vm8793_vm7, %v803_v31, %v807_v13  ;;  %v851_v55 = vrot.slane %v850_v18, 4 }
  0x63   : > { %v873_v54 = vrot.slane %v10668_v60, 4  ;;  %v891_v30 = vshll.u32 %v8718_v47, 16  ;;  %v822_v35 = vsel %vm8793_vm7, %v817_v4, %v8951_v8  ;;  %v832_v1 = vsel %vm8793_vm7, %v827_v46, %v831_v38  ;;  %v9043_v46 = vld [vmem:[%s8521_s27 + $0x98] sm:$0x1] }
  0x64   : > { %v879_v58 = vrot.slane %v877_v61, 5  ;;  %v915_v10 = vshll.u32 %v8731_v42, 16  ;;  %v865_v51 = vrot.slane %v864_v49, 4  ;;  %v10669_v52 = vshrl.u32 %v8715_v40, 16 }
  0x65   : > { %v874_v13 = vor.u32 %v873_v54, %v9006_v2  ;;  %v10670_v17 = vshll.u32 %v8715_v40, 16  ;;  %v10671_v8 = vshrl.u32 %v8718_v47, 16  ;;  %v901_v62 = vshll.u32 %v9011_v25, 16 }
  0x66   : > { %v884_v20 = vrot.slane %v10669_v52, 4  ;;  %v10672_v44 = vshrl.u32 %v8726_v43, 16  ;;  %v939_v38 = vshll.u32 %v8739_v50, 16  ;;  %v9040_v18 = vrot.slane %v891_v30, 5 }
  0x67   : > { %7053 = vmatmul.mubr.msk.bf16.gmra.mrb[8].mxu0 %vm368_vm1, %v9001_v63  ;;  %v887_v37 = vrot.slane %v10670_v17, 5  ;;  %v897_v31 = vrot.slane %v10671_v8, 4  ;;  %v10673_v61 = vshll.u32 %v8726_v43, 16  ;;  %v9047_v60 = vcombine.low %v798_v15, %v808_v53 }
  0x68   : > { %7056 = vmatprep.mubr.msk.bf16.mxu0 %vm368_vm1, %v9004_v29  ;;  %v908_v4 = vrot.slane %v10672_v44, 4  ;;  %v9049_v54 = vcombine.low %v822_v35, %v832_v1  ;;  %v917_v52 = vrot.slane %v915_v10, 5  ;;  %v10676_v17 = vshrl.u32 %v8731_v42, 16  ;;  %v9054_v29 = vld [vmem:[%s8521_s27 + $0xa4] sm:$0x1] }
  0x69   : > { %v911_v49 = vrot.slane %v10673_v61, 5  ;;  %10674 = vst [vmem:[#allocation28_spill] sm:$0xff] %v9047_v60  ;;  %v875_v26 = vrot.slane %v874_v13, 4  ;;  %10677 = vst [vmem:[#allocation30_spill] sm:$0xff] %v9054_v29  ;;  %v10678_v44 = vshrl.u32 %v8736_v36, 16  ;;  %v10679_v63 = vshll.u32 %v8736_v36, 16 }
  0x6a   : > { %10675 = vst [vmem:[#allocation29_spill] sm:$0xff] %v9049_v54  ;;  %v921_v8 = vrot.slane %v10676_v17, 4  ;;  %v963_v61 = vshll.u32 %v8757_v22, 16  ;;  %v888_v15 = vor.u32 %v887_v37, %v884_v20  ;;  %v941_v53 = vrot.slane %v939_v38, 5  ;;  %v10681_v17 = vld [vmem:[#allocation15_spill] sm:$0xff] }
  0x6b   : > { %v932_v30 = vrot.slane %v10678_v44, 4  ;;  %v935_v12 = vrot.slane %v10679_v63, 5  ;;  %v10680_v35 = vshrl.u32 %v8739_v50, 16  ;;  %v846_v10 = vsel %vm8793_vm7, %v841_v41, %v8972_v9  ;;  %v9077_v9 = vld [vmem:[%s8521_s27 + $0xb0] sm:$0x1] }
  0x6c   : > { %v856_v13 = vsel %vm8793_vm7, %v851_v55, %v855_v0  ;;  %v10682_v57 = vshrl.u32 %v10681_v17, 16  ;;  %v10683_v48 = vshll.u32 %v10681_v17, 16  ;;  %v898_v20 = vor.u32 %v897_v31, %v9040_v18  ;;  %10684 = vst [vmem:[#allocation31_spill] sm:$0xff] %v9077_v9  ;;  %v9093_v17 = vld [vmem:[%s8521_s27 + $0xbc] sm:$0x1] }
  0x6d   : > { %v945_v1 = vrot.slane %v10680_v35, 4  ;;  %v912_v37 = vor.u32 %v911_v49, %v908_v4  ;;  %v922_v38 = vor.u32 %v921_v8, %v917_v52  ;;  %v925_v35 = vshll.u32 %v9043_v46, 16 }
  0x6e   : > { %v956_v44 = vrot.slane %v10682_v57, 4  ;;  %v959_v63 = vrot.slane %v10683_v48, 5  ;;  %v870_v57 = vsel %vm8793_vm7, %v865_v51, %v9006_v2  ;;  %v936_v48 = vor.u32 %v935_v12, %v932_v30 }
  0x6f   : > { %7057 = vmatmul.mubr.msk.bf16.gmra.mrb[12].mxu0 %vm368_vm1, %v9047_v60  ;;  %v965_v41 = vrot.slane %v963_v61, 5  ;;  %v10685_v0 = vshrl.u32 %v8757_v22, 16  ;;  %v880_v31 = vsel %vm8793_vm7, %v875_v26, %v879_v58  ;;  %v889_v4 = vrot.slane %v888_v15, 4  ;;  %v10686_v58 = vld [vmem:[#allocation17_spill] sm:$0xff] }
  0x70   : > { %7060 = vmatprep.mubr.msk.bf16.mxu0 %vm368_vm1, %v9049_v54  ;;  %v946_v49 = vor.u32 %v945_v1, %v941_v53  ;;  %v949_v8 = vshll.u32 %v9054_v29, 16  ;;  %v9089_v60 = vcombine.low %v846_v10, %v856_v13  ;;  %v903_v6 = vrot.slane %v901_v62, 5  ;;  %v10687_v62 = vld [vmem:[#allocation16_spill] sm:$0xff] }
  0x71   : > { %v969_v55 = vrot.slane %v10685_v0, 4  ;;  %v960_v54 = vor.u32 %v959_v63, %v956_v44  ;;  %v973_v14 = vshll.u32 %v9077_v9, 16  ;;  %v899_v12 = vrot.slane %v898_v20, 4 }
  0x72   : > { %v913_v2 = vrot.slane %v912_v37, 4  ;;  %v923_v51 = vrot.slane %v922_v38, 4  ;;  %v927_v30 = vrot.slane %v925_v35, 5  ;;  %v9095_v61 = vcombine.low %v870_v57, %v880_v31 }
  0x73   : > { %v937_v0 = vrot.slane %v936_v48, 4  ;;  %v970_v26 = vor.u32 %v969_v55, %v965_v41  ;;  %v987_v15 = vshll.u32 %v10686_v58, 16  ;;  %v947_v1 = vrot.slane %v946_v49, 4 }
  0x74   : > { %v951_v29 = vrot.slane %v949_v8, 5  ;;  %v961_v10 = vrot.slane %v960_v54, 4  ;;  %v975_v13 = vrot.slane %v973_v14, 5  ;;  %v10688_v44 = vshrl.u32 %v10687_v62, 16 }
  0x75   : > { %v10689_v9 = vshll.u32 %v10687_v62, 16  ;;  %v10690_v20 = vshrl.u32 %v10686_v58, 16  ;;  %v997_v38 = vshll.u32 %v9093_v17, 16  ;;  %v894_v14 = vsel %vm8793_vm7, %v889_v4, %v9040_v18 }
  0x76   : > { %v980_v63 = vrot.slane %v10688_v44, 4  ;;  %v904_v54 = vsel %vm8793_vm7, %v899_v12, %v903_v6  ;;  %v971_v35 = vrot.slane %v970_v26, 4  ;;  %v918_v57 = vsel %vm8793_vm7, %v913_v2, %v917_v52 }
  0x77   : > { %v983_v36 = vrot.slane %v10689_v9, 5  ;;  %7061 = vmatmul.mubr.msk.bf16.gmra.mrb[16].mxu0 %vm368_vm1, %v9089_v60  ;;  %v993_v37 = vrot.slane %v10690_v20, 4  ;;  %v989_v9 = vrot.slane %v987_v15, 5  ;;  %v928_v48 = vsel %vm8793_vm7, %v923_v51, %v927_v30  ;;  %v8447_v15 = vld [vmem:[%s8521_s27 + $0x18] sm:$0xf] }
  0x78   : > { %7064 = vmatprep.mubr.msk.bf16.mxu0 %vm368_vm1, %v9095_v61  ;;  %v9118_v55 = vcombine.low %v894_v14, %v904_v54  ;;  %v9120_v31 = vcombine.low %v918_v57, %v928_v48  ;;  %v942_v6 = vsel %vm8793_vm7, %v937_v0, %v941_v53  ;;  %v952_v18 = vsel %vm8793_vm7, %v947_v1, %v951_v29  ;;  %v8448_v20 = vld [vmem:[%s8521_s27 + $0x28] sm:$0xf]  ;;  %v8449_v54 = vld [vmem:[%s8521_s27 + $0x34] sm:$0xf]  ;;  %v8450_v57 = vld [vmem:[%s8521_s27 + $0x24] sm:$0xf] }
  0x79   : > { %v984_v52 = vor.u32 %v983_v36, %v980_v63  ;;  %v994_v4 = vor.u32 %v993_v37, %v989_v9  ;;  %v966_v49 = vsel %vm8793_vm7, %v961_v10, %v965_v41  ;;  %v976_v8 = vsel %vm8793_vm7, %v971_v35, %v975_v13  ;;  %v8446_v41 = vld [vmem:[%s8521_s27 + $0x1c] sm:$0xf]  ;;  %v10691_v13 = vld [vmem:[#allocation20_spill] sm:$0xff] }
  0x7a   : > { %v9134_v12 = vcombine.low %v942_v6, %v952_v18  ;;  %v9136_v2 = vcombine.low %v966_v49, %v976_v8  ;;  %v999_v53 = vrot.slane %v997_v38, 5  ;;  %v1330_v0 = vrot.slane %v8446_v41, 5  ;;  %v8451_v18 = vld [vmem:[%s8521_s27 + $0x30] sm:$0xf] }
  0x7b   : > { %v985_v51 = vrot.slane %v984_v52, 4  ;;  %v995_v30 = vrot.slane %v994_v4, 4  ;;  %v6278_v1 = vrot.slane %v8447_v15, 9  ;;  %v1333_v44 = vrot.slane %v10691_v13, 5  ;;  %v9174_v8 = vld [vmem:[%s10540_s1 + $0x10] sm:$0xf] }
  0x7c   : > { %v1332_v10 = vrot.slane %v1330_v0, 4  ;;  %v10692_v63 = vcombine.low %v8614_v45, %v8969_v11  ;;  %v1337_v37 = vrot.slane %v8448_v20, 5  ;;  %v1344_v35 = vrot.slane %v8449_v54, 5  ;;  %v8454_v15 = vld [vmem:[%s8521_s27 + $0x3c] sm:$0xf] }
  0x7d   : > { %v990_v36 = vsel %vm8793_vm7, %v985_v51, %v989_v9  ;;  %v1000_v29 = vsel %vm8793_vm7, %v995_v30, %v999_v53  ;;  %v1331_v38 = vsel %vm8597_vm4, %v6278_v1, %v1330_v0  ;;  %v6279_v48 = vrot.slane %v8450_v57, 9  ;;  %v8457_v57 = vld [vmem:[%s8521_s27 + $0x64] sm:$0xf] }
  0x7e   : > { %v9147_v26 = vcombine.low %v990_v36, %v1000_v29  ;;  %v1334_v14 = vsel %vm8597_vm4, %v1332_v10, %v1333_v44  ;;  %v1339_v6 = vrot.slane %v1337_v37, 4  ;;  %v1340_v45 = vrot.slane %v8813_v21, 5  ;;  %v8453_v36 = vld [vmem:[%s8521_s27 + $0x4c] sm:$0xf]  ;;  %v8455_v44 = vld [vmem:[%s8521_s27 + $0x48] sm:$0xf] }
  0x7f   : > { %7065 = vmatmul.mubr.msk.bf16.gmra.mrb[20].mxu0 %vm368_vm1, %v9118_v55  ;;  %v9163_v9 = vcombine.low %v1331_v38, %v1334_v14  ;;  %v1731_v11 = vsel %vm417_vm0, %v8903_v59, 0  ;;  %v6280_v52 = vrot.slane %v8451_v18, 9  ;;  %v1346_v4 = vrot.slane %v1344_v35, 4  ;;  %v8452_v59 = vld [vmem:[%s8521_s27 + $0x40] sm:$0xf] }
  0x80   : > { %7068 = vmatprep.mubr.msk.bf16.mxu0 %vm368_vm1, %v9120_v31  ;;  %v1347_v49 = vrot.slane %v8826_v19, 5  ;;  %v1338_v21 = vsel %vm8597_vm4, %v6279_v48, %v1337_v37  ;;  %v1341_v19 = vsel %vm8597_vm4, %v1339_v6, %v1340_v45  ;;  %v1351_v51 = vrot.slane %v8452_v59, 5 }
  0x81   : > { %v1345_v30 = vsel %vm8597_vm4, %v6280_v52, %v1344_v35  ;;  %v1358_v29 = vrot.slane %v8453_v36, 5  ;;  %v9192_v41 = vcombine.low %v1338_v21, %v1341_v19  ;;  %v6281_v1 = vrot.slane %v8454_v15, 9 }
  0x82   : > { %v1348_v53 = vsel %vm8597_vm4, %v1346_v4, %v1347_v49  ;;  %v1353_v10 = vrot.slane %v1351_v51, 4  ;;  %v1354_v13 = vrot.slane %v8851_v28, 5  ;;  %v1361_v37 = vrot.slane %v8881_v16, 5  ;;  %v8456_v28 = vld [vmem:[%s8521_s27 + $0x58] sm:$0xf] }
  0x83   : > { %v9194_v0 = vcombine.low %v1345_v30, %v1348_v53  ;;  %v1360_v20 = vrot.slane %v1358_v29, 4  ;;  %v1352_v38 = vsel %vm8597_vm4, %v6281_v1, %v1351_v51  ;;  %v1365_v54 = vrot.slane %v8456_v28, 5  ;;  %v8459_v49 = vld [vmem:[%s8521_s27 + $0x60] sm:$0xf] }
  0x84   : > { %v1355_v14 = vsel %vm8597_vm4, %v1353_v10, %v1354_v13  ;;  %v1372_v48 = vrot.slane %v8457_v57, 5  ;;  %v1368_v4 = vrot.slane %v8897_v23, 5  ;;  %v6284_v21 = vrot.slane %v8459_v49, 9  ;;  %v10694_v49 = vld [vmem:[#allocation30_spill] sm:$0xff] }
  0x85   : > { %v1362_v16 = vsel %vm8597_vm4, %v1360_v20, %v1361_v37  ;;  %v9214_v6 = vcombine.low %v1352_v38, %v1355_v14  ;;  %v1367_v52 = vrot.slane %v1365_v54, 4  ;;  %v1375_v59 = vrot.slane %v8938_v39, 5 }
  0x86   : > { %v1374_v19 = vrot.slane %v1372_v48, 4  ;;  %v1379_v53 = vrot.slane %v8684_v27, 5  ;;  %v1373_v23 = vsel %vm8597_vm4, %v6284_v21, %v1372_v48  ;;  %v1386_v36 = vrot.slane %v8692_v33, 5 }
  0x87   : > { %7069 = vmatmul.mubr.msk.bf16.gmra.mrb[24].mxu0 %vm368_vm1, %v9134_v12  ;;  %v1369_v30 = vsel %vm8597_vm4, %v1367_v52, %v1368_v4  ;;  %v6285_v1 = vrot.slane %v8681_v24, 9  ;;  %v1382_v13 = vrot.slane %v8960_v56, 5  ;;  %v1393_v20 = vrot.slane %v8718_v47, 5 }
  0x88   : > { %7072 = vmatprep.mubr.msk.bf16.mxu0 %vm368_vm1, %v9136_v2  ;;  %v1376_v39 = vsel %vm8597_vm4, %v1374_v19, %v1375_v59  ;;  %v1381_v10 = vrot.slane %v1379_v53, 4  ;;  %v1388_v27 = vrot.slane %v1386_v36, 4  ;;  %v6287_v14 = vrot.slane %v8715_v40, 9  ;;  %v10695_v19 = vld [vmem:[#allocation15_spill] sm:$0xff] }
  0x89   : > { %v9238_v15 = vcombine.low %v1373_v23, %v1376_v39  ;;  %v1380_v33 = vsel %vm8597_vm4, %v6285_v1, %v1379_v53  ;;  %v1395_v28 = vrot.slane %v1393_v20, 4  ;;  %v1407_v57 = vrot.slane %v8739_v50, 5 }
  0x8a   : > { %v1383_v24 = vsel %vm8597_vm4, %v1381_v10, %v1382_v13  ;;  %v1410_v21 = vrot.slane %v10694_v49, 5  ;;  %v6290_v59 = vrot.slane %v10695_v19, 9  ;;  %v1421_v23 = vrot.slane %v10686_v58, 5  ;;  %v10713_v49 = vld [vmem:[#allocation23_spill] sm:$0xff]  ;;  %v10715_v19 = vld [vmem:[#allocation25_spill] sm:$0xff] }
  0x8b   : > { %v9258_v37 = vcombine.low %v1380_v33, %v1383_v24  ;;  %v1409_v4 = vrot.slane %v1407_v57, 4  ;;  %v6291_v13 = vrot.slane %v10687_v62, 9  ;;  %v10697_v62 = vld [vmem:[#allocation2_spill] sm:$0xff]  ;;  %v6362_v24 = vld [vmem:[%s10540_s1 + $0x14] sm:$0xf] }
  0x8d   : > { %v1411_v53 = vsel %vm8597_vm4, %v1409_v4, %v1410_v21  ;;  %v1422_v58 = vsel %vm8597_vm4, %v6291_v13, %v1421_v23  ;;  %v6380_v4 = vld [vmem:[%s10540_s1 + $0x18] sm:$0xf]  ;;  %v10714_v21 = vld [vmem:[#allocation24_spill] sm:$0xff] }
  0x8f   : > { %7073 = vmatmul.mubr.msk.bf16.gmra.mrb[28].mxu0 %vm368_vm1, %v9147_v26 }
  0x90   : > { %7078 = vmatprep.mubr.msk.bf16.mxu0 %vm368_vm1, %v10692_v63  ;;  %v6282_v63 = vrot.slane %v8455_v44, 9  ;;  %v6286_v44 = vrot.slane %v8689_v32, 9 }
  0x92   : > { %v1359_v35 = vsel %vm8597_vm4, %v6282_v63, %v1358_v29  ;;  %v1389_v63 = vrot.slane %v8977_v7, 5  ;;  %v1387_v32 = vsel %vm8597_vm4, %v6286_v44, %v1386_v36  ;;  %v1400_v7 = vrot.slane %v8731_v42, 5 }
  0x93   : > { %v9216_v45 = vcombine.low %v1359_v35, %v1362_v16  ;;  %v6288_v35 = vrot.slane %v8726_v43, 9  ;;  %v1403_v16 = vrot.slane %v9043_v46, 5  ;;  %v1394_v42 = vsel %vm8597_vm4, %v6287_v14, %v1393_v20  ;;  %v10698_v20 = vld [vmem:[#allocation3_spill] sm:$0xff]  ;;  %v10703_v14 = vld [vmem:[#allocation8_spill] sm:$0xff] }
  0x94   : > { %v1390_v56 = vsel %vm8597_vm4, %v1388_v27, %v1389_v63  ;;  %v1402_v47 = vrot.slane %v1400_v7, 4  ;;  %v1414_v46 = vrot.slane %v8757_v22, 5  ;;  %v1423_v44 = vrot.slane %v1421_v23, 4 }
  0x95   : > { %v9260_v38 = vcombine.low %v1387_v32, %v1390_v56  ;;  %v1401_v43 = vsel %vm8597_vm4, %v6288_v35, %v1400_v7  ;;  %v1424_v27 = vrot.slane %v9093_v17, 5  ;;  %v1959_v17 = vsel %vm417_vm0, %v9174_v8, 0  ;;  %v10699_v32 = vld [vmem:[#allocation4_spill] sm:$0xff]  ;;  %v10700_v56 = vld [vmem:[#allocation5_spill] sm:$0xff]  ;;  %v10701_v7 = vld [vmem:[#allocation6_spill] sm:$0xff] }
  0x96   : > { %v1416_v50 = vrot.slane %v1414_v46, 4  ;;  %v1415_v39 = vsel %vm8597_vm4, %v6290_v59, %v1414_v46  ;;  %v10706_v35 = vld [vmem:[#allocation11_spill] sm:$0xff]  ;;  %v10716_v59 = vld [vmem:[#allocation26_spill] sm:$0xff] }
  0x97   : > { %7079 = vmatmul.mubr.msk.bf16.vlgmr.msra.gmra.mrb[0].mxu0 %vm368_vm1, %v8995_v5  ;;  %v1425_v63 = vsel %vm8597_vm4, %v1423_v44, %v1424_v27 }
  0x98   : > { %7111 = vmatpush3.bf16.msra.mxu0 %v1731_v11  ;;  %7082 = vmatprep.mubr.msk.bf16.mxu0 %vm368_vm1, %v9163_v9  ;;  %v8458_v11 = vld [vmem:[%s8521_s27 + $0x54] sm:$0xf]  ;;  %v9315_v33 = vcombine.low %v1422_v58, %v1425_v63  ;;  %v276_v58 = vld [vmem:[%s8521_s27 + $0xc8] sm:$0x1] }
  0x99   : > { %8342 = vmatprep.subr.msk.bf16.mxu0 %vm417_vm0, %v9174_v8  ;;  %v6283_v18 = vrot.slane %v8458_v11, 9  ;;  %v10702_v8 = vld [vmem:[#allocation7_spill] sm:$0xff] }
  0x9b   : > { %v1366_v51 = vsel %vm8597_vm4, %v6283_v18, %v1365_v54  ;;  %v1396_v54 = vrot.slane %v9011_v25, 5  ;;  %v1404_v25 = vsel %vm8597_vm4, %v1402_v47, %v1403_v16  ;;  %v10693_v18 = vld [vmem:[#allocation12_spill] sm:$0xff]  ;;  %v10707_v47 = vld [vmem:[#allocation13_spill] sm:$0xff]  ;;  %v10708_v16 = vld [vmem:[#allocation14_spill] sm:$0xff] }
  0x9c   : > { %v9236_v29 = vcombine.low %v1366_v51, %v1369_v30  ;;  %v9282_v11 = vcombine.low %v1401_v43, %v1404_v25  ;;  %v6289_v52 = vrot.slane %v10693_v18, 9  ;;  %v10696_v51 = vld [vmem:[#allocation31_spill] sm:$0xff]  ;;  %v9356_v43 = vld [vmem:[%s8521_s27 + $0xc0] sm:$0xf]  ;;  %v9359_v25 = vld [vmem:[%s8521_s27 + $0xc4] sm:$0xf] }
  0x9d   : > { %v1397_v40 = vsel %vm8597_vm4, %v1395_v28, %v1396_v54  ;;  %v1417_v30 = vrot.slane %v10696_v51, 5  ;;  %v10704_v28 = vld [vmem:[#allocation9_spill] sm:$0xff]  ;;  %v10705_v54 = vld [vmem:[#allocation10_spill] sm:$0xff]  ;;  %v9363_v46 = vcombine.low %v9356_v43, %v9359_v25  ;;  %v10718_v51 = vld [vmem:[#allocation28_spill] sm:$0xff]  ;;  %v1940_v23 = vshrl.u32 %v9359_v25, 16 }
  0x9e   : > { %v9280_v48 = vcombine.low %v1394_v42, %v1397_v40  ;;  %v1408_v22 = vsel %vm8597_vm4, %v6289_v52, %v1407_v57  ;;  %v10709_v42 = vld [vmem:[#allocation18_spill] sm:$0xff]  ;;  %v10710_v40 = vld [vmem:[#allocation19_spill] sm:$0xff]  ;;  %v10711_v57 = vld [vmem:[#allocation21_spill] sm:$0xff]  ;;  %v2171_v52 = vsel %vm417_vm0, %v6362_v24, 0 }
  0x9f   : > { %7083 = vmatmul.mubr.msk.bf16.gmra.mrb[4].mxu0 %vm368_vm1, %v9192_v41  ;;  %v1418_v36 = vsel %vm8597_vm4, %v1416_v50, %v1417_v30  ;;  %v9301_v1 = vcombine.low %v1408_v22, %v1411_v53  ;;  %v10712_v18 = vld [vmem:[#allocation22_spill] sm:$0xff]  ;;  %v10717_v50 = vld [vmem:[#allocation27_spill] sm:$0xff]  ;;  %v10719_v30 = vld [vmem:[#allocation29_spill] sm:$0xff]  ;;  %v1927_v22 = vshrl.u32 %v9356_v43, 16  ;;  %v1930_v53 = vshll.u32 %v9356_v43, 16 }
  0xa0   : > { %7086 = vmatprep.mubr.msk.bf16.mxu0 %vm368_vm1, %v9194_v0  ;;  %v9303_v10 = vcombine.low %v1415_v39, %v1418_v36  ;;  %v1936_v39 = vshll.u32 %v9359_v25, 16  ;;  %v1942_v27 = vrot.slane %v1940_v23, 4 }
  0xa1   : > { %v1929_v36 = vrot.slane %v1927_v22, 4  ;;  %v1932_v13 = vrot.slane %v1930_v53, 5 }
  0xa2   : > { %v1938_v44 = vrot.slane %v1936_v39, 5  ;;  %v2377_v39 = vsel %vm417_vm0, %v6380_v4, 0 }
  0xa3   : > { %v1933_v63 = vor.u32 %v1932_v13, %v1929_v36  ;;  %v6398_v36 = vld [vmem:[%s10540_s1 + $0x1c] sm:$0xf] }
  0xa7   : > { %7087 = vmatmul.mubr.msk.bf16.gmra.mrb[8].mxu0 %vm368_vm1, %v9214_v6 }
  0xa8   : > { %7090 = vmatprep.mubr.msk.bf16.mxu0 %vm368_vm1, %v9216_v45 }
  0xaf   : > { %7091 = vmatmul.mubr.msk.bf16.gmra.mrb[12].mxu0 %vm368_vm1, %v9236_v29 }
  0xb0   : > { %7094 = vmatprep.mubr.msk.bf16.mxu0 %vm368_vm1, %v9238_v15 }
  0xb7   : > { %7095 = vmatmul.mubr.msk.bf16.gmra.mrb[16].mxu0 %vm368_vm1, %v9258_v37 }
  0xb8   : > { %7098 = vmatprep.mubr.msk.bf16.mxu0 %vm368_vm1, %v9260_v38 }
  0xbf   : > { %7099 = vmatmul.mubr.msk.bf16.gmra.mrb[20].mxu0 %vm368_vm1, %v9280_v48 }
  0xc0   : > { %7102 = vmatprep.mubr.msk.bf16.mxu0 %vm368_vm1, %v9282_v11 }
  0xc7   : > { %7103 = vmatmul.mubr.msk.bf16.gmra.mrb[24].mxu0 %vm368_vm1, %v9301_v1 }
  0xc8   : > { %7106 = vmatprep.mubr.msk.bf16.mxu0 %vm368_vm1, %v9303_v10 }
  0xcf   : > { %7107 = vmatmul.mubr.msk.bf16.gmra.mrb[28].mxu0 %vm368_vm1, %v9315_v33 }
  0xd0   : > { %7112 = vmatprep.mubr.msk.bf16.mxu0 %vm368_vm1, %v10697_v62  ;;  %v1943_v62 = vor.u32 %v1942_v27, %v1938_v44 }
  0xd7   : > { %7113 = vmatmul.mubr.msk.bf16.vlgmr.msra.gmra.mrb[0].mxu0 %vm368_vm1, %v10698_v20 }
  0xd8   : > { %7145 = vmatpush3.bf16.msra.mxu0 %v1959_v17  ;;  %7116 = vmatprep.mubr.msk.bf16.mxu0 %vm368_vm1, %v10699_v32  ;;  %v1946_v17 = vshll.u32 %v276_v58, 16 }
  0xd9   : > { %8343 = vmatprep.subr.msk.bf16.mxu0 %vm417_vm0, %v6362_v24  ;;  %v1934_v24 = vrot.slane %v1933_v63, 4 }
  0xdb   : > { %v1939_v22 = vsel %vm8793_vm7, %v1934_v24, %v1938_v44  ;;  %v2160_v44 = vrot.slane %v276_v58, 5 }
  0xdf   : > { %7117 = vmatmul.mubr.msk.bf16.gmra.mrb[4].mxu0 %vm368_vm1, %v10700_v56 }
  0xe0   : > { %7120 = vmatprep.mubr.msk.bf16.mxu0 %vm368_vm1, %v10701_v7 }
  0xe7   : > { %7121 = vmatmul.mubr.msk.bf16.gmra.mrb[8].mxu0 %vm368_vm1, %v10702_v8 }
  0xe8   : > { %7124 = vmatprep.mubr.msk.bf16.mxu0 %vm368_vm1, %v10703_v14 }
  0xef   : > { %7125 = vmatmul.mubr.msk.bf16.gmra.mrb[12].mxu0 %vm368_vm1, %v10704_v28 }
  0xf0   : > { %7128 = vmatprep.mubr.msk.bf16.mxu0 %vm368_vm1, %v10705_v54 }
  0xf7   : > { %7129 = vmatmul.mubr.msk.bf16.gmra.mrb[16].mxu0 %vm368_vm1, %v10706_v35 }
  0xf8   : > { %7132 = vmatprep.mubr.msk.bf16.mxu0 %vm368_vm1, %v10707_v47 }
  0xff   : > { %7133 = vmatmul.mubr.msk.bf16.gmra.mrb[20].mxu0 %vm368_vm1, %v10708_v16 }
 0x100   : > { %7136 = vmatprep.mubr.msk.bf16.mxu0 %vm368_vm1, %v10709_v42 }
 0x107   : > { %7137 = vmatmul.mubr.msk.bf16.gmra.mrb[24].mxu0 %vm368_vm1, %v10710_v40 }
 0x108   : > { %7140 = vmatprep.mubr.msk.bf16.mxu0 %vm368_vm1, %v10711_v57 }
 0x10f   : > { %7141 = vmatmul.mubr.msk.bf16.gmra.mrb[28].mxu0 %vm368_vm1, %v9363_v46 }
 0x110   : > { %7146 = vmatprep.mubr.msk.bf16.mxu0 %vm368_vm1, %v10712_v18  ;;  %v1944_v18 = vrot.slane %v1943_v62, 4 }
 0x117   : > { %7147 = vmatmul.mubr.msk.bf16.vlgmr.msra.gmra.mrb[0].mxu0 %vm368_vm1, %v10713_v49 }
 0x118   : > { %7179 = vmatpush3.bf16.msra.mxu0 %v2171_v52  ;;  %7150 = vmatprep.mubr.msk.bf16.mxu0 %vm368_vm1, %v10714_v21  ;;  %v1948_v52 = vrot.slane %v1946_v17, 5 }
 0x119   : > { %8344 = vmatprep.subr.msk.bf16.mxu0 %vm417_vm0, %v6380_v4  ;;  %v6361_v4 = vrot.slane %v9356_v43, 9  ;;  %v2605_v43 = vsel %vm417_vm0, %v6398_v36, 0 }
 0x11a   : > { %v1949_v53 = vsel %vm8793_vm7, %v1944_v18, %v1948_v52 }
 0x11b   : > { %v9411_v23 = vcombine.low %v1939_v22, %v1949_v53 }
 0x11f   : > { %7151 = vmatmul.mubr.msk.bf16.gmra.mrb[4].mxu0 %vm368_vm1, %v10715_v19 }
 0x120   : > { %7154 = vmatprep.mubr.msk.bf16.mxu0 %vm368_vm1, %v10716_v59 }
 0x127   : > { %7155 = vmatmul.mubr.msk.bf16.gmra.mrb[8].mxu0 %vm368_vm1, %v10717_v50 }
 0x128   : > { %7158 = vmatprep.mubr.msk.bf16.mxu0 %vm368_vm1, %v10718_v51 }
 0x12f   : > { %7159 = vmatmul.mubr.msk.bf16.gmra.mrb[12].mxu0 %vm368_vm1, %v10719_v30 }
 0x130   : > { %7162 = vmatprep.mubr.msk.bf16.mxu0 %vm368_vm1, %v9089_v60 }
 0x137   : > { %7163 = vmatmul.mubr.msk.bf16.gmra.mrb[16].mxu0 %vm368_vm1, %v9095_v61 }
 0x138   : > { %7166 = vmatprep.mubr.msk.bf16.mxu0 %vm368_vm1, %v9118_v55 }
 0x13f   : > { %7167 = vmatmul.mubr.msk.bf16.gmra.mrb[20].mxu0 %vm368_vm1, %v9120_v31 }
 0x140   : > { %7170 = vmatprep.mubr.msk.bf16.mxu0 %vm368_vm1, %v9134_v12 }
 0x147   : > { %7171 = vmatmul.mubr.msk.bf16.gmra.mrb[24].mxu0 %vm368_vm1, %v9136_v2 }
 0x148   : > { %7174 = vmatprep.mubr.msk.bf16.mxu0 %vm368_vm1, %v9147_v26 }
 0x14f   : > { %7175 = vmatmul.mubr.msk.bf16.gmra.mrb[28].mxu0 %vm368_vm1, %v9411_v23 }
 0x150   : > { %7180 = vmatprep.mubr.msk.bf16.mxu0 %vm368_vm1, %v8995_v5  ;;  %v2157_v5 = vrot.slane %v9359_v25, 5  ;;  %v6417_v25 = vld [vmem:[%s10540_s1 + $0x20] sm:$0xf] }
 0x152   : > { %v2159_v13 = vrot.slane %v2157_v5, 4  ;;  %v2158_v27 = vsel %vm8597_vm4, %v6361_v4, %v2157_v5 }
 0x154   : > { %v2161_v63 = vsel %vm8597_vm4, %v2159_v13, %v2160_v44 }
 0x155   : > { %v9456_v62 = vcombine.low %v2158_v27, %v2161_v63 }
 0x157   : > { %7181 = vmatmul.mubr.msk.bf16.vlgmr.msra.gmra.mrb[0].mxu0 %vm368_vm1, %v9163_v9 }
 0x158   : > { %7213 = vmatpush3.bf16.msra.mxu0 %v2377_v39  ;;  %7184 = vmatprep.mubr.msk.bf16.mxu0 %vm368_vm1, %v9192_v41 }
 0x159   : > { %8345 = vmatprep.subr.msk.bf16.mxu0 %vm417_vm0, %v6398_v36 }
 0x15f   : > { %7185 = vmatmul.mubr.msk.bf16.gmra.mrb[4].mxu0 %vm368_vm1, %v9194_v0 }
 0x160   : > { %7188 = vmatprep.mubr.msk.bf16.mxu0 %vm368_vm1, %v9214_v6 }
 0x167   : > { %7189 = vmatmul.mubr.msk.bf16.gmra.mrb[8].mxu0 %vm368_vm1, %v9216_v45 }
 0x168   : > { %7192 = vmatprep.mubr.msk.bf16.mxu0 %vm368_vm1, %v9236_v29 }
 0x16f   : > { %7193 = vmatmul.mubr.msk.bf16.gmra.mrb[12].mxu0 %vm368_vm1, %v9238_v15 }
 0x170   : > { %7196 = vmatprep.mubr.msk.bf16.mxu0 %vm368_vm1, %v9258_v37 }
 0x177   : > { %7197 = vmatmul.mubr.msk.bf16.gmra.mrb[16].mxu0 %vm368_vm1, %v9260_v38 }
 0x178   : > { %7200 = vmatprep.mubr.msk.bf16.mxu0 %vm368_vm1, %v9280_v48 }
 0x17f   : > { %7201 = vmatmul.mubr.msk.bf16.gmra.mrb[20].mxu0 %vm368_vm1, %v9282_v11 }
 0x180   : > { %7204 = vmatprep.mubr.msk.bf16.mxu0 %vm368_vm1, %v9301_v1 }
 0x187   : > { %7205 = vmatmul.mubr.msk.bf16.gmra.mrb[24].mxu0 %vm368_vm1, %v9303_v10 }
 0x188   : > { %7208 = vmatprep.mubr.msk.bf16.mxu0 %vm368_vm1, %v9315_v33 }
 0x18f   : > { %7209 = vmatmul.mubr.msk.bf16.gmra.mrb[28].mxu0 %vm368_vm1, %v9456_v62 }
 0x190   : > { %7214 = vmatprep.mubr.msk.bf16.mxu0 %vm368_vm1, %v10698_v20  ;;  %v9496_v20 = vld [vmem:[%s8521_s27 + $0xcc] sm:$0xf] }
 0x197   : > { %7215 = vmatmul.mubr.msk.bf16.vlgmr.msra.gmra.mrb[0].mxu0 %vm368_vm1, %v10699_v32  ;;  %v9499_v32 = vld [vmem:[%s8521_s27 + $0xd0] sm:$0xf] }
 0x198   : > { %7247 = vmatpush3.bf16.msra.mxu0 %v2605_v43  ;;  %7218 = vmatprep.mubr.msk.bf16.mxu0 %vm368_vm1, %v10700_v56  ;;  %v6381_v56 = vcombine.low %v9496_v20, %v9499_v32  ;;  %v2803_v3 = vrot.slane %v9499_v32, 5 }
 0x199   : > { %8346 = vmatprep.subr.msk.bf16.mxu0 %vm417_vm0, %v6417_v25 }
 0x19f   : > { %7219 = vmatmul.mubr.msk.bf16.gmra.mrb[4].mxu0 %vm368_vm1, %v10701_v7  ;;  %v8374_v7 = vld [vmem:[%s10542_s3] sm:$0xff]  }
 0x1a0   : > { %7222 = vmatprep.mubr.msk.bf16.mxu0 %vm368_vm1, %v10702_v8  ;;  %v8375_v8 = vld [vmem:[%s10542_s3 + $0x8] sm:$0xff]   ;;  %7746 = vmatprep.subr.bf16.mxu1 %v8374_v7 }
 0x1a1   : > { %7754 = vmatpush3.bf16.msra.mxu1 %v8374_v7 }
 0x1a2   : > { %7747 = vmatprep.subr.bf16.mxu1 %v8375_v8 }
 0x1a5   : > { %7755 = vmatpush3.bf16.msra.mxu1 %v8375_v8 }
 0x1a7   : > { %7223 = vmatmul.mubr.msk.bf16.gmra.mrb[8].mxu0 %vm368_vm1, %v10703_v14  ;;  %v2817_v14 = vsel %vm417_vm0, %v6417_v25, 0 }
 0x1a8   : > { %7226 = vmatprep.mubr.msk.bf16.mxu0 %vm368_vm1, %v10704_v28  ;;  %v8376_v28 = vld [vmem:[%s10542_s3 + $0x10] sm:$0xff]  }
 0x1a9   : > { %7748 = vmatprep.subr.bf16.mxu1 %v8376_v28 }
 0x1aa   : > { %7756 = vmatpush3.bf16.msra.mxu1 %v8376_v28 }
 0x1af   : > { %7227 = vmatmul.mubr.msk.bf16.gmra.mrb[12].mxu0 %vm368_vm1, %v10705_v54  ;;  %v8377_v54 = vld [vmem:[%s10542_s3 + $0x18] sm:$0xff]  }
 0x1b0   : > { %7230 = vmatprep.mubr.msk.bf16.mxu0 %vm368_vm1, %v10706_v35  ;;  %7749 = vmatprep.subr.bf16.mxu1 %v8377_v54  ;;  %v2573_v35 = vshrl.u32 %v9496_v20, 16 }
 0x1b1   : > { %7757 = vmatpush3.bf16.msra.mxu1 %v8377_v54 }
 0x1b7   : > { %7231 = vmatmul.mubr.msk.bf16.gmra.mrb[16].mxu0 %vm368_vm1, %v10707_v47  ;;  %v2576_v47 = vshll.u32 %v9496_v20, 16 }
 0x1b8   : > { %7234 = vmatprep.mubr.msk.bf16.mxu0 %vm368_vm1, %v10708_v16  ;;  %v2586_v16 = vshrl.u32 %v9499_v32, 16 }
 0x1bf   : > { %7235 = vmatmul.mubr.msk.bf16.gmra.mrb[20].mxu0 %vm368_vm1, %v10709_v42  ;;  %v2582_v42 = vshll.u32 %v9499_v32, 16 }
 0x1c0   : > { %7238 = vmatprep.mubr.msk.bf16.mxu0 %vm368_vm1, %v10710_v40  ;;  %v2575_v40 = vrot.slane %v2573_v35, 4 }
 0x1c7   : > { %7239 = vmatmul.mubr.msk.bf16.gmra.mrb[24].mxu0 %vm368_vm1, %v10711_v57  ;;  %v2578_v57 = vrot.slane %v2576_v47, 5 }
 0x1c8   : > { %7242 = vmatprep.mubr.msk.bf16.mxu0 %vm368_vm1, %v9363_v46  ;;  %v2588_v46 = vrot.slane %v2586_v16, 4 }
 0x1cf   : > { %7243 = vmatmul.mubr.msk.bf16.gmra.mrb[28].mxu0 %vm368_vm1, %v6381_v56 }
 0x1d0   : > { %7248 = vmatprep.mubr.msk.bf16.mxu0 %vm368_vm1, %v10713_v49  ;;  %v279_v49 = vld [vmem:[%s8521_s27 + $0xd4] sm:$0x1] }
 0x1d7   : > { %7249 = vmatmul.mubr.msk.bf16.vlgmr.msra.gmra.mrb[0].mxu0 %vm368_vm1, %v10714_v21  ;;  %v2592_v21 = vshll.u32 %v279_v49, 16 }
 0x1d8   : > { %7281 = vmatpush3.bf16.msra.mxu0 %v2817_v14  ;;  %7252 = vmatprep.mubr.msk.bf16.mxu0 %vm368_vm1, %v10715_v19 }
 0x1d9   : > { %7314 = vmatprep.subr.bf16.mxu0 %v8374_v7 }
 0x1df   : > { %7253 = vmatmul.mubr.msk.bf16.gmra.mrb[4].mxu0 %vm368_vm1, %v10716_v59 }
 0x1e0   : > { %7256 = vmatprep.mubr.msk.bf16.mxu0 %vm368_vm1, %v10717_v50  ;;  %v2594_v50 = vrot.slane %v2592_v21, 5 }
 0x1e7   : > { %7257 = vmatmul.mubr.msk.bf16.gmra.mrb[8].mxu0 %vm368_vm1, %v10718_v51 }
 0x1e8   : > { %7260 = vmatprep.mubr.msk.bf16.mxu0 %vm368_vm1, %v10719_v30 }
 0x1ef   : > { %7261 = vmatmul.mubr.msk.bf16.gmra.mrb[12].mxu0 %vm368_vm1, %v9089_v60  ;;  %v2584_v60 = vrot.slane %v2582_v42, 5 }
 0x1f0   : > { %7264 = vmatprep.mubr.msk.bf16.mxu0 %vm368_vm1, %v9095_v61  ;;  %v2579_v61 = vor.u32 %v2578_v57, %v2575_v40 }
 0x1f2   : > { %v2580_v19 = vrot.slane %v2579_v61, 4 }
 0x1f7   : > { %7265 = vmatmul.mubr.msk.bf16.gmra.mrb[16].mxu0 %vm368_vm1, %v9118_v55  ;;  %v2589_v55 = vor.u32 %v2588_v46, %v2584_v60 }
 0x1f8   : > { %7268 = vmatprep.mubr.msk.bf16.mxu0 %vm368_vm1, %v9120_v31  ;;  %v2585_v31 = vsel %vm8793_vm7, %v2580_v19, %v2584_v60 }
 0x1f9   : > { %v2590_v59 = vrot.slane %v2589_v55, 4 }
 0x1ff   : > { %7269 = vmatmul.mubr.msk.bf16.gmra.mrb[20].mxu0 %vm368_vm1, %v9134_v12  ;;  %v2595_v12 = vsel %vm8793_vm7, %v2590_v59, %v2594_v50 }
 0x200   : > { %7272 = vmatprep.mubr.msk.bf16.mxu0 %vm368_vm1, %v9136_v2  ;;  %v6399_v51 = vcombine.low %v2585_v31, %v2595_v12  ;;  %v6416_v2 = vrot.slane %v9496_v20, 9 }
 0x207   : > { %7273 = vmatmul.mubr.msk.bf16.gmra.mrb[24].mxu0 %vm368_vm1, %v9147_v26  ;;  %v2805_v26 = vrot.slane %v2803_v3, 4 }
 0x208   : > { %7276 = vmatprep.mubr.msk.bf16.mxu0 %vm368_vm1, %v9411_v23 }
 0x20f   : > { %7277 = vmatmul.mubr.msk.bf16.gmra.mrb[28].mxu0 %vm368_vm1, %v6399_v51 }
 0x210   : > { %7282 = vmatprep.mubr.msk.bf16.mxu0 %vm368_vm1, %v9163_v9  ;;  %v2806_v9 = vrot.slane %v279_v49, 5 }
 0x217   : > { %7283 = vmatmul.mubr.msk.bf16.vlgmr.msra.gmra.mrb[0].mxu0 %vm368_vm1, %v9192_v41  ;;  %v2804_v41 = vsel %vm8597_vm4, %v6416_v2, %v2803_v3 }
 0x218   : > { %7286 = vmatprep.mubr.msk.bf16.mxu0 %vm368_vm1, %v9194_v0  ;;  %7315 = vmatpush3.bf16.msra.mxu0 %v8374_v7  ;;  %v2807_v0 = vsel %vm8597_vm4, %v2805_v26, %v2806_v9 }
 0x219   : > { %7316 = vmatprep.subr.bf16.mxu0 %v8375_v8 }
 0x21c   : > { %7317 = vmatpush3.bf16.msra.mxu0 %v8375_v8 }
 0x21d   : > { %7318 = vmatprep.subr.bf16.mxu0 %v8376_v28 }
 0x21f   : > { %7287 = vmatmul.mubr.msk.bf16.gmra.mrb[4].mxu0 %vm368_vm1, %v9214_v6  ;;  %v6418_v6 = vcombine.low %v2804_v41, %v2807_v0 }
 0x220   : > { %7290 = vmatprep.mubr.msk.bf16.mxu0 %vm368_vm1, %v9216_v45  ;;  %7319 = vmatpush3.bf16.msra.mxu0 %v8376_v28  ;;  %v8378_v45 = vld [vmem:[%s10542_s3 + $0x20] sm:$0xff]  }
 0x221   : > { %7320 = vmatprep.subr.bf16.mxu0 %v8377_v54  ;;  %7750 = vmatprep.subr.bf16.mxu1 %v8378_v45 }
 0x222   : > { %7758 = vmatpush3.bf16.msra.mxu1 %v8378_v45 }
 0x224   : > { %7321 = vmatpush3.bf16.msra.mxu0 %v8377_v54 }
 0x225   : > { %7322 = vmatprep.subr.bf16.mxu0 %v8378_v45 }
 0x227   : > { %7291 = vmatmul.mubr.msk.bf16.gmra.mrb[8].mxu0 %vm368_vm1, %v9236_v29  ;;  %v8379_v29 = vld [vmem:[%s10542_s3 + $0x28] sm:$0xff]  }
 0x228   : > { %7294 = vmatprep.mubr.msk.bf16.mxu0 %vm368_vm1, %v9238_v15  ;;  %7323 = vmatpush3.bf16.msra.mxu0 %v8378_v45  ;;  %v8381_v15 = vld [vmem:[%s10542_s3 + $0x38] sm:$0xff]  }
 0x229   : > { %7324 = vmatprep.subr.bf16.mxu0 %v8379_v29  ;;  %7751 = vmatprep.subr.bf16.mxu1 %v8379_v29 }
 0x22a   : > { %7759 = vmatpush3.bf16.msra.mxu1 %v8379_v29 }
 0x22b   : > { %7752 = vmatprep.subr.bf16.mxu1 %v8380_v34 }
 0x22c   : > { %7325 = vmatpush3.bf16.msra.mxu0 %v8379_v29 }
 0x22d   : > { %7326 = vmatprep.subr.bf16.mxu0 %v8380_v34 }
 0x22e   : > { %7760 = vmatpush3.bf16.msra.mxu1 %v8380_v34 }
 0x22f   : > { %7295 = vmatmul.mubr.msk.bf16.gmra.mrb[12].mxu0 %vm368_vm1, %v9258_v37  ;;  %7753 = vmatprep.subr.bf16.mxu1 %v8381_v15  ;;  %v9609_v37 = vld [vmem:[%s10542_s3 + $0x40] sm:$0xff]  }
 0x230   : > { %7298 = vmatprep.mubr.msk.bf16.mxu0 %vm368_vm1, %v9260_v38  ;;  %7327 = vmatpush3.bf16.msra.mxu0 %v8380_v34  ;;  %v9615_v38 = vld [vmem:[%s10541_s2] ss:$0 sm:$0xff] }
 0x231   : > { %7328 = vmatprep.subr.bf16.mxu0 %v8381_v15 }
 0x232   : > { %7761 = vmatpush3.bf16.msra.mxu1 %v8381_v15 }
 0x233   : > { %7362 = vmatprep.subr.bf16.mxu1 %v9609_v37 }
 0x234   : > { %7329 = vmatpush3.bf16.msra.mxu0 %v8381_v15 }
 0x237   : > { %7299 = vmatmul.mubr.msk.bf16.gmra.mrb[16].mxu0 %vm368_vm1, %v9280_v48 }
 0x238   : > { %7302 = vmatprep.mubr.msk.bf16.mxu0 %vm368_vm1, %v9282_v11 }
 0x23f   : > { %7303 = vmatmul.mubr.msk.bf16.gmra.mrb[20].mxu0 %vm368_vm1, %v9301_v1 }
 0x240   : > { %7306 = vmatprep.mubr.msk.bf16.mxu0 %vm368_vm1, %v9303_v10 }
 0x247   : > { %7307 = vmatmul.mubr.msk.bf16.gmra.mrb[24].mxu0 %vm368_vm1, %v9315_v33 }
 0x248   : > { %7310 = vmatprep.mubr.msk.bf16.mxu0 %vm368_vm1, %v9456_v62 }
 0x24f   : > { %7311 = vmatmul.mubr.msk.bf16.gmra.mrb[28].mxu0 %vm368_vm1, %v6418_v6 }
 0x2ea   : > { %v7284_v48 = vpop.f32.mrb[0].mxu0 }
 0x2eb   : > { %v7762_v11 = vadd.f32 %v7284_v48, %v9615_v38  ;;  %v2853_v1 = vpop.f32.mrb[1].mxu0 }
 0x2ec   : > { %v7763_v10 = vadd.f32 %v9615_v38, %v2853_v1  ;;  %v7285_v33 = vpop.f32.mrb[2].mxu0 }
 0x2ed   : > { %v3046_v30 = vmul.f32 0.01, %v7762_v11  ;;  %v7764_v58 = vadd.f32 %v7285_v33, %v9615_v38  ;;  %v2856_v17 = vpop.f32.mrb[3].mxu0  ;;  %vm3014_vm8 = vcmp.ge.f32.partialorder %v7762_v11, 0.0 }
 0x2ee   : > { %v3044_v24 = vmul.f32 0.01, %v7763_v10  ;;  %v7765_v18 = vadd.f32 %v9615_v38, %v2856_v17  ;;  %vm3012_vm9 = vcmp.ge.f32.partialorder %v7763_v10, 0.0 }
 0x2ef   : > { %vm3015_vm10 = vcmp.ge.f32.partialorder %v7764_v58, 0.0  ;;  %v3047_v52 = vmul.f32 0.01, %v7764_v58  ;;  %v3078_v53 = vsel %vm3014_vm8, %v7762_v11, %v3046_v30 }
 0x2f0   : > { %vm3013_vm11 = vcmp.ge.f32.partialorder %v7765_v18, 0.0  ;;  %v3045_v22 = vmul.f32 0.01, %v7765_v18  ;;  %v3076_v39 = vsel %vm3012_vm9, %v7763_v10, %v3044_v24 }
 0x2f1   : > { %v3079_v23 = vsel %vm3015_vm10, %v7764_v58, %v3047_v52 }
 0x2f2   : > { %v9621_v36 = vpack.c.bf16 %v3079_v23, %v3078_v53  ;;  %v3077_v5 = vsel %vm3013_vm11, %v7765_v18, %v3045_v22  ;;  %v7288_v4 = vpop.f32.mrb[4].mxu0 }
 0x2f3   : > { %v3108_v13 = vpack.c.bf16 %v3077_v5, %v3076_v39  ;;  %v7766_v44 = vadd.f32 %v7288_v4, %v9615_v38  ;;  %v2869_v27 = vpop.f32.mrb[5].mxu0 }
 0x2f4   : > { %v3128_v63 = vshrl.u32 %v9621_v36, 16  ;;  %v7767_v62 = vadd.f32 %v9615_v38, %v2869_v27  ;;  %v7289_v43 = vpop.f32.mrb[6].mxu0  ;;  %v3193_v8 = vshll.u32 %v9621_v36, 16 }
 0x2f5   : > { %v3125_v25 = vshrl.u32 %v3108_v13, 16  ;;  %v3189_v20 = vshll.u32 %v3108_v13, 16  ;;  %v3050_v32 = vmul.f32 0.01, %v7766_v44  ;;  %v2872_v56 = vpop.f32.mrb[7].mxu0  ;;  %vm3018_vm14 = vcmp.ge.f32.partialorder %v7766_v44, 0.0 }
 0x2f6   : > { %v9626_v7 = vrot.slane %v3128_v63, 7  ;;  %v7768_v54 = vadd.f32 %v7289_v43, %v9615_v38  ;;  %vm3016_vm0 = vcmp.ge.f32.partialorder %v7767_v62, 0.0  ;;  %v3048_v16 = vmul.f32 0.01, %v7767_v62 }
 0x2f7   : > { %v3188_v14 = vrot.slane %v3125_v25, 7  ;;  %v3284_v28 = vrot.slane %v3189_v20, 7  ;;  %v7769_v42 = vadd.f32 %v9615_v38, %v2872_v56  ;;  %v3082_v57 = vsel %vm3018_vm14, %v7766_v44, %v3050_v32 }
 0x2f8   : > { %v3195_v47 = vor.u32 %v3193_v8, %v9626_v7  ;;  %vm3019_vm1 = vcmp.ge.f32.partialorder %v7768_v54, 0.0  ;;  %v3051_v60 = vmul.f32 0.01, %v7768_v54  ;;  %v3080_v31 = vsel %vm3016_vm0, %v7767_v62, %v3048_v16 }
 0x2f9   : > { %v3191_v40 = vor.u32 %v3189_v20, %v3188_v14  ;;  %vm3017_vm2 = vcmp.ge.f32.partialorder %v7769_v42, 0.0  ;;  %v3049_v46 = vmul.f32 0.01, %v7769_v42  ;;  %v9644_v55 = vsel %vm9630_vm15, %v3188_v14, %v3284_v28  ;;  %v8383_v14 = vld [vmem:[%s10542_s3 + $0x48] sm:$0xff]  }
 0x2fa   : > { %v7292_v49 = vpop.f32.mrb[8].mxu0  ;;  %v9640_v61 = vsel %vm9630_vm15, %v3128_v63, %v3195_v47  ;;  %v3083_v21 = vsel %vm3019_vm1, %v7768_v54, %v3051_v60 }
 0x2fb   : > { %v7770_v19 = vadd.f32 %v7292_v49, %v9615_v38  ;;  %v2885_v59 = vpop.f32.mrb[9].mxu0  ;;  %7330 = vmatprep.mubr.bf16.mxu0 %v9640_v61  ;;  %7334 = vmatprep.mubr.bf16.mxu1 %v9640_v61  ;;  %v9651_v50 = vsel %vm9630_vm15, %v3125_v25, %v3191_v40  ;;  %v9654_v12 = vpack.c.bf16 %v3083_v21, %v3082_v57  ;;  %v4100_v35 = vrot.slane %v9640_v61, 1 }
 0x2fc   : > { %v3081_v51 = vsel %vm3017_vm2, %v7769_v42, %v3049_v46  ;;  %v7771_v3 = vadd.f32 %v9615_v38, %v2885_v59  ;;  %v7293_v2 = vpop.f32.mrb[10].mxu0  ;;  %7331 = vmatmul.mubr.bf16.vlgmr.msra.gmra.mrb[32].mxu0 %v9651_v50 }
 0x2fd   : > { %v9658_v26 = vpack.c.bf16 %v3081_v51, %v3080_v31  ;;  %v7772_v9 = vadd.f32 %v7293_v2, %v9615_v38  ;;  %v2888_v41 = vpop.f32.mrb[11].mxu0  ;;  %v3134_v0 = vshrl.u32 %v9654_v12, 16  ;;  %v3054_v6 = vmul.f32 0.01, %v7770_v19 }
 0x2fe   : > { %vm3022_vm3 = vcmp.ge.f32.partialorder %v7770_v19, 0.0  ;;  %v3052_v34 = vmul.f32 0.01, %v7771_v3  ;;  %v3201_v48 = vshll.u32 %v9654_v12, 16  ;;  %vm3020_vm5 = vcmp.ge.f32.partialorder %v7771_v3, 0.0 }
 0x2ff   : > { %v3131_v45 = vshrl.u32 %v9658_v26, 16  ;;  %vm3023_vm4 = vcmp.ge.f32.partialorder %v7772_v9, 0.0  ;;  %v9663_v29 = vrot.slane %v3134_v0, 7  ;;  %v3055_v15 = vmul.f32 0.01, %v7772_v9 }
 0x300   : > { %v7773_v1 = vadd.f32 %v9615_v38, %v2888_v41  ;;  %v3197_v10 = vshll.u32 %v9658_v26, 16  ;;  %v3086_v33 = vsel %vm3022_vm3, %v7770_v19, %v3054_v6  ;;  %v3084_v53 = vsel %vm3020_vm5, %v7771_v3, %v3052_v34 }
 0x301   : > { %v9666_v11 = vrot.slane %v3131_v45, 7  ;;  %v3087_v30 = vsel %vm3023_vm4, %v7772_v9, %v3055_v15  ;;  %v3203_v17 = vor.u32 %v3201_v48, %v9663_v29 }
 0x302   : > { %v7296_v58 = vpop.f32.mrb[12].mxu0  ;;  %v9673_v24 = vpack.c.bf16 %v3087_v30, %v3086_v33  ;;  %vm3021_vm6 = vcmp.ge.f32.partialorder %v7773_v1, 0.0  ;;  %v3053_v18 = vmul.f32 0.01, %v7773_v1 }
 0x303   : > { %v2901_v52 = vpop.f32.mrb[13].mxu0  ;;  %v3199_v22 = vor.u32 %v3197_v10, %v9666_v11  ;;  %v7774_v23 = vadd.f32 %v7296_v58, %v9615_v38  ;;  %v9686_v43 = vsel %vm9630_vm15, %v3134_v0, %v3203_v17  ;;  %v8385_v17 = vld [vmem:[%s10542_s3 + $0x58] sm:$0xff]  }
 0x304   : > { %v7297_v39 = vpop.f32.mrb[14].mxu0  ;;  %v3140_v5 = vshrl.u32 %v9673_v24, 16  ;;  %v3085_v4 = vsel %vm3021_vm6, %v7773_v1, %v3053_v18  ;;  %v7775_v13 = vadd.f32 %v9615_v38, %v2901_v52  ;;  %v10606_v20 = vshll.u32 %v9673_v24, 16 }
 0x305   : > { %v7776_v44 = vadd.f32 %v7297_v39, %v9615_v38  ;;  %v2904_v27 = vpop.f32.mrb[15].mxu0  ;;  %v9682_v63 = vpack.c.bf16 %v3085_v4, %v3084_v53  ;;  %v3058_v62 = vmul.f32 0.01, %v7774_v23  ;;  %vm3026_vm7 = vcmp.ge.f32.partialorder %v7774_v23, 0.0 }
 0x306   : > { %v9688_v25 = vrot.slane %v3140_v5, 7  ;;  %vm3024_vm9 = vcmp.ge.f32.partialorder %v7775_v13, 0.0  ;;  %v3056_v28 = vmul.f32 0.01, %v7775_v13  ;;  %v9697_v54 = vsel %vm9630_vm15, %v3131_v45, %v3199_v22 }
 0x307   : > { %vm3027_vm8 = vcmp.ge.f32.partialorder %v7776_v44, 0.0  ;;  %v3137_v32 = vshrl.u32 %v9682_v63, 16  ;;  %v3059_v56 = vmul.f32 0.01, %v7776_v44  ;;  %v7777_v47 = vadd.f32 %v9615_v38, %v2904_v27  ;;  %7335 = vmatmul.mubr.bf16.vlgmr.msra.gmra.mrb[0].mxu1 %v9697_v54 }
 0x308   : > { %v3205_v42 = vshll.u32 %v9682_v63, 16  ;;  %v3090_v40 = vsel %vm3026_vm7, %v7774_v23, %v3058_v62  ;;  %7363 = vmatpush3.bf16.msra.mxu1 %v9609_v37  ;;  %7338 = vmatprep.mubr.bf16.mxu1 %v9686_v43  ;;  %v3211_v59 = vor.u32 %v10606_v20, %v9688_v25  ;;  %v8384_v37 = vld [vmem:[%s10542_s3 + $0x50] sm:$0xff]   ;;  %v3088_v2 = vsel %vm3024_vm9, %v7775_v13, %v3056_v28 }
 0x309   : > { %v9700_v16 = vrot.slane %v3137_v32, 7  ;;  %v3091_v57 = vsel %vm3027_vm8, %v7776_v44, %v3059_v56  ;;  %vm3025_vm10 = vcmp.ge.f32.partialorder %v7777_v47, 0.0  ;;  %v3057_v49 = vmul.f32 0.01, %v7777_v47  ;;  %7364 = vmatprep.subr.bf16.mxu1 %v8383_v14 }
 0x30a   : > { %v7300_v60 = vpop.f32.mrb[16].mxu0  ;;  %v9704_v46 = vpack.c.bf16 %v3091_v57, %v3090_v40  ;;  %v9733_v58 = vsel %vm9630_vm15, %v3140_v5, %v3211_v59  ;;  %v8386_v40 = vld [vmem:[%s10542_s3 + $0x60] sm:$0xff]  }
 0x30b   : > { %v7778_v21 = vadd.f32 %v7300_v60, %v9615_v38  ;;  %v2917_v19 = vpop.f32.mrb[17].mxu0  ;;  %v3207_v31 = vor.u32 %v3205_v42, %v9700_v16  ;;  %v3089_v41 = vsel %vm3025_vm10, %v7777_v47, %v3057_v49 }
 0x30c   : > { %v7779_v51 = vadd.f32 %v9615_v38, %v2917_v19  ;;  %v7301_v3 = vpop.f32.mrb[18].mxu0  ;;  %v3146_v9 = vshrl.u32 %v9704_v46, 16  ;;  %v9721_v6 = vpack.c.bf16 %v3089_v41, %v3088_v2  ;;  %7365 = vmatpush3.bf16.msra.mxu1 %v8383_v14  ;;  %v10603_v18 = vshll.u32 %v9704_v46, 16  ;;  %v8387_v2 = vld [vmem:[%s10542_s3 + $0x68] sm:$0xff]  }
 0x30d   : > { %v2920_v0 = vpop.f32.mrb[19].mxu0  ;;  %v3062_v45 = vmul.f32 0.01, %v7778_v21  ;;  %vm3030_vm11 = vcmp.ge.f32.partialorder %v7778_v21, 0.0  ;;  %v7780_v15 = vadd.f32 %v7301_v3, %v9615_v38  ;;  %v9726_v1 = vsel %vm9630_vm15, %v3137_v32, %v3207_v31  ;;  %7366 = vmatprep.subr.bf16.mxu1 %v8384_v37 }
 0x30e   : > { %v3060_v34 = vmul.f32 0.01, %v7779_v51  ;;  %vm3028_vm12 = vcmp.ge.f32.partialorder %v7779_v51, 0.0  ;;  %v9728_v33 = vrot.slane %v3146_v9, 7  ;;  %v3143_v30 = vshrl.u32 %v9721_v6, 16 }
 0x30f   : > { %vm3031_vm13 = vcmp.ge.f32.partialorder %v7780_v15, 0.0  ;;  %v3063_v52 = vmul.f32 0.01, %v7780_v15  ;;  %v7781_v22 = vadd.f32 %v9615_v38, %v2920_v0  ;;  %v10605_v23 = vshll.u32 %v9721_v6, 16  ;;  %7339 = vmatmul.mubr.bf16.gmra.mrb[4].mxu1 %v9726_v1 }
 0x310   : > { %v9740_v53 = vrot.slane %v3143_v30, 7  ;;  %v3094_v39 = vsel %vm3030_vm11, %v7778_v21, %v3062_v45  ;;  %v3092_v5 = vsel %vm3028_vm12, %v7779_v51, %v3060_v34  ;;  %7342 = vmatprep.mubr.bf16.mxu1 %v9733_v58  ;;  %7367 = vmatpush3.bf16.msra.mxu1 %v8384_v37  ;;  %v3219_v32 = vor.u32 %v10603_v18, %v9728_v33 }
 0x311   : > { %v3095_v13 = vsel %vm3031_vm13, %v7780_v15, %v3063_v52  ;;  %vm3029_vm14 = vcmp.ge.f32.partialorder %v7781_v22, 0.0  ;;  %v3061_v44 = vmul.f32 0.01, %v7781_v22  ;;  %7368 = vmatprep.subr.bf16.mxu1 %v8385_v17  ;;  %vm3615_vm12 = vsmask.f32 7424 }
 0x312   : > { %v7304_v4 = vpop.f32.mrb[20].mxu0  ;;  %v3215_v56 = vor.u32 %v10605_v23, %v9740_v53  ;;  %v9754_v14 = vpack.c.bf16 %v3095_v13, %v3094_v39  ;;  %v9767_v37 = vsel %vm9630_vm15, %v3146_v9, %v3219_v32  ;;  %v8388_v32 = vld [vmem:[%s10542_s3 + $0x70] sm:$0xff]   ;;  %vm4099_vm13 = vcmask 1046528  }
 0x313   : > { %v7782_v27 = vadd.f32 %v7304_v4, %v9615_v38  ;;  %v2933_v62 = vpop.f32.mrb[21].mxu0  ;;  %v3093_v57 = vsel %vm3029_vm14, %v7781_v22, %v3061_v44 }
 0x314   : > { %v7783_v28 = vadd.f32 %v9615_v38, %v2933_v62  ;;  %v7305_v47 = vpop.f32.mrb[22].mxu0  ;;  %v3152_v19 = vshrl.u32 %v9754_v14, 16  ;;  %v9762_v59 = vpack.c.bf16 %v3093_v57, %v3092_v5  ;;  %7369 = vmatpush3.bf16.msra.mxu1 %v8385_v17  ;;  %v9774_v45 = vsel %vm9630_vm15, %v3143_v30, %v3215_v56 }
 0x315   : > { %vm3034_vm0 = vcmp.ge.f32.partialorder %v7782_v27, 0.0  ;;  %v3066_v60 = vmul.f32 0.01, %v7782_v27  ;;  %v7784_v49 = vadd.f32 %v7305_v47, %v9615_v38  ;;  %v2936_v21 = vpop.f32.mrb[23].mxu0  ;;  %7370 = vmatprep.subr.bf16.mxu1 %v8386_v40  ;;  %v10600_v4 = vshll.u32 %v9754_v14, 16 }
 0x316   : > { %v3149_v51 = vshrl.u32 %v9762_v59, 16  ;;  %vm3032_vm2 = vcmp.ge.f32.partialorder %v7783_v28, 0.0  ;;  %v3064_v41 = vmul.f32 0.01, %v7783_v28  ;;  %v7785_v34 = vadd.f32 %v9615_v38, %v2936_v21 }
 0x317   : > { %vm3035_vm1 = vcmp.ge.f32.partialorder %v7784_v49, 0.0  ;;  %v3067_v31 = vmul.f32 0.01, %v7784_v49  ;;  %v3098_v3 = vsel %vm3034_vm0, %v7782_v27, %v3066_v60  ;;  %v9777_v15 = vrot.slane %v3152_v19, 7  ;;  %7343 = vmatmul.mubr.bf16.gmra.mrb[8].mxu1 %v9774_v45 }
 0x318   : > { %v9779_v17 = vrot.slane %v3149_v51, 7  ;;  %v10602_v9 = vshll.u32 %v9762_v59, 16  ;;  %vm3033_vm3 = vcmp.ge.f32.partialorder %v7785_v34, 0.0  ;;  %v3065_v39 = vmul.f32 0.01, %v7785_v34  ;;  %7346 = vmatprep.mubr.bf16.mxu1 %v9767_v37  ;;  %7371 = vmatpush3.bf16.msra.mxu1 %v8386_v40 }
 0x319   : > { %v3099_v0 = vsel %vm3035_vm1, %v7784_v49, %v3067_v31  ;;  %7372 = vmatprep.subr.bf16.mxu1 %v8387_v2  ;;  %v3096_v56 = vsel %vm3032_vm2, %v7783_v28, %v3064_v41  ;;  %v3227_v49 = vor.u32 %v10600_v4, %v9777_v15 }
 0x31a   : > { %v9782_v52 = vpack.c.bf16 %v3099_v0, %v3098_v3  ;;  %v7308_v22 = vpop.f32.mrb[24].mxu0  ;;  %v3223_v13 = vor.u32 %v10602_v9, %v9779_v17  ;;  %v3097_v47 = vsel %vm3033_vm3, %v7785_v34, %v3065_v39 }
 0x31b   : > { %v7786_v30 = vadd.f32 %v7308_v22, %v9615_v38  ;;  %v2949_v5 = vpop.f32.mrb[25].mxu0  ;;  %v9801_v21 = vpack.c.bf16 %v3097_v47, %v3096_v56  ;;  %v8389_v22 = vld [vmem:[%s10542_s3 + $0x78] sm:$0xff]  }
 0x31c   : > { %v3158_v44 = vshrl.u32 %v9782_v52, 16  ;;  %v7787_v27 = vadd.f32 %v9615_v38, %v2949_v5  ;;  %v7309_v62 = vpop.f32.mrb[26].mxu0  ;;  %v10601_v31 = vshll.u32 %v9782_v52, 16  ;;  %7373 = vmatpush3.bf16.msra.mxu1 %v8387_v2  ;;  %v9809_v34 = vsel %vm9630_vm15, %v3149_v51, %v3223_v13 }
 0x31d   : > { %v3070_v40 = vmul.f32 0.01, %v7786_v30  ;;  %v7788_v57 = vadd.f32 %v7309_v62, %v9615_v38  ;;  %v2952_v60 = vpop.f32.mrb[27].mxu0  ;;  %vm3038_vm4 = vcmp.ge.f32.partialorder %v7786_v30, 0.0  ;;  %v3155_v28 = vshrl.u32 %v9801_v21, 16  ;;  %7374 = vmatprep.subr.bf16.mxu1 %v8388_v32 }
 0x31e   : > { %v9804_v0 = vrot.slane %v3158_v44, 7  ;;  %v3068_v41 = vmul.f32 0.01, %v7787_v27  ;;  %vm3036_vm6 = vcmp.ge.f32.partialorder %v7787_v27, 0.0  ;;  %v7789_v62 = vadd.f32 %v9615_v38, %v2952_v60 }
 0x31f   : > { %vm3039_vm5 = vcmp.ge.f32.partialorder %v7788_v57, 0.0  ;;  %v3071_v3 = vmul.f32 0.01, %v7788_v57  ;;  %v3102_v39 = vsel %vm3038_vm4, %v7786_v30, %v3070_v40  ;;  %v9815_v2 = vrot.slane %v3155_v28, 7  ;;  %7347 = vmatmul.mubr.bf16.gmra.mrb[12].mxu1 %v9809_v34 }
 0x320   : > { %v10604_v56 = vshll.u32 %v9801_v21, 16  ;;  %v9823_v51 = vsel %vm9630_vm15, %v3152_v19, %v3227_v49  ;;  %vm3037_vm7 = vcmp.ge.f32.partialorder %v7789_v62, 0.0  ;;  %v3069_v4 = vmul.f32 0.01, %v7789_v62  ;;  %7375 = vmatpush3.bf16.msra.mxu1 %v8388_v32 }
 0x321   : > { %v3103_v5 = vsel %vm3039_vm5, %v7788_v57, %v3071_v3  ;;  %7350 = vmatprep.mubr.bf16.mxu1 %v9823_v51  ;;  %v3235_v57 = vor.u32 %v10601_v31, %v9804_v0  ;;  %v3100_v19 = vsel %vm3036_vm6, %v7787_v27, %v3068_v41  ;;  %7376 = vmatprep.subr.bf16.mxu1 %v8389_v22 }
 0x322   : > { %v9818_v47 = vpack.c.bf16 %v3103_v5, %v3102_v39  ;;  %v7312_v13 = vpop.f32.mrb[28].mxu0  ;;  %v3231_v60 = vor.u32 %v10604_v56, %v9815_v2  ;;  %v9838_v39 = vld [vmem:[%s10542_s3 + $0x80] sm:$0xff]   ;;  %v3101_v32 = vsel %vm3037_vm7, %v7789_v62, %v3069_v4 }
 0x323   : > { %v7790_v30 = vadd.f32 %v7312_v13, %v9615_v38  ;;  %v2965_v40 = vpop.f32.mrb[29].mxu0  ;;  %v9842_v18 = vpack.c.bf16 %v3101_v32, %v3100_v19  ;;  %v9853_v4 = vsel %vm9630_vm15, %v3158_v44, %v3235_v57 }
 0x324   : > { %v3164_v49 = vshrl.u32 %v9818_v47, 16  ;;  %v7313_v3 = vpop.f32.mrb[30].mxu0  ;;  %v7791_v13 = vadd.f32 %v9615_v38, %v2965_v40  ;;  %7377 = vmatpush3.bf16.msra.mxu1 %v8389_v22  ;;  %v9849_v23 = vsel %vm9630_vm15, %v3155_v28, %v3231_v60  ;;  %v10608_v44 = vshll.u32 %v9818_v47, 16 }
 0x325   : > { %v3074_v5 = vmul.f32 0.01, %v7790_v30  ;;  %v7792_v31 = vadd.f32 %v7313_v3, %v9615_v38  ;;  %v2968_v9 = vpop.f32.mrb[31].mxu0  ;;  %vm3042_vm8 = vcmp.ge.f32.partialorder %v7790_v30, 0.0  ;;  %v3161_v56 = vshrl.u32 %v9842_v18, 16  ;;  %7410 = vmatprep.subr.bf16.mxu1 %v9838_v39 }
 0x326   : > { %v9844_v41 = vrot.slane %v3164_v49, 7  ;;  %v3072_v40 = vmul.f32 0.01, %v7791_v13  ;;  %v7793_v3 = vadd.f32 %v9615_v38, %v2968_v9  ;;  %v10609_v32 = vshll.u32 %v9842_v18, 16 }
 0x327   : > { %vm3043_vm9 = vcmp.ge.f32.partialorder %v7792_v31, 0.0  ;;  %v3075_v27 = vmul.f32 0.01, %v7792_v31  ;;  %v3106_v62 = vsel %vm3042_vm8, %v7790_v30, %v3074_v5  ;;  %v9857_v22 = vrot.slane %v3161_v56, 7  ;;  %7351 = vmatmul.mubr.bf16.gmra.mrb[16].mxu1 %v9849_v23 }
 0x328   : > { %vm3040_vm10 = vcmp.ge.f32.partialorder %v7791_v13, 0.0  ;;  %vm3041_vm11 = vcmp.ge.f32.partialorder %v7793_v3, 0.0  ;;  %v3073_v28 = vmul.f32 0.01, %v7793_v3  ;;  %7354 = vmatprep.mubr.bf16.mxu1 %v9853_v4  ;;  %v3285_v38 = vrot.slane %v3193_v8, 7 }
 0x329   : > { %v3107_v19 = vsel %vm3043_vm9, %v7792_v31, %v3075_v27  ;;  %v3239_v31 = vor.u32 %v10609_v32, %v9857_v22  ;;  %v3104_v9 = vsel %vm3040_vm10, %v7791_v13, %v3072_v40  ;;  %v3243_v57 = vor.u32 %v10608_v44, %v9844_v41 }
 0x32a   : > { %v9860_v20 = vpack.c.bf16 %v3107_v19, %v3106_v62  ;;  %v3105_v30 = vsel %vm3041_vm11, %v7793_v3, %v3073_v28  ;;  %v3619_v5 = vshll.u32 %v9640_v61, 16  ;;  %v9884_v36 = vsel %vm9630_vm15, %v9626_v7, %v3285_v38 }
 0x32b   : > { %v9873_v60 = vpack.c.bf16 %v3105_v30, %v3104_v9  ;;  %v9878_v27 = vsel %vm9630_vm15, %v3161_v56, %v3239_v31  ;;  %v9892_v40 = vsel %vm9630_vm15, %v3164_v49, %v3243_v57  ;;  %v3617_v7 = vshrl.u32 %v9640_v61, 16 }
 0x32c   : > { %v3621_v19 = vrot.slane %v3619_v5, 1  ;;  %v3624_v3 = vshll.u32 %v9884_v36, 16  ;;  %v3631_v28 = vshll.u32 %v9651_v50, 16  ;;  %v3629_v57 = vshrl.u32 %v9651_v50, 16 }
 0x32d   : > { %v3167_v62 = vshrl.u32 %v9873_v60, 16  ;;  %v10607_v13 = vshll.u32 %v9873_v60, 16  ;;  %v3636_v5 = vshll.u32 %v9644_v55, 16  ;;  %v3170_v63 = vshrl.u32 %v9860_v20, 16 }
 0x32e   : > { %v3622_v31 = vor.u32 %v3621_v19, %v3617_v7  ;;  %v3626_v49 = vrot.slane %v3624_v3, 1  ;;  %v3633_v9 = vrot.slane %v3631_v28, 1  ;;  %v3286_v19 = vrot.slane %v3197_v10, 7 }
 0x32f   : > { %v9886_v8 = vrot.slane %v3167_v62, 7  ;;  %7355 = vmatmul.mubr.bf16.gmra.mrb[20].mxu1 %v9878_v27  ;;  %v3643_v7 = vshll.u32 %v9697_v54, 16  ;;  %v3655_v3 = vshll.u32 %v9686_v43, 16  ;;  %v3638_v28 = vrot.slane %v3636_v5, 1 }
 0x330   : > { %7358 = vmatprep.mubr.bf16.mxu1 %v9892_v40  ;;  %v9907_v30 = vsel %vm3615_vm12, %v3622_v31, %v3626_v49  ;;  %v8391_v31 = vld [vmem:[%s10542_s3 + $0x88] sm:$0xff]   ;;  %v9924_v49 = vsel %vm9630_vm15, %v9666_v11, %v3286_v19  ;;  %v3653_v5 = vshrl.u32 %v9686_v43, 16  ;;  %v8392_v19 = vld [vmem:[%s10542_s3 + $0x90] sm:$0xff]  }
 0x331   : > { %v3247_v56 = vor.u32 %v10607_v13, %v9886_v8  ;;  %v3645_v12 = vrot.slane %v3643_v7, 1  ;;  %v3657_v10 = vrot.slane %v3655_v3, 1  ;;  %v3648_v11 = vshll.u32 %v9924_v49, 16 }
 0x332   : > { %v3667_v7 = vshll.u32 %v9726_v1, 16 }
 0x333   : > { %v9903_v38 = vsel %vm9630_vm15, %v3167_v62, %v3247_v56  ;;  %v3287_v62 = vrot.slane %v3201_v48, 7  ;;  %v3634_v56 = vor.u32 %v3633_v9, %v3629_v57  ;;  %v3641_v9 = vshrl.u32 %v9697_v54, 16 }
 0x334   : > { %v3288_v57 = vrot.slane %v3205_v42, 7  ;;  %v3658_v3 = vor.u32 %v3657_v10, %v3653_v5  ;;  %v3650_v42 = vrot.slane %v3648_v11, 1  ;;  %v3669_v10 = vrot.slane %v3667_v7, 1 }
 0x335   : > { %v9927_v26 = vsel %vm3615_vm12, %v3634_v56, %v3638_v28  ;;  %v9932_v48 = vsel %vm9630_vm15, %v9663_v29, %v3287_v62  ;;  %v3646_v56 = vor.u32 %v3645_v12, %v3641_v9  ;;  %v3679_v28 = vshll.u32 %v9733_v58, 16 }
 0x336   : > { %v3660_v29 = vshll.u32 %v9932_v48, 16  ;;  %v9954_v44 = vsel %vm9630_vm15, %v9700_v16, %v3288_v57  ;;  %v3248_v11 = vrot.slane %v3170_v63, 7  ;;  %v3665_v57 = vshrl.u32 %v9726_v1, 16 }
 0x337   : > { %7359 = vmatmul.mubr.bf16.gmra.mrb[24].mxu1 %v9903_v38  ;;  %v9960_v12 = vsel %vm3615_vm12, %v3646_v56, %v3650_v42  ;;  %v3681_v16 = vrot.slane %v3679_v28, 1  ;;  %v3672_v5 = vshll.u32 %v9954_v44, 16  ;;  %v10726_v7 = vshll.u32 %v9704_v46, 16  ;;  %v8395_v46 = vld [vmem:[%s10542_s3 + $0xa8] sm:$0xff]  }
 0x338   : > { %7378 = vmatprep.mubr.bf16.mxu1 %v9907_v30  ;;  %v3662_v13 = vrot.slane %v3660_v29, 1  ;;  %10723 = vst [vmem:[#allocation17_spill] sm:$0xff] %v9960_v12  ;;  %v10725_v29 = vshll.u32 %v9721_v6, 16  ;;  %v3670_v28 = vor.u32 %v3669_v10, %v3665_v57  ;;  %v3703_v6 = vshll.u32 %v9767_v37, 16 }
 0x33f   : > { %7379 = vmatmul.mubr.bf16.vlgmr.msra.gmra.mrb[28].mxu1 %v9927_v26 }
 0x340   : > { %7411 = vmatpush3.bf16.msra.mxu1 %v9838_v39  ;;  %7382 = vmatprep.mubr.bf16.mxu1 %v9907_v30  ;;  %v10722_v39 = vshll.u32 %v9673_v24, 16  ;;  %v8393_v24 = vld [vmem:[%s10542_s3 + $0x98] sm:$0xff]  }
 0x341   : > { %7412 = vmatprep.subr.bf16.mxu1 %v8391_v31 }
 0x342   : > { %v3289_v62 = vrot.slane %v10722_v39, 7  ;;  %v3290_v39 = vrot.slane %v10725_v29, 7 }
 0x344   : > { %7413 = vmatpush3.bf16.msra.mxu1 %v8391_v31  ;;  %v9965_v9 = vsel %vm9630_vm15, %v9688_v25, %v3289_v62  ;;  %v9969_v31 = vsel %vm3615_vm12, %v3658_v3, %v3662_v13  ;;  %v3249_v25 = vshll.u32 %v9860_v20, 16  ;;  %v3677_v62 = vshrl.u32 %v9733_v58, 16  ;;  %v8394_v13 = vld [vmem:[%s10542_s3 + $0xa0] sm:$0xff]  }
 0x345   : > { %7414 = vmatprep.subr.bf16.mxu1 %v8392_v19  ;;  %10724 = vst [vmem:[#allocation16_spill] sm:$0xff] %v9969_v31  ;;  %v3684_v56 = vshll.u32 %v9965_v9, 16  ;;  %v3291_v3 = vrot.slane %v10726_v7, 7  ;;  %v3674_v20 = vrot.slane %v3672_v5, 1  ;;  %v3689_v5 = vshrl.u32 %v9774_v45, 16  ;;  %v8396_v7 = vld [vmem:[%s10542_s3 + $0xb0] sm:$0xff]  }
 0x346   : > { %v3682_v42 = vor.u32 %v3681_v16, %v3677_v62  ;;  %v3251_v29 = vor.u32 %v3249_v25, %v3248_v11  ;;  %v3299_v32 = vrot.slane %v3249_v25, 7 }
 0x347   : > { %7383 = vmatmul.mubr.bf16.gmra.mrb[0].mxu1 %v9960_v12  ;;  %v9989_v12 = vsel %vm9630_vm15, %v9740_v53, %v3290_v39  ;;  %v9995_v10 = vsel %vm3615_vm12, %v3670_v28, %v3674_v20  ;;  %v3705_v53 = vrot.slane %v3703_v6, 1  ;;  %v3727_v6 = vshll.u32 %v9823_v51, 16 }
 0x348   : > { %7386 = vmatprep.mubr.bf16.mxu1 %v9969_v31  ;;  %7415 = vmatpush3.bf16.msra.mxu1 %v8392_v19  ;;  %v3691_v19 = vshll.u32 %v9774_v45, 16  ;;  %v3686_v31 = vrot.slane %v3684_v56, 1  ;;  %v3696_v39 = vshll.u32 %v9989_v12, 16  ;;  %v10011_v25 = vsel %vm9630_vm15, %v3170_v63, %v3251_v29 }
 0x349   : > { %7416 = vmatprep.subr.bf16.mxu1 %v8393_v24  ;;  %v3701_v56 = vshrl.u32 %v9767_v37, 16 }
 0x34a   : > { %v3693_v16 = vrot.slane %v3691_v19, 1  ;;  %v10004_v57 = vsel %vm3615_vm12, %v3682_v42, %v3686_v31  ;;  %v4949_v19 = vrot.slane %v10011_v25, 1  ;;  %v3698_v20 = vrot.slane %v3696_v39, 1 }
 0x34b   : > { %v3706_v42 = vor.u32 %v3705_v53, %v3701_v56  ;;  %v3713_v39 = vshrl.u32 %v9809_v34, 16  ;;  %v10729_v56 = vshll.u32 %v9801_v21, 16  ;;  %v3751_v21 = vshll.u32 %v9853_v4, 16 }
 0x34c   : > { %7417 = vmatpush3.bf16.msra.mxu1 %v8393_v24  ;;  %v10000_v24 = vsel %vm9630_vm15, %v9728_v33, %v3291_v3  ;;  %v10727_v33 = vshll.u32 %v9762_v59, 16  ;;  %v10022_v3 = vsel %vm9630_vm15, %v3248_v11, %v3299_v32  ;;  %v3694_v28 = vor.u32 %v3693_v16, %v3689_v5 }
 0x34d   : > { %7418 = vmatprep.subr.bf16.mxu1 %v8394_v13  ;;  %v3708_v31 = vshll.u32 %v10000_v24, 16  ;;  %v3715_v59 = vshll.u32 %v9809_v34, 16  ;;  %v4950_v29 = vrot.slane %v10022_v3, 1  ;;  %v3729_v5 = vrot.slane %v3727_v6, 1 }
 0x34e   : > { %v3292_v62 = vrot.slane %v10727_v33, 7  ;;  %v10042_v16 = vsel %vm3615_vm12, %v3694_v28, %v3698_v20  ;;  %v10730_v28 = vshll.u32 %v9782_v52, 16 }
 0x34f   : > { %7387 = vmatmul.mubr.bf16.gmra.mrb[4].mxu1 %v9995_v10  ;;  %v3710_v33 = vrot.slane %v3708_v31, 1  ;;  %v10039_v11 = vsel %vm4099_vm13, %v4949_v19, %v4950_v29  ;;  %v3717_v53 = vrot.slane %v3715_v59, 1  ;;  %v3294_v31 = vrot.slane %v10729_v56, 7 }
 0x350   : > { %7390 = vmatprep.mubr.bf16.mxu1 %v10004_v57  ;;  %7419 = vmatpush3.bf16.msra.mxu1 %v8394_v13  ;;  %v10728_v13 = vshll.u32 %v9754_v14, 16  ;;  %v10033_v32 = vsel %vm9630_vm15, %v9779_v17, %v3292_v62  ;;  %v8397_v14 = vld [vmem:[%s10542_s3 + $0xb8] sm:$0xff]   ;;  %v3295_v59 = vrot.slane %v10730_v28, 7 }
 0x351   : > { %7420 = vmatprep.subr.bf16.mxu1 %v8395_v46  ;;  %v10051_v17 = vsel %vm3615_vm12, %v3706_v42, %v3710_v33  ;;  %v3720_v62 = vshll.u32 %v10033_v32, 16  ;;  %v3718_v19 = vor.u32 %v3717_v53, %v3713_v39  ;;  %v3739_v42 = vshll.u32 %v9849_v23, 16 }
 0x352   : > { %v3293_v63 = vrot.slane %v10728_v13, 7  ;;  %v3725_v13 = vshrl.u32 %v9823_v51, 16  ;;  %v10072_v20 = vsel %vm9630_vm15, %v9815_v2, %v3294_v31  ;;  %v10081_v53 = vsel %vm9630_vm15, %v9804_v0, %v3295_v59 }
 0x353   : > { %v3722_v6 = vrot.slane %v3720_v62, 1  ;;  %v3741_v52 = vrot.slane %v3739_v42, 1  ;;  %v3737_v2 = vshrl.u32 %v9849_v23, 16  ;;  %v3744_v39 = vshll.u32 %v10072_v20, 16 }
 0x354   : > { %7421 = vmatpush3.bf16.msra.mxu1 %v8395_v46  ;;  %v10047_v46 = vsel %vm9630_vm15, %v9777_v15, %v3293_v63  ;;  %v10063_v63 = vld [vmem:[%s10542_s3 + $0xc0] sm:$0xff]   ;;  %v10731_v62 = vshll.u32 %v9842_v18, 16  ;;  %v3749_v31 = vshrl.u32 %v9853_v4, 16  ;;  %v3756_v0 = vshll.u32 %v10081_v53, 16 }
 0x355   : > { %7422 = vmatprep.subr.bf16.mxu1 %v8396_v7  ;;  %v3732_v15 = vshll.u32 %v10047_v46, 16  ;;  %v10076_v33 = vsel %vm3615_vm12, %v3718_v19, %v3722_v6  ;;  %v3742_v28 = vor.u32 %v3741_v52, %v3737_v2  ;;  %v3763_v59 = vshll.u32 %v9878_v27, 16 }
 0x356   : > { %v3296_v56 = vrot.slane %v10731_v62, 7  ;;  %v3775_v42 = vshll.u32 %v9892_v40, 16 }
 0x357   : > { %7391 = vmatmul.mubr.bf16.gmra.mrb[8].mxu1 %v10042_v16  ;;  %v3734_v29 = vrot.slane %v3732_v15, 1 }
 0x358   : > { %7394 = vmatprep.mubr.bf16.mxu1 %v10051_v17  ;;  %7423 = vmatpush3.bf16.msra.mxu1 %v8396_v7  ;;  %v3730_v7 = vor.u32 %v3729_v5, %v3725_v13  ;;  %v3753_v5 = vrot.slane %v3751_v21, 1  ;;  %v10732_v13 = vshll.u32 %v9818_v47, 16  ;;  %v3758_v21 = vrot.slane %v3756_v0, 1 }
 0x359   : > { %7424 = vmatprep.subr.bf16.mxu1 %v8397_v14  ;;  %v10101_v18 = vsel %vm9630_vm15, %v9857_v22, %v3296_v56  ;;  %v3761_v22 = vshrl.u32 %v9878_v27, 16  ;;  %v3773_v56 = vshrl.u32 %v9892_v40, 16  ;;  %v3787_v0 = vshll.u32 %v9903_v38, 16 }
 0x35a   : > { %v3297_v15 = vrot.slane %v10732_v13, 7  ;;  %v3754_v19 = vor.u32 %v3753_v5, %v3749_v31  ;;  %v3777_v5 = vrot.slane %v3775_v42, 1  ;;  %v3768_v2 = vshll.u32 %v10101_v18, 16 }
 0x35c   : > { %7425 = vmatpush3.bf16.msra.mxu1 %v8397_v14  ;;  %v10085_v14 = vsel %vm3615_vm12, %v3730_v7, %v3734_v29  ;;  %v3746_v7 = vrot.slane %v3744_v39, 1  ;;  %v3765_v29 = vrot.slane %v3763_v59, 1  ;;  %v10109_v47 = vsel %vm9630_vm15, %v9844_v41, %v3297_v15 }
 0x35d   : > { %7458 = vmatprep.subr.bf16.mxu1 %v10063_v63  ;;  %v10113_v52 = vsel %vm3615_vm12, %v3754_v19, %v3758_v21  ;;  %v10733_v39 = vshll.u32 %v9873_v60, 16  ;;  %v3780_v41 = vshll.u32 %v10109_v47, 16  ;;  %v3778_v13 = vor.u32 %v3777_v5, %v3773_v56  ;;  %v8399_v56 = vld [vmem:[%s10542_s3 + $0xc8] sm:$0xff]  }
 0x35e   : > { %v10104_v6 = vsel %vm3615_vm12, %v3742_v28, %v3746_v7  ;;  %v3766_v31 = vor.u32 %v3765_v29, %v3761_v22  ;;  %v3770_v15 = vrot.slane %v3768_v2, 1  ;;  %v3789_v60 = vrot.slane %v3787_v0, 1 }
 0x35f   : > { %7395 = vmatmul.mubr.bf16.gmra.mrb[12].mxu1 %v10076_v33  ;;  %v3298_v62 = vrot.slane %v10733_v39, 7  ;;  %v3782_v28 = vrot.slane %v3780_v41, 1  ;;  %v3785_v7 = vshrl.u32 %v9903_v38, 16  ;;  %v4101_v5 = vrot.slane %v9884_v36, 1  ;;  %v8400_v41 = vld [vmem:[%s10542_s3 + $0xd0] sm:$0xff]  }
 0x360   : > { %7398 = vmatprep.mubr.bf16.mxu1 %v10085_v14  ;;  %v10129_v19 = vsel %vm3615_vm12, %v3766_v31, %v3770_v15  ;;  %v4103_v39 = vrot.slane %v9651_v50, 1  ;;  %v4109_v31 = vrot.slane %v9686_v43, 1  ;;  %v4107_v0 = vrot.slane %v9924_v49, 1  ;;  %v8402_v49 = vld [vmem:[%s10542_s3 + $0xe0] sm:$0xff]  }
 0x361   : > { %v10126_v59 = vsel %vm9630_vm15, %v9886_v8, %v3298_v62  ;;  %v10133_v42 = vsel %vm3615_vm12, %v3778_v13, %v3782_v28  ;;  %v3790_v29 = vor.u32 %v3789_v60, %v3785_v7  ;;  %v10145_v2 = vsel %vm4099_vm13, %v4100_v35, %v4101_v5 }
 0x362   : > { %v3792_v21 = vshll.u32 %v10126_v59, 16  ;;  %v4104_v62 = vrot.slane %v9644_v55, 1  ;;  %v4106_v55 = vrot.slane %v9697_v54, 1  ;;  %v4110_v13 = vrot.slane %v9932_v48, 1 }
 0x363   : > { %v4112_v48 = vrot.slane %v9726_v1, 1  ;;  %v4115_v60 = vrot.slane %v9733_v58, 1  ;;  %v4113_v7 = vrot.slane %v9954_v44, 1  ;;  %v8404_v44 = vld [vmem:[%s10542_s3 + $0xf0] sm:$0xff]   ;;  %v4121_v5 = vrot.slane %v9767_v37, 1 }
 0x364   : > { %v3794_v8 = vrot.slane %v3792_v21, 1  ;;  %v10154_v36 = vsel %vm4099_vm13, %v4103_v39, %v4104_v62  ;;  %v10170_v15 = vsel %vm4099_vm13, %v4106_v55, %v4107_v0  ;;  %v10174_v28 = vsel %vm4099_vm13, %v4109_v31, %v4110_v13 }
 0x365   : > { %v4116_v21 = vrot.slane %v9965_v9, 1  ;;  %v10188_v35 = vsel %vm4099_vm13, %v4112_v48, %v4113_v7  ;;  %v4118_v9 = vrot.slane %v9774_v45, 1  ;;  %v4119_v39 = vrot.slane %v9989_v12, 1  ;;  %v8406_v12 = vld [vmem:[%s10542_s3 + $0x100] sm:$0xff]  }
 0x366   : > { %v10141_v22 = vsel %vm3615_vm12, %v3790_v29, %v3794_v8  ;;  %v8403_v29 = vld [vmem:[%s10542_s3 + $0xe8] sm:$0xff]   ;;  %v4122_v62 = vrot.slane %v10000_v24, 1  ;;  %v4124_v24 = vrot.slane %v9809_v34, 1  ;;  %v4127_v31 = vrot.slane %v9823_v51, 1 }
 0x367   : > { %7399 = vmatmul.mubr.bf16.gmra.mrb[16].mxu1 %v10104_v6  ;;  %v10192_v8 = vsel %vm4099_vm13, %v4115_v60, %v4116_v21  ;;  %v4125_v0 = vrot.slane %v10033_v32, 1  ;;  %v4128_v13 = vrot.slane %v10047_v46, 1  ;;  %v4130_v48 = vrot.slane %v9849_v23, 1 }
 0x368   : > { %7402 = vmatprep.mubr.bf16.mxu1 %v10113_v52  ;;  %v10210_v55 = vsel %vm4099_vm13, %v4121_v5, %v4122_v62  ;;  %v4133_v60 = vrot.slane %v9853_v4, 1  ;;  %v4131_v32 = vrot.slane %v10072_v20, 1  ;;  %v4134_v7 = vrot.slane %v10081_v53, 1 }
 0x369   : > { %v4140_v20 = vrot.slane %v10109_v47, 1  ;;  %v4143_v62 = vrot.slane %v10126_v59, 1  ;;  %v8408_v47 = vld [vmem:[%s10542_s3 + $0x110] sm:$0xff]   ;;  %v8410_v59 = vld [vmem:[%s10542_s3 + $0x120] sm:$0xff]  }
 0x36a   : > { %v10233_v46 = vsel %vm4099_vm13, %v4130_v48, %v4131_v32  ;;  %v10237_v21 = vsel %vm4099_vm13, %v4133_v60, %v4134_v7  ;;  %v8412_v48 = vld [vmem:[%s10542_s3 + $0x130] sm:$0xff]   ;;  %v8413_v60 = vld [vmem:[%s10542_s3 + $0x138] sm:$0xff]   ;;  %v8414_v32 = vld [vmem:[%s10542_s3 + $0x140] sm:$0xff]  }
 0x36b   : > { %v8415_v7 = vld [vmem:[%s10542_s3 + $0x148] sm:$0xff]  }
 0x36f   : > { %7403 = vmatmul.mubr.bf16.gmra.mrb[20].mxu1 %v10129_v19 }
 0x370   : > { %7406 = vmatprep.mubr.bf16.mxu1 %v10133_v42 }
 0x377   : > { %7407 = vmatmul.mubr.bf16.gmra.mrb[24].mxu1 %v10141_v22 }
 0x378   : > { %7426 = vmatprep.mubr.bf16.mxu1 %v10145_v2 }
 0x37f   : > { %7427 = vmatmul.mubr.bf16.vlgmr.msra.gmra.mrb[28].mxu1 %v10154_v36 }
 0x380   : > { %7459 = vmatpush3.bf16.msra.mxu1 %v10063_v63  ;;  %7430 = vmatprep.mubr.bf16.mxu1 %v10145_v2  ;;  %v8401_v63 = vld [vmem:[%s10542_s3 + $0xd8] sm:$0xff]  }
 0x381   : > { %7460 = vmatprep.subr.bf16.mxu1 %v8399_v56 }
 0x384   : > { %7461 = vmatpush3.bf16.msra.mxu1 %v8399_v56  ;;  %v8405_v56 = vld [vmem:[%s10542_s3 + $0xf8] sm:$0xff]  }
 0x385   : > { %7462 = vmatprep.subr.bf16.mxu1 %v8400_v41 }
 0x387   : > { %7431 = vmatmul.mubr.bf16.gmra.mrb[0].mxu1 %v10170_v15 }
 0x388   : > { %7434 = vmatprep.mubr.bf16.mxu1 %v10174_v28  ;;  %7463 = vmatpush3.bf16.msra.mxu1 %v8400_v41  ;;  %v10206_v41 = vsel %vm4099_vm13, %v4118_v9, %v4119_v39  ;;  %v4137_v9 = vrot.slane %v10101_v18, 1  ;;  %v4142_v39 = vrot.slane %v9903_v38, 1  ;;  %v8407_v18 = vld [vmem:[%s10542_s3 + $0x108] sm:$0xff]  }
 0x389   : > { %7464 = vmatprep.subr.bf16.mxu1 %v8401_v63 }
 0x38c   : > { %7465 = vmatpush3.bf16.msra.mxu1 %v8401_v63  ;;  %v10221_v63 = vsel %vm4099_vm13, %v4124_v24, %v4125_v0 }
 0x38d   : > { %7466 = vmatprep.subr.bf16.mxu1 %v8402_v49 }
 0x38f   : > { %7435 = vmatmul.mubr.bf16.gmra.mrb[4].mxu1 %v10188_v35 }
 0x390   : > { %7438 = vmatprep.mubr.bf16.mxu1 %v10192_v8  ;;  %7467 = vmatpush3.bf16.msra.mxu1 %v8402_v49  ;;  %v10225_v49 = vsel %vm4099_vm13, %v4127_v31, %v4128_v13  ;;  %v8411_v31 = vld [vmem:[%s10542_s3 + $0x128] sm:$0xff]  }
 0x391   : > { %7468 = vmatprep.subr.bf16.mxu1 %v8403_v29 }
 0x394   : > { %7469 = vmatpush3.bf16.msra.mxu1 %v8403_v29  ;;  %v4136_v29 = vrot.slane %v9878_v27, 1 }
 0x395   : > { %7470 = vmatprep.subr.bf16.mxu1 %v8404_v44 }
 0x396   : > { %v10245_v53 = vsel %vm4099_vm13, %v4136_v29, %v4137_v9  ;;  %v10734_v29 = vld [vmem:[#allocation17_spill] sm:$0xff]  ;;  %v10735_v9 = vld [vmem:[#allocation16_spill] sm:$0xff] }
 0x397   : > { %7439 = vmatmul.mubr.bf16.gmra.mrb[8].mxu1 %v10206_v41 }
 0x398   : > { %7442 = vmatprep.mubr.bf16.mxu1 %v10210_v55  ;;  %7471 = vmatpush3.bf16.msra.mxu1 %v8404_v44  ;;  %v4139_v44 = vrot.slane %v9892_v40, 1 }
 0x399   : > { %7472 = vmatprep.subr.bf16.mxu1 %v8405_v56 }
 0x39a   : > { %v10249_v5 = vsel %vm4099_vm13, %v4139_v44, %v4140_v20  ;;  %v8416_v44 = vld [vmem:[%s10542_s3 + $0x150] sm:$0xff]   ;;  %v8418_v20 = vld [vmem:[%s10542_s3 + $0x160] sm:$0xff]  }
 0x39c   : > { %7473 = vmatpush3.bf16.msra.mxu1 %v8405_v56  ;;  %v10255_v56 = vsel %vm4099_vm13, %v4142_v39, %v4143_v62  ;;  %v8419_v39 = vld [vmem:[%s10542_s3 + $0x168] sm:$0xff]   ;;  %v8420_v62 = vld [vmem:[%s10542_s3 + $0x170] sm:$0xff]  }
 0x39d   : > { %7506 = vmatprep.subr.bf16.mxu1 %v8406_v12 }
 0x39f   : > { %7443 = vmatmul.mubr.bf16.gmra.mrb[12].mxu1 %v10221_v63 }
 0x3a0   : > { %7446 = vmatprep.mubr.bf16.mxu1 %v10225_v49 }
 0x3a7   : > { %7447 = vmatmul.mubr.bf16.gmra.mrb[16].mxu1 %v10233_v46 }
 0x3a8   : > { %7450 = vmatprep.mubr.bf16.mxu1 %v10237_v21 }
 0x3af   : > { %7451 = vmatmul.mubr.bf16.gmra.mrb[20].mxu1 %v10245_v53 }
 0x3b0   : > { %7454 = vmatprep.mubr.bf16.mxu1 %v10249_v5 }
 0x3b7   : > { %7455 = vmatmul.mubr.bf16.gmra.mrb[24].mxu1 %v10255_v56 }
 0x3b8   : > { %7474 = vmatprep.mubr.bf16.mxu1 %v9651_v50  ;;  %v8409_v50 = vld [vmem:[%s10542_s3 + $0x118] sm:$0xff]  }
 0x3bf   : > { %7475 = vmatmul.mubr.bf16.vlgmr.msra.gmra.mrb[28].mxu1 %v9640_v61 }
 0x3c0   : > { %7507 = vmatpush3.bf16.msra.mxu1 %v8406_v12  ;;  %7478 = vmatprep.mubr.bf16.mxu1 %v9697_v54 }
 0x3c1   : > { %7508 = vmatprep.subr.bf16.mxu1 %v8407_v18 }
 0x3c4   : > { %7509 = vmatpush3.bf16.msra.mxu1 %v8407_v18  ;;  %v8421_v18 = vld [vmem:[%s10542_s3 + $0x178] sm:$0xff]  }
 0x3c5   : > { %7510 = vmatprep.subr.bf16.mxu1 %v8408_v47 }
 0x3c7   : > { %7479 = vmatmul.mubr.bf16.gmra.mrb[0].mxu1 %v9686_v43 }
 0x3c8   : > { %7482 = vmatprep.mubr.bf16.mxu1 %v9726_v1  ;;  %7511 = vmatpush3.bf16.msra.mxu1 %v8408_v47  ;;  %v8422_v47 = vld [vmem:[%s10542_s3 + $0x180] sm:$0xff]  }
 0x3c9   : > { %7512 = vmatprep.subr.bf16.mxu1 %v8409_v50 }
 0x3cc   : > { %7513 = vmatpush3.bf16.msra.mxu1 %v8409_v50  ;;  %v4679_v50 = vshll.u32 %v10011_v25, 16 }
 0x3cd   : > { %7514 = vmatprep.subr.bf16.mxu1 %v8410_v59 }
 0x3cf   : > { %v10275_v12 = vpop.f32.mrb[32].mxu0  ;;  %7483 = vmatmul.mubr.bf16.gmra.mrb[4].mxu1 %v9733_v58 }
 0x3d0   : > { %v10277_v24 = vpop.f32.mrb[33].mxu0  ;;  %7486 = vmatprep.mubr.bf16.mxu1 %v9774_v45  ;;  %7515 = vmatpush3.bf16.msra.mxu1 %v8410_v59  ;;  %v4681_v59 = vrot.slane %v4679_v50, 1  ;;  %v8432_v50 = vld [vmem:[%s10542_s3 + $0x1d0] sm:$0xff]  }
 0x3d1   : > { %v10282_v0 = vpop.f32.mrb[34].mxu0  ;;  %7516 = vmatprep.subr.bf16.mxu1 %v8411_v31 }
 0x3d2   : > { %v10285_v13 = vpop.f32.mrb[35].mxu0 }
 0x3d4   : > { %7517 = vmatpush3.bf16.msra.mxu1 %v8411_v31  ;;  %v4677_v31 = vshrl.u32 %v10011_v25, 16 }
 0x3d5   : > { %7518 = vmatprep.subr.bf16.mxu1 %v8412_v48 }
 0x3d7   : > { %7487 = vmatmul.mubr.bf16.gmra.mrb[8].mxu1 %v9767_v37 }
 0x3d8   : > { %7490 = vmatprep.mubr.bf16.mxu1 %v9809_v34  ;;  %7519 = vmatpush3.bf16.msra.mxu1 %v8412_v48  ;;  %v4684_v48 = vshll.u32 %v10022_v3, 16  ;;  %v8424_v3 = vld [vmem:[%s10542_s3 + $0x190] sm:$0xff]  }
 0x3d9   : > { %7520 = vmatprep.subr.bf16.mxu1 %v8413_v60 }
 0x3dc   : > { %7521 = vmatpush3.bf16.msra.mxu1 %v8413_v60  ;;  %v4682_v60 = vor.u32 %v4681_v59, %v4677_v31 }
 0x3dd   : > { %7554 = vmatprep.subr.bf16.mxu1 %v8414_v32 }
 0x3df   : > { %7491 = vmatmul.mubr.bf16.gmra.mrb[12].mxu1 %v9823_v51 }
 0x3e0   : > { %7494 = vmatprep.mubr.bf16.mxu1 %v9849_v23 }
 0x3e7   : > { %7495 = vmatmul.mubr.bf16.gmra.mrb[16].mxu1 %v9853_v4 }
 0x3e8   : > { %7498 = vmatprep.mubr.bf16.mxu1 %v9878_v27 }
 0x3ef   : > { %7499 = vmatmul.mubr.bf16.gmra.mrb[20].mxu1 %v9892_v40 }
 0x3f0   : > { %7502 = vmatprep.mubr.bf16.mxu1 %v9903_v38 }
 0x3f7   : > { %7503 = vmatmul.mubr.bf16.gmra.mrb[24].mxu1 %v10011_v25 }
 0x3f8   : > { %7522 = vmatprep.mubr.bf16.mxu1 %v9927_v26  ;;  %v8417_v26 = vld [vmem:[%s10542_s3 + $0x158] sm:$0xff]  }
 0x3ff   : > { %7523 = vmatmul.mubr.bf16.vlgmr.msra.gmra.mrb[28].mxu1 %v9907_v30 }
 0x400   : > { %7555 = vmatpush3.bf16.msra.mxu1 %v8414_v32  ;;  %7526 = vmatprep.mubr.bf16.mxu1 %v10734_v29  ;;  %v4686_v32 = vrot.slane %v4684_v48, 1 }
 0x401   : > { %7556 = vmatprep.subr.bf16.mxu1 %v8415_v7 }
 0x404   : > { %7557 = vmatpush3.bf16.msra.mxu1 %v8415_v7  ;;  %v10349_v7 = vsel %vm3615_vm12, %v4682_v60, %v4686_v32 }
 0x405   : > { %7558 = vmatprep.subr.bf16.mxu1 %v8416_v44 }
 0x407   : > { %7527 = vmatmul.mubr.bf16.gmra.mrb[0].mxu1 %v10735_v9 }
 0x408   : > { %7530 = vmatprep.mubr.bf16.mxu1 %v9995_v10  ;;  %7559 = vmatpush3.bf16.msra.mxu1 %v8416_v44  ;;  %v8423_v44 = vld [vmem:[%s10542_s3 + $0x188] sm:$0xff]  }
 0x409   : > { %7560 = vmatprep.subr.bf16.mxu1 %v8417_v26 }
 0x40c   : > { %7561 = vmatpush3.bf16.msra.mxu1 %v8417_v26  ;;  %v8426_v26 = vld [vmem:[%s10542_s3 + $0x1a0] sm:$0xff]  }
 0x40d   : > { %7562 = vmatprep.subr.bf16.mxu1 %v8418_v20 }
 0x40f   : > { %7531 = vmatmul.mubr.bf16.gmra.mrb[4].mxu1 %v10004_v57 }
 0x410   : > { %7534 = vmatprep.mubr.bf16.mxu1 %v10042_v16  ;;  %7563 = vmatpush3.bf16.msra.mxu1 %v8418_v20  ;;  %v8427_v20 = vld [vmem:[%s10542_s3 + $0x1a8] sm:$0xff]  }
 0x411   : > { %7564 = vmatprep.subr.bf16.mxu1 %v8419_v39 }
 0x414   : > { %7565 = vmatpush3.bf16.msra.mxu1 %v8419_v39  ;;  %v8428_v39 = vld [vmem:[%s10542_s3 + $0x1b0] sm:$0xff]  }
 0x415   : > { %7566 = vmatprep.subr.bf16.mxu1 %v8420_v62 }
 0x417   : > { %7535 = vmatmul.mubr.bf16.gmra.mrb[8].mxu1 %v10051_v17 }
 0x418   : > { %7538 = vmatprep.mubr.bf16.mxu1 %v10076_v33  ;;  %7567 = vmatpush3.bf16.msra.mxu1 %v8420_v62  ;;  %v8429_v62 = vld [vmem:[%s10542_s3 + $0x1b8] sm:$0xff]  }
 0x419   : > { %7568 = vmatprep.subr.bf16.mxu1 %v8421_v18 }
 0x41c   : > { %7569 = vmatpush3.bf16.msra.mxu1 %v8421_v18  ;;  %v8430_v18 = vld [vmem:[%s10542_s3 + $0x1c0] sm:$0xff]  }
 0x41d   : > { %7602 = vmatprep.subr.bf16.mxu1 %v8422_v47 }
 0x41f   : > { %7539 = vmatmul.mubr.bf16.gmra.mrb[12].mxu1 %v10085_v14 }
 0x420   : > { %7542 = vmatprep.mubr.bf16.mxu1 %v10104_v6 }
 0x427   : > { %7543 = vmatmul.mubr.bf16.gmra.mrb[16].mxu1 %v10113_v52 }
 0x428   : > { %7546 = vmatprep.mubr.bf16.mxu1 %v10129_v19 }
 0x42f   : > { %7547 = vmatmul.mubr.bf16.gmra.mrb[20].mxu1 %v10133_v42 }
 0x430   : > { %7550 = vmatprep.mubr.bf16.mxu1 %v10141_v22 }
 0x437   : > { %7551 = vmatmul.mubr.bf16.gmra.mrb[24].mxu1 %v10349_v7 }
 0x438   : > { %7570 = vmatprep.mubr.bf16.mxu1 %v10154_v36  ;;  %v8425_v36 = vld [vmem:[%s10542_s3 + $0x198] sm:$0xff]  }
 0x43f   : > { %7571 = vmatmul.mubr.bf16.vlgmr.msra.gmra.mrb[28].mxu1 %v10145_v2 }
 0x440   : > { %7603 = vmatpush3.bf16.msra.mxu1 %v8422_v47  ;;  %7574 = vmatprep.mubr.bf16.mxu1 %v10170_v15  ;;  %v8431_v47 = vld [vmem:[%s10542_s3 + $0x1c8] sm:$0xff]  }
 0x441   : > { %7604 = vmatprep.subr.bf16.mxu1 %v8423_v44 }
 0x444   : > { %7605 = vmatpush3.bf16.msra.mxu1 %v8423_v44 }
 0x445   : > { %7606 = vmatprep.subr.bf16.mxu1 %v8424_v3 }
 0x447   : > { %7575 = vmatmul.mubr.bf16.gmra.mrb[0].mxu1 %v10174_v28 }
 0x448   : > { %7578 = vmatprep.mubr.bf16.mxu1 %v10188_v35  ;;  %7607 = vmatpush3.bf16.msra.mxu1 %v8424_v3 }
 0x449   : > { %7608 = vmatprep.subr.bf16.mxu1 %v8425_v36 }
 0x44c   : > { %7609 = vmatpush3.bf16.msra.mxu1 %v8425_v36 }
 0x44d   : > { %7610 = vmatprep.subr.bf16.mxu1 %v8426_v26 }
 0x44f   : > { %7579 = vmatmul.mubr.bf16.gmra.mrb[4].mxu1 %v10192_v8 }
 0x450   : > { %7582 = vmatprep.mubr.bf16.mxu1 %v10206_v41  ;;  %7611 = vmatpush3.bf16.msra.mxu1 %v8426_v26 }
 0x451   : > { %7612 = vmatprep.subr.bf16.mxu1 %v8427_v20 }
 0x454   : > { %7613 = vmatpush3.bf16.msra.mxu1 %v8427_v20 }
 0x455   : > { %7614 = vmatprep.subr.bf16.mxu1 %v8428_v39 }
 0x457   : > { %7583 = vmatmul.mubr.bf16.gmra.mrb[8].mxu1 %v10210_v55 }
 0x458   : > { %7586 = vmatprep.mubr.bf16.mxu1 %v10221_v63  ;;  %7615 = vmatpush3.bf16.msra.mxu1 %v8428_v39 }
 0x459   : > { %7616 = vmatprep.subr.bf16.mxu1 %v8429_v62 }
 0x45c   : > { %7617 = vmatpush3.bf16.msra.mxu1 %v8429_v62 }
 0x45d   : > { %7650 = vmatprep.subr.bf16.mxu1 %v8430_v18 }
 0x45f   : > { %7587 = vmatmul.mubr.bf16.gmra.mrb[12].mxu1 %v10225_v49 }
 0x460   : > { %7590 = vmatprep.mubr.bf16.mxu1 %v10233_v46 }
 0x467   : > { %7591 = vmatmul.mubr.bf16.gmra.mrb[16].mxu1 %v10237_v21 }
 0x468   : > { %7594 = vmatprep.mubr.bf16.mxu1 %v10245_v53 }
 0x46f   : > { %7595 = vmatmul.mubr.bf16.gmra.mrb[20].mxu1 %v10249_v5 }
 0x470   : > { %7598 = vmatprep.mubr.bf16.mxu1 %v10255_v56 }
 0x477   : > { %7599 = vmatmul.mubr.bf16.gmra.mrb[24].mxu1 %v10039_v11 }
 0x478   : > { %7618 = vmatprep.mubr.bf16.mxu1 %v9640_v61  ;;  %v8433_v61 = vld [vmem:[%s10542_s3 + $0x1d8] sm:$0xff]  }
 0x47f   : > { %7619 = vmatmul.mubr.bf16.vlgmr.msra.gmra.mrb[28].mxu1 %v9697_v54  ;;  %v8435_v54 = vld [vmem:[%s10542_s3 + $0x1e8] sm:$0xff]  }
 0x480   : > { %7651 = vmatpush3.bf16.msra.mxu1 %v8430_v18  ;;  %7622 = vmatprep.mubr.bf16.mxu1 %v9686_v43  ;;  %v8434_v43 = vld [vmem:[%s10542_s3 + $0x1e0] sm:$0xff]  }
 0x481   : > { %7652 = vmatprep.subr.bf16.mxu1 %v8431_v47 }
 0x484   : > { %7653 = vmatpush3.bf16.msra.mxu1 %v8431_v47 }
 0x485   : > { %7654 = vmatprep.subr.bf16.mxu1 %v8432_v50 }
 0x487   : > { %7623 = vmatmul.mubr.bf16.gmra.mrb[0].mxu1 %v9726_v1  ;;  %v8436_v1 = vld [vmem:[%s10542_s3 + $0x1f0] sm:$0xff]  }
 0x488   : > { %7626 = vmatprep.mubr.bf16.mxu1 %v9733_v58  ;;  %7655 = vmatpush3.bf16.msra.mxu1 %v8432_v50  ;;  %v8437_v58 = vld [vmem:[%s10542_s3 + $0x1f8] sm:$0xff]  }
 0x489   : > { %7656 = vmatprep.subr.bf16.mxu1 %v8433_v61 }
 0x48c   : > { %7657 = vmatpush3.bf16.msra.mxu1 %v8433_v61 }
 0x48d   : > { %7658 = vmatprep.subr.bf16.mxu1 %v8434_v43 }
 0x48f   : > { %7627 = vmatmul.mubr.bf16.gmra.mrb[4].mxu1 %v9774_v45  ;;  %v8439_v45 = vld [vmem:[%s10542_s3 + $0x208] sm:$0xff]  }
 0x490   : > { %7630 = vmatprep.mubr.bf16.mxu1 %v9767_v37  ;;  %7659 = vmatpush3.bf16.msra.mxu1 %v8434_v43  ;;  %v8438_v37 = vld [vmem:[%s10542_s3 + $0x200] sm:$0xff]  }
 0x491   : > { %7660 = vmatprep.subr.bf16.mxu1 %v8435_v54 }
 0x494   : > { %7661 = vmatpush3.bf16.msra.mxu1 %v8435_v54 }
 0x495   : > { %7662 = vmatprep.subr.bf16.mxu1 %v8436_v1 }
 0x497   : > { %7631 = vmatmul.mubr.bf16.gmra.mrb[8].mxu1 %v9809_v34  ;;  %v8441_v34 = vld [vmem:[%s10542_s3 + $0x218] sm:$0xff]  }
 0x498   : > { %7634 = vmatprep.mubr.bf16.mxu1 %v9823_v51  ;;  %7663 = vmatpush3.bf16.msra.mxu1 %v8436_v1  ;;  %v8442_v51 = vld [vmem:[%s10542_s3 + $0x220] sm:$0xff]  }
 0x499   : > { %7664 = vmatprep.subr.bf16.mxu1 %v8437_v58 }
 0x49c   : > { %7665 = vmatpush3.bf16.msra.mxu1 %v8437_v58 }
 0x49d   : > { %7698 = vmatprep.subr.bf16.mxu1 %v8438_v37 }
 0x49f   : > { %7635 = vmatmul.mubr.bf16.gmra.mrb[12].mxu1 %v9849_v23  ;;  %v8440_v23 = vld [vmem:[%s10542_s3 + $0x210] sm:$0xff]  }
 0x4a0   : > { %7638 = vmatprep.mubr.bf16.mxu1 %v9853_v4  ;;  %v8443_v4 = vld [vmem:[%s10542_s3 + $0x228] sm:$0xff]  }
 0x4a7   : > { %7639 = vmatmul.mubr.bf16.gmra.mrb[16].mxu1 %v9878_v27  ;;  %v8444_v27 = vld [vmem:[%s10542_s3 + $0x230] sm:$0xff]  }
 0x4a8   : > { %7642 = vmatprep.mubr.bf16.mxu1 %v9892_v40  ;;  %v8445_v40 = vld [vmem:[%s10542_s3 + $0x238] sm:$0xff]  }
 0x4af   : > { %7643 = vmatmul.mubr.bf16.gmra.mrb[20].mxu1 %v9903_v38 }
 0x4b0   : > { %7646 = vmatprep.mubr.bf16.mxu1 %v10011_v25 }
 0x4b7   : > { %7647 = vmatmul.mubr.bf16.gmra.mrb[24].mxu1 %v9903_v38  ;;  %v10488_v38 = vld [vmem:[%s10543_s4] ss:$0 sm:$0xff] }
 0x4b8   : > { %7666 = vmatprep.mubr.bf16.mxu1 %v9907_v30  ;;  %v3585_v30 = vadd.f32 %v10275_v12, %v10488_v38  ;;  %v3586_v25 = vadd.f32 %v10282_v0, %v10488_v38 }
 0x4bf   : > { %7667 = vmatmul.mubr.bf16.vlgmr.msra.gmra.mrb[28].mxu1 %v10734_v29 }
 0x4c0   : > { %7699 = vmatpush3.bf16.msra.mxu1 %v8438_v37  ;;  %7670 = vmatprep.mubr.bf16.mxu1 %v10735_v9 }
 0x4c1   : > { %7700 = vmatprep.subr.bf16.mxu1 %v8439_v45 }
 0x4c4   : > { %7701 = vmatpush3.bf16.msra.mxu1 %v8439_v45 }
 0x4c5   : > { %7702 = vmatprep.subr.bf16.mxu1 %v8440_v23 }
 0x4c7   : > { %7671 = vmatmul.mubr.bf16.gmra.mrb[0].mxu1 %v9995_v10  ;;  %v3583_v10 = vadd.f32 %v10488_v38, %v10277_v24 }
 0x4c8   : > { %7674 = vmatprep.mubr.bf16.mxu1 %v10004_v57  ;;  %7703 = vmatpush3.bf16.msra.mxu1 %v8440_v23 }
 0x4c9   : > { %7704 = vmatprep.subr.bf16.mxu1 %v8441_v34 }
 0x4cc   : > { %7705 = vmatpush3.bf16.msra.mxu1 %v8441_v34 }
 0x4cd   : > { %7706 = vmatprep.subr.bf16.mxu1 %v8442_v51 }
 0x4cf   : > { %7675 = vmatmul.mubr.bf16.gmra.mrb[4].mxu1 %v10042_v16 }
 0x4d0   : > { %7678 = vmatprep.mubr.bf16.mxu1 %v10051_v17  ;;  %7707 = vmatpush3.bf16.msra.mxu1 %v8442_v51 }
 0x4d1   : > { %7708 = vmatprep.subr.bf16.mxu1 %v8443_v4 }
 0x4d4   : > { %7709 = vmatpush3.bf16.msra.mxu1 %v8443_v4 }
 0x4d5   : > { %7710 = vmatprep.subr.bf16.mxu1 %v8444_v27 }
 0x4d7   : > { %7679 = vmatmul.mubr.bf16.gmra.mrb[8].mxu1 %v10076_v33 }
 0x4d8   : > { %7682 = vmatprep.mubr.bf16.mxu1 %v10085_v14  ;;  %7711 = vmatpush3.bf16.msra.mxu1 %v8444_v27 }
 0x4d9   : > { %7712 = vmatprep.subr.bf16.mxu1 %v8445_v40 }
 0x4dc   : > { %7713 = vmatpush3.bf16.msra.mxu1 %v8445_v40 }
 0x4df   : > { %7683 = vmatmul.mubr.bf16.gmra.mrb[12].mxu1 %v10104_v6 }
 0x4e0   : > { %7686 = vmatprep.mubr.bf16.mxu1 %v10113_v52 }
 0x4e7   : > { %7687 = vmatmul.mubr.bf16.gmra.mrb[16].mxu1 %v10129_v19 }
 0x4e8   : > { %7690 = vmatprep.mubr.bf16.mxu1 %v10133_v42 }
 0x4ef   : > { %7691 = vmatmul.mubr.bf16.gmra.mrb[20].mxu1 %v10141_v22 }
 0x4f0   : > { %7694 = vmatprep.mubr.bf16.mxu1 %v10349_v7 }
 0x4f7   : > { %7695 = vmatmul.mubr.bf16.gmra.mrb[24].mxu1 %v10141_v22 }
 0x4f8   : > { %7714 = vmatprep.mubr.bf16.mxu1 %v10145_v2 }
 0x4ff   : > { %7715 = vmatmul.mubr.bf16.vlgmr.msra.gmra.mrb[28].mxu1 %v10170_v15 }
 0x500   : > { %7718 = vmatprep.mubr.bf16.mxu1 %v10174_v28 }
 0x507   : > { %7719 = vmatmul.mubr.bf16.gmra.mrb[0].mxu1 %v10188_v35 }
 0x508   : > { %7722 = vmatprep.mubr.bf16.mxu1 %v10192_v8 }
 0x50f   : > { %7723 = vmatmul.mubr.bf16.gmra.mrb[4].mxu1 %v10206_v41 }
 0x510   : > { %7726 = vmatprep.mubr.bf16.mxu1 %v10210_v55 }
 0x517   : > { %7727 = vmatmul.mubr.bf16.gmra.mrb[8].mxu1 %v10221_v63 }
 0x518   : > { %7730 = vmatprep.mubr.bf16.mxu1 %v10225_v49 }
 0x51f   : > { %7731 = vmatmul.mubr.bf16.gmra.mrb[12].mxu1 %v10233_v46 }
 0x520   : > { %7734 = vmatprep.mubr.bf16.mxu1 %v10237_v21 }
 0x527   : > { %7735 = vmatmul.mubr.bf16.gmra.mrb[16].mxu1 %v10245_v53 }
 0x528   : > { %7738 = vmatprep.mubr.bf16.mxu1 %v10249_v5 }
 0x52f   : > { %7739 = vmatmul.mubr.bf16.gmra.mrb[20].mxu1 %v10255_v56 }
 0x530   : > { %7742 = vmatprep.mubr.bf16.mxu1 %v10039_v11  ;;  %v3584_v11 = vadd.f32 %v10488_v38, %v10285_v13 }
 0x537   : > { %7743 = vmatmul.mubr.bf16.gmra.mrb[24].mxu1 %v10255_v56 }
 0x5d2   : > { %v7716_v57 = vpop.f32.mrb[28].mxu1 }
 0x5d3   : > { %v7795_v16 = vadd.f32 %v7716_v57, %v3585_v30  ;;  %v5826_v17 = vpop.f32.mrb[29].mxu1 }
 0x5d4   : > { %v7797_v33 = vadd.f32 %v5826_v17, %v3583_v10  ;;  %v7717_v14 = vpop.f32.mrb[30].mxu1 }
 0x5d5   : > { %v7799_v6 = vadd.f32 %v7717_v14, %v3586_v25  ;;  %v5829_v52 = vpop.f32.mrb[31].mxu1  ;;  %v6019_v41 = vmul.f32 0.01, %v7795_v16  ;;  %vm5987_vm0 = vcmp.ge.f32.partialorder %v7795_v16, 0.0 }
 0x5d6   : > { %v7801_v19 = vadd.f32 %v5829_v52, %v3584_v11  ;;  %vm5985_vm15 = vcmp.ge.f32.partialorder %v7797_v33, 0.0  ;;  %v6017_v42 = vmul.f32 0.01, %v7797_v33 }
 0x5d7   : > { %v6051_v49 = vsel %vm5987_vm0, %v7795_v16, %v6019_v41  ;;  %v6020_v46 = vmul.f32 0.01, %v7799_v6  ;;  %vm5988_vm1 = vcmp.ge.f32.partialorder %v7799_v6, 0.0 }
 0x5d8   : > { %v6049_v22 = vsel %vm5985_vm15, %v7797_v33, %v6017_v42  ;;  %v6018_v2 = vmul.f32 0.01, %v7801_v19  ;;  %vm5986_vm14 = vcmp.ge.f32.partialorder %v7801_v19, 0.0 }
 0x5d9   : > { %6081 = vxpose.xlu0.b32.start [1/16] (narrow) %v6049_v22, 8  ;;  %v6052_v12 = vsel %vm5988_vm1, %v7799_v6, %v6020_v46 }
 0x5da   : > { %v7720_v15 = vpop.f32.mrb[0].mxu1  ;;  %v6050_v8 = vsel %vm5986_vm14, %v7801_v19, %v6018_v2 }
 0x5db   : > { %v5842_v28 = vpop.f32.mrb[1].mxu1  ;;  %v7802_v13 = vadd.f32 %v7720_v15, %v10488_v38 }
 0x5dc   : > { %v7721_v35 = vpop.f32.mrb[2].mxu1  ;;  %v7803_v63 = vadd.f32 %v10488_v38, %v5842_v28 }
 0x5dd   : > { %6082 = vxpose.xlu0.b32.cont [2/16] (narrow) %v6050_v8, 8  ;;  %v5845_v55 = vpop.f32.mrb[3].mxu1  ;;  %v7804_v48 = vadd.f32 %v7721_v35, %v10488_v38  ;;  %v6023_v7 = vmul.f32 0.01, %v7802_v13  ;;  %vm5991_vm4 = vcmp.ge.f32.partialorder %v7802_v13, 0.0 }
 0x5de   : > { %v7805_v5 = vadd.f32 %v10488_v38, %v5845_v55  ;;  %v6021_v24 = vmul.f32 0.01, %v7803_v63  ;;  %vm5989_vm2 = vcmp.ge.f32.partialorder %v7803_v63, 0.0 }
 0x5df   : > { %v6055_v36 = vsel %vm5991_vm4, %v7802_v13, %v6023_v7  ;;  %v6024_v26 = vmul.f32 0.01, %v7804_v48  ;;  %vm5992_vm5 = vcmp.ge.f32.partialorder %v7804_v48, 0.0 }
 0x5e0   : > { %v6053_v29 = vsel %vm5989_vm2, %v7803_v63, %v6021_v24  ;;  %v6022_v9 = vmul.f32 0.01, %v7805_v5  ;;  %vm5990_vm3 = vcmp.ge.f32.partialorder %v7805_v5, 0.0 }
 0x5e1   : > { %6083 = vxpose.xlu0.b32.cont [3/16] (narrow) %v6051_v49, 8  ;;  %v6056_v61 = vsel %vm5992_vm5, %v7804_v48, %v6024_v26 }
 0x5e2   : > { %v7724_v21 = vpop.f32.mrb[4].mxu1  ;;  %v6054_v32 = vsel %vm5990_vm3, %v7805_v5, %v6022_v9 }
 0x5e3   : > { %v5858_v53 = vpop.f32.mrb[5].mxu1  ;;  %v7806_v58 = vadd.f32 %v7724_v21, %v10488_v38 }
 0x5e4   : > { %v7725_v56 = vpop.f32.mrb[6].mxu1  ;;  %v7807_v3 = vadd.f32 %v10488_v38, %v5858_v53 }
 0x5e5   : > { %6084 = vxpose.xlu0.b32.cont [4/16] (narrow) %v6052_v12, 8  ;;  %v5861_v0 = vpop.f32.mrb[7].mxu1  ;;  %v7808_v27 = vadd.f32 %v7725_v56, %v10488_v38  ;;  %vm5995_vm10 = vcmp.ge.f32.partialorder %v7806_v58, 0.0  ;;  %v6027_v30 = vmul.f32 0.01, %v7806_v58 }
 0x5e6   : > { %v6025_v62 = vmul.f32 0.01, %v7807_v3  ;;  %v7809_v18 = vadd.f32 %v10488_v38, %v5861_v0  ;;  %vm5993_vm6 = vcmp.ge.f32.partialorder %v7807_v3, 0.0 }
 0x5e7   : > { %v6059_v14 = vsel %vm5995_vm10, %v7806_v58, %v6027_v30  ;;  %v6028_v6 = vmul.f32 0.01, %v7808_v27  ;;  %vm5996_vm12 = vcmp.ge.f32.partialorder %v7808_v27, 0.0 }
 0x5e8   : > { %v6057_v37 = vsel %vm5993_vm6, %v7807_v3, %v6025_v62  ;;  %v6026_v34 = vmul.f32 0.01, %v7809_v18  ;;  %vm5994_vm8 = vcmp.ge.f32.partialorder %v7809_v18, 0.0 }
 0x5e9   : > { %6085 = vxpose.xlu0.b32.cont [5/16] (narrow) %v6053_v29, 8  ;;  %v6060_v28 = vsel %vm5996_vm12, %v7808_v27, %v6028_v6 }
 0x5ea   : > { %v10501_v59 = vpop.f32.mrb[8].mxu1  ;;  %v6058_v25 = vsel %vm5994_vm8, %v7809_v18, %v6026_v34 }
 0x5eb   : > { %v5874_v31 = vpop.f32.mrb[9].mxu1  ;;  %v7810_v46 = vadd.f32 %v10501_v59, %v10488_v38 }
 0x5ec   : > { %v10504_v60 = vpop.f32.mrb[10].mxu1  ;;  %v7811_v33 = vadd.f32 %v10488_v38, %v5874_v31 }
 0x5ed   : > { %6086 = vxpose.xlu0.b32.cont [6/16] (narrow) %v6054_v32, 8  ;;  %v5877_v44 = vpop.f32.mrb[11].mxu1  ;;  %v7812_v0 = vadd.f32 %v10504_v60, %v10488_v38  ;;  %vm5999_vm2 = vcmp.ge.f32.partialorder %v7810_v46, 0.0  ;;  %v6031_v29 = vmul.f32 0.01, %v7810_v46 }
 0x5ee   : > { %v7813_v2 = vadd.f32 %v10488_v38, %v5877_v44  ;;  %v6029_v35 = vmul.f32 0.01, %v7811_v33  ;;  %vm5997_vm15 = vcmp.ge.f32.partialorder %v7811_v33, 0.0 }
 0x5ef   : > { %v6063_v44 = vsel %vm5999_vm2, %v7810_v46, %v6031_v29  ;;  %v6032_v26 = vmul.f32 0.01, %v7812_v0  ;;  %vm6000_vm4 = vcmp.ge.f32.partialorder %v7812_v0, 0.0 }
 0x5f0   : > { %v6061_v21 = vsel %vm5997_vm15, %v7811_v33, %v6029_v35  ;;  %v6030_v56 = vmul.f32 0.01, %v7813_v2  ;;  %vm5998_vm0 = vcmp.ge.f32.partialorder %v7813_v2, 0.0 }
 0x5f1   : > { %6087 = vxpose.xlu0.b32.cont [7/16] (narrow) %v6055_v36, 8 }
 0x5f2   : > { %v7732_v20 = vpop.f32.mrb[12].mxu1  ;;  %v6062_v31 = vsel %vm5998_vm0, %v7813_v2, %v6030_v56 }
 0x5f3   : > { %v5890_v39 = vpop.f32.mrb[13].mxu1  ;;  %v7814_v45 = vadd.f32 %v7732_v20, %v10488_v38 }
 0x5f4   : > { %v7815_v47 = vadd.f32 %v10488_v38, %v5890_v39  ;;  %v7733_v50 = vpop.f32.mrb[14].mxu1  ;;  %v6064_v39 = vsel %vm6000_vm4, %v7812_v0, %v6032_v26 }
 0x5f5   : > { %6088 = vxpose.xlu0.b32.cont [8/16] (narrow) %v6056_v61, 8  ;;  %v5893_v43 = vpop.f32.mrb[15].mxu1  ;;  %v7816_v10 = vadd.f32 %v7733_v50, %v10488_v38  ;;  %v6035_v17 = vmul.f32 0.01, %v7814_v45  ;;  %vm6003_vm11 = vcmp.ge.f32.partialorder %v7814_v45, 0.0 }
 0x5f6   : > { %v7817_v54 = vadd.f32 %v10488_v38, %v5893_v43  ;;  %vm6001_vm7 = vcmp.ge.f32.partialorder %v7815_v47, 0.0  ;;  %v6033_v1 = vmul.f32 0.01, %v7815_v47 }
 0x5f7   : > { %v6067_v19 = vsel %vm6003_vm11, %v7814_v45, %v6035_v17  ;;  %v6036_v42 = vmul.f32 0.01, %v7816_v10  ;;  %vm6004_vm13 = vcmp.ge.f32.partialorder %v7816_v10, 0.0 }
 0x5f8   : > { %v6065_v23 = vsel %vm6001_vm7, %v7815_v47, %v6033_v1  ;;  %v6034_v51 = vmul.f32 0.01, %v7817_v54  ;;  %vm6002_vm9 = vcmp.ge.f32.partialorder %v7817_v54, 0.0 }
 0x5f9   : > { %6089 = vxpose.xlu0.b32.cont [9/16] (narrow) %v6057_v37, 8  ;;  %6113 = vxpose.xlu1.b32.start [1/16] (narrow) %v6065_v23, 8  ;;  %v6068_v55 = vsel %vm6004_vm13, %v7816_v10, %v6036_v42 }
 0x5fa   : > { %v7736_v4 = vpop.f32.mrb[16].mxu1  ;;  %v6066_v16 = vsel %vm6002_vm9, %v7817_v54, %v6034_v51 }
 0x5fb   : > { %v5906_v40 = vpop.f32.mrb[17].mxu1  ;;  %v7818_v53 = vadd.f32 %v7736_v4, %v10488_v38 }
 0x5fc   : > { %v7737_v57 = vpop.f32.mrb[18].mxu1  ;;  %v7819_v52 = vadd.f32 %v10488_v38, %v5906_v40 }
 0x5fd   : > { %6090 = vxpose.xlu0.b32.cont [10/16] (narrow) %v6058_v25, 8  ;;  %6114 = vxpose.xlu1.b32.cont [2/16] (narrow) %v6066_v16, 8  ;;  %v5909_v11 = vpop.f32.mrb[19].mxu1  ;;  %v7820_v9 = vadd.f32 %v7737_v57, %v10488_v38  ;;  %v6039_v32 = vmul.f32 0.01, %v7818_v53  ;;  %vm6007_vm3 = vcmp.ge.f32.partialorder %v7818_v53, 0.0 }
 0x5fe   : > { %v7821_v8 = vadd.f32 %v10488_v38, %v5909_v11  ;;  %v6037_v63 = vmul.f32 0.01, %v7819_v52  ;;  %vm6005_vm14 = vcmp.ge.f32.partialorder %v7819_v52, 0.0 }
 0x5ff   : > { %v6071_v36 = vsel %vm6007_vm3, %v7818_v53, %v6039_v32  ;;  %v6040_v20 = vmul.f32 0.01, %v7820_v9  ;;  %vm6008_vm5 = vcmp.ge.f32.partialorder %v7820_v9, 0.0 }
 0x600   : > { %v6069_v5 = vsel %vm6005_vm14, %v7819_v52, %v6037_v63  ;;  %v6038_v12 = vmul.f32 0.01, %v7821_v8  ;;  %vm6006_vm1 = vcmp.ge.f32.partialorder %v7821_v8, 0.0 }
 0x601   : > { %6091 = vxpose.xlu0.b32.cont [11/16] (narrow) %v6059_v14, 8  ;;  %6115 = vxpose.xlu1.b32.cont [3/16] (narrow) %v6067_v19, 8  ;;  %v6072_v62 = vsel %vm6008_vm5, %v7820_v9, %v6040_v20 }
 0x602   : > { %v7740_v22 = vpop.f32.mrb[20].mxu1  ;;  %v6070_v48 = vsel %vm6006_vm1, %v7821_v8, %v6038_v12 }
 0x603   : > { %v5922_v15 = vpop.f32.mrb[21].mxu1  ;;  %v7822_v47 = vadd.f32 %v7740_v22, %v10488_v38 }
 0x604   : > { %v7741_v41 = vpop.f32.mrb[22].mxu1  ;;  %v7823_v3 = vadd.f32 %v10488_v38, %v5922_v15 }
 0x605   : > { %6092 = vxpose.xlu0.b32.cont [12/16] (narrow) %v6060_v28, 8  ;;  %6116 = vxpose.xlu1.b32.cont [4/16] (narrow) %v6068_v55, 8  ;;  %v5925_v49 = vpop.f32.mrb[23].mxu1  ;;  %v7824_v43 = vadd.f32 %v7741_v41, %v10488_v38  ;;  %v6043_v1 = vmul.f32 0.01, %v7822_v47  ;;  %vm6011_vm8 = vcmp.ge.f32.partialorder %v7822_v47, 0.0 }
 0x606   : > { %v7825_v60 = vadd.f32 %v10488_v38, %v5925_v49  ;;  %v6041_v18 = vmul.f32 0.01, %v7823_v3  ;;  %vm6009_vm6 = vcmp.ge.f32.partialorder %v7823_v3, 0.0 }
 0x607   : > { %v6075_v37 = vsel %vm6011_vm8, %v7822_v47, %v6043_v1  ;;  %v6044_v45 = vmul.f32 0.01, %v7824_v43  ;;  %vm6012_vm9 = vcmp.ge.f32.partialorder %v7824_v43, 0.0 }
 0x608   : > { %v6073_v50 = vsel %vm6009_vm6, %v7823_v3, %v6041_v18  ;;  %v6042_v61 = vmul.f32 0.01, %v7825_v60  ;;  %vm6010_vm7 = vcmp.ge.f32.partialorder %v7825_v60, 0.0 }
 0x609   : > { %6093 = vxpose.xlu0.b32.cont [13/16] (narrow) %v6061_v21, 8  ;;  %6117 = vxpose.xlu1.b32.cont [5/16] (narrow) %v6069_v5, 8  ;;  %v6076_v34 = vsel %vm6012_vm9, %v7824_v43, %v6044_v45 }
 0x60a   : > { %v7744_v24 = vpop.f32.mrb[24].mxu1  ;;  %v6074_v54 = vsel %vm6010_vm7, %v7825_v60, %v6042_v61 }
 0x60b   : > { %v5938_v13 = vpop.f32.mrb[25].mxu1  ;;  %v7826_v4 = vadd.f32 %v7744_v24, %v10488_v38 }
 0x60c   : > { %v7745_v59 = vpop.f32.mrb[26].mxu1  ;;  %v7827_v58 = vadd.f32 %v10488_v38, %v5938_v13 }
 0x60d   : > { %6094 = vxpose.xlu0.b32.cont [14/16] (narrow) %v6062_v31, 8  ;;  %6118 = vxpose.xlu1.b32.cont [6/16] (narrow) %v6070_v48, 8  ;;  %v5941_v7 = vpop.f32.mrb[27].mxu1  ;;  %v7828_v30 = vadd.f32 %v7745_v59, %v10488_v38  ;;  %v6047_v57 = vmul.f32 0.01, %v7826_v4  ;;  %vm6015_vm12 = vcmp.ge.f32.partialorder %v7826_v4, 0.0 }
 0x60e   : > { %v7829_v23 = vadd.f32 %v10488_v38, %v5941_v7  ;;  %v6045_v51 = vmul.f32 0.01, %v7827_v58  ;;  %vm6013_vm10 = vcmp.ge.f32.partialorder %v7827_v58, 0.0 }
 0x60f   : > { %v6079_v25 = vsel %vm6015_vm12, %v7826_v4, %v6047_v57  ;;  %v6048_v16 = vmul.f32 0.01, %v7828_v30  ;;  %vm6016_vm13 = vcmp.ge.f32.partialorder %v7828_v30, 0.0 }
 0x610   : > { %v6077_v27 = vsel %vm6013_vm10, %v7827_v58, %v6045_v51  ;;  %v6046_v40 = vmul.f32 0.01, %v7829_v23  ;;  %vm6014_vm11 = vcmp.ge.f32.partialorder %v7829_v23, 0.0 }
 0x611   : > { %6095 = vxpose.xlu0.b32.cont [15/16] (narrow) %v6063_v44, 8  ;;  %6119 = vxpose.xlu1.b32.cont [7/16] (narrow) %v6071_v36, 8  ;;  %v6080_v17 = vsel %vm6016_vm13, %v7828_v30, %v6048_v16 }
 0x612   : > { %v6078_v10 = vsel %vm6014_vm11, %v7829_v23, %v6046_v40 }
 0x615   : > { %6096 = vxpose.xlu0.b32.end [16/16] (narrow) %v6064_v39, 8  ;;  %6120 = vxpose.xlu1.b32.cont [8/16] (narrow) %v6072_v62, 8 }
 0x619   : > { %6121 = vxpose.xlu1.b32.cont [9/16] (narrow) %v6073_v50, 8 }
 0x61d   : > { %6122 = vxpose.xlu1.b32.cont [10/16] (narrow) %v6074_v54, 8 }
 0x621   : > { %6123 = vxpose.xlu1.b32.cont [11/16] (narrow) %v6075_v37, 8 }
 0x625   : > { %6124 = vxpose.xlu1.b32.cont [12/16] (narrow) %v6076_v34, 8 }
 0x629   : > { %6125 = vxpose.xlu1.b32.cont [13/16] (narrow) %v6077_v27, 8 }
 0x62d   : > { %6126 = vxpose.xlu1.b32.cont [14/16] (narrow) %v6078_v10, 8 }
 0x631   : > { %6127 = vxpose.xlu1.b32.cont [15/16] (narrow) %v6079_v25, 8 }
 0x635   : > { %6128 = vxpose.xlu1.b32.end [16/16] (narrow) %v6080_v17, 8 }
 0x659   : > { %v6097_v11 = vpop.trf.xlu0 }
 0x65a   : > { %6145 = vst [vmem:[%s224_s7] sm:$0xff] %v6097_v11 }
 0x679   : > { %v6129_v33 = vpop.trf.xlu1 }
 0x67a   : > { %6146 = vst [vmem:[%s224_s7 + $0x8] sm:$0xff] %v6129_v33 }
 0x67b PF: > { %s15_s18 = sadd.s32 1, %s8466_s18  }
 0x67c   : > { %p12_p4 = scmp.ge.s32.totalorder %s15_s18, 4  }
 0x67e   :  { %14 = sbr.rel (!%p12_p4) target bundleno = 1 (0x1), region = 86 }

</bundles_post_ra>
